<compile_context>
chip_gen: v6e
topology: v6e:2x2x1
jax: 0.10.0
libtpu: 0.0.40
codegen_flags: <defaults>
</compile_context>

<pallas_src>
import functools

import jax
import jax.numpy as jnp
from jax import lax
from jax.experimental import pallas as pl

F32 = jnp.float32
_EPS_NORM = 1e-12   # torch.nn.functional.normalize default eps
_EPS_BN = 1e-5      # nn.BatchNorm1d default eps


# ----------------------------------------------------------------------------
# Kernels
# ----------------------------------------------------------------------------
def sobel_kernel(xp_ref, o_ref):
    # xp_ref: [B, 3, H+2, W+2] zero-padded RGB batch (whole batch, one invocation)
    # o_ref : [B, 2, H, W]     sobel output (channel 0: Gx, channel 1: Gy)
    B = o_ref.shape[0]
    H = o_ref.shape[2]
    W = o_ref.shape[3]
    # grayscale 1x1 conv: all weights 1/3, bias 0
    gray = (xp_ref[:, 0] + xp_ref[:, 1] + xp_ref[:, 2]) * (1.0 / 3.0)   # [B, H+2, W+2]
    wx = ((1.0, 0.0, -1.0), (2.0, 0.0, -2.0), (1.0, 0.0, -1.0))
    wy = ((1.0, 2.0, 1.0), (0.0, 0.0, 0.0), (-1.0, -2.0, -1.0))
    gx = jnp.zeros((B, H, W), F32)
    gy = jnp.zeros((B, H, W), F32)
    for dy in range(3):
        for dx in range(3):
            if wx[dy][dx] == 0.0 and wy[dy][dx] == 0.0:
                continue
            win = gray[:, dy:dy + H, dx:dx + W]
            if wx[dy][dx] != 0.0:
                gx = gx + wx[dy][dx] * win
            if wy[dy][dx] != 0.0:
                gy = gy + wy[dy][dx] * win
    o_ref[:, 0] = gx
    o_ref[:, 1] = gy


def _fused_dense_kernel(*refs, n_inputs, n_transforms, out_dim, n_clusters,
                        normalize):
    # Inputs : x_0..x_{n-1}, w_0..w_{n-1}, b_bb, w_nce, b_nce,
    #          w1, b1, gamma, beta, w2, b2, proto [K,d], proto_t [d,K], (t_stack [d,T*d])
    # Outputs: backbone_out [B,nbo], clust_head [B,d], cTz [B,K], (rand [T,B,K])
    i = 0
    xs = refs[i:i + n_inputs]; i += n_inputs
    ws = refs[i:i + n_inputs]; i += n_inputs
    (b_bb_ref, w_nce_ref, b_nce_ref, w1_ref, b1_ref, g_ref, be_ref,
     w2_ref, b2_ref, proto_ref, proto_t_ref) = refs[i:i + 11]
    i += 11
    t_stack_ref = None
    if n_transforms > 0:
        t_stack_ref = refs[i]; i += 1
    bb_out_ref = refs[i]
    clust_ref = refs[i + 1]
    ctz_ref = refs[i + 2]
    rand_ref = refs[i + 3] if n_transforms > 0 else None

    # --- synthetic backbone: concat([rgb, sobel], dim=1).flatten() @ W_bb + b ---
    feat = b_bb_ref[...]
    for x_ref, w_ref in zip(xs, ws):
        feat = feat + jnp.dot(x_ref[...], w_ref[...], preferred_element_type=F32)
    bb_out_ref[...] = (jnp.dot(feat, w_nce_ref[...], preferred_element_type=F32)
                       + b_nce_ref[...])

    # --- projection head: Linear -> BatchNorm1d (batch stats, biased var) -> ReLU -> Linear ---
    # NOTE: the whole batch lives in one block, so batch statistics match nn.BatchNorm1d.
    h = jnp.dot(feat, w1_ref[...], preferred_element_type=F32) + b1_ref[...]
    mu = jnp.mean(h, axis=0, keepdims=True)
    var = jnp.mean((h - mu) * (h - mu), axis=0, keepdims=True)
    h = (h - mu) * lax.rsqrt(var + _EPS_BN)
    h = h * g_ref[...] + be_ref[...]
    h = jnp.maximum(h, 0.0)
    z = jnp.dot(h, w2_ref[...], preferred_element_type=F32) + b2_ref[...]   # temp_1
    clust_ref[...] = z

    eps2 = _EPS_NORM * _EPS_NORM

    # --- random transforms on UN-normalized temp_1 (as in the module) ---
    if n_transforms > 0:
        zt_all = jnp.dot(z, t_stack_ref[...], preferred_element_type=F32)          # [B, T*d]
        ct_all = jnp.dot(proto_ref[...], t_stack_ref[...], preferred_element_type=F32)  # [K, T*d]
        for t in range(n_transforms):
            zt = zt_all[:, t * out_dim:(t + 1) * out_dim]
            ct = ct_all[:, t * out_dim:(t + 1) * out_dim]
            zt = zt * lax.rsqrt(jnp.maximum(jnp.sum(zt * zt, axis=1, keepdims=True), eps2))
            ct = ct * lax.rsqrt(jnp.maximum(jnp.sum(ct * ct, axis=1, keepdims=True), eps2))
            rand_ref[t] = lax.dot_general(zt, ct, (((1,), (1,)), ((), ())),
                                          preferred_element_type=F32)

    # --- (optional) normalize + prototypes ---
    zn = z
    if normalize:
        zn = z * lax.rsqrt(jnp.maximum(jnp.sum(z * z, axis=1, keepdims=True), eps2))
    ctz_ref[...] = jnp.dot(zn, proto_t_ref[...], preferred_element_type=F32)


# ----------------------------------------------------------------------------
# Pallas wrappers
# ----------------------------------------------------------------------------
def sobel_pallas(batch):
    B, C, H, W = batch.shape
    xp = jnp.pad(batch, ((0, 0), (0, 0), (1, 1), (1, 1)))   # pad=1; single tiny wrapper op
    return pl.pallas_call(
        sobel_kernel,
        out_shape=jax.ShapeDtypeStruct((B, 2, H, W), F32),
    )(xp)


def fused_dense_pallas(x_parts, w_parts, params, *, n_transforms, normalize):
    B = x_parts[0].shape[0]
    out_dim = params["w2"].shape[1]
    n_clusters = params["proto"].shape[0]
    nbo = params["w_nce"].shape[1]
    kernel = functools.partial(
        _fused_dense_kernel,
        n_inputs=len(x_parts), n_transforms=n_transforms,
        out_dim=out_dim, n_clusters=n_clusters, normalize=normalize)
    out_shape = [
        jax.ShapeDtypeStruct((B, nbo), F32),                      # backbone_out
        jax.ShapeDtypeStruct((B, out_dim), F32),                  # clust_head (temp_1)
        jax.ShapeDtypeStruct((B, n_clusters), F32),               # cTz
    ]
    if n_transforms > 0:
        out_shape.append(jax.ShapeDtypeStruct((n_transforms, B, n_clusters), F32))
    args = list(x_parts) + list(w_parts) + [
        params["b_bb"], params["w_nce"], params["b_nce"],
        params["w1"], params["b1"], params["bn_gamma"], params["bn_beta"],
        params["w2"], params["b2"], params["proto"], params["proto_t"]]
    if n_transforms > 0:
        args.append(params["t_stack"])
    return pl.pallas_call(kernel, out_shape=tuple(out_shape))(*args)


# ----------------------------------------------------------------------------
# Unsup forward
# ----------------------------------------------------------------------------
def init_params(key, *, in_hw, hidden_mlp, out_dim, n_clusters,
                backbone_out_dim, n_transforms, use_sobel, include_rgb):
    H, W = in_hw
    proj_head_indim = 512  # arch='resnet18'
    ks = jax.random.split(key, 8)
    s = 0.02
    p = {}
    # synthetic backbone (stand-in for the external NCE module), pre-transposed [in, out]
    if (not use_sobel) or include_rgb:
        p["w_bb_rgb"] = jax.random.normal(ks[0], (3 * H * W, proj_head_indim), F32) * s
    if use_sobel:
        p["w_bb_sob"] = jax.random.normal(ks[6], (2 * H * W, proj_head_indim), F32) * s
    p["b_bb"] = jnp.zeros((1, proj_head_indim), F32)
    p["w_nce"] = jax.random.normal(ks[1], (proj_head_indim, backbone_out_dim), F32) * s
    p["b_nce"] = jnp.zeros((1, backbone_out_dim), F32)
    # projection head: Linear(512, hidden) + BN + ReLU + Linear(hidden, out_dim)
    p["w1"] = jax.random.normal(ks[2], (proj_head_indim, hidden_mlp), F32) * s
    p["b1"] = jnp.zeros((1, hidden_mlp), F32)
    p["bn_gamma"] = jnp.ones((1, hidden_mlp), F32)
    p["bn_beta"] = jnp.zeros((1, hidden_mlp), F32)
    p["w2"] = jax.random.normal(ks[3], (hidden_mlp, out_dim), F32) * s
    p["b2"] = jnp.zeros((1, out_dim), F32)
    # prototypes: nn.Linear(out_dim, n_clusters, bias=False)
    p["proto"] = jax.random.normal(ks[4], (n_clusters, out_dim), F32) * s   # [K, d]
    p["proto_t"] = jnp.transpose(p["proto"])                                # [d, K] pre-transposed
    # random transforms, stacked pre-transposed: columns = [T0^T | T1^T | ...]
    if n_transforms > 0:
        tr = jax.random.normal(ks[5], (n_transforms, out_dim, out_dim), F32) * s
        p["t_stack"] = jnp.concatenate([tr[t].T for t in range(n_transforms)], axis=1)
    return p


def _unsup_forward(batch, params, *, use_sobel=True, include_rgb=True,
                   normalize=True, n_transforms=0):
    B = batch.shape[0]
    x_parts, w_parts = [], []
    if use_sobel:
        temp_batch = sobel_pallas(batch)                     # [B, 2, H, W]
        if include_rgb:
            x_parts.append(batch.reshape(B, -1))             # contiguous -> bitcast reshape
            w_parts.append(params["w_bb_rgb"])
        x_parts.append(temp_batch.reshape(B, -1))
        w_parts.append(params["w_bb_sob"])
    else:
        x_parts.append(batch.reshape(B, -1))
        w_parts.append(params["w_bb_rgb"])

    outs = fused_dense_pallas(x_parts, w_parts, params,
                              n_transforms=n_transforms, normalize=normalize)
    if n_transforms > 0:
        backbone_out, temp_1, ctz, rand_stack = outs
        rand_out = [{"cTz": rand_stack[t]} for t in range(n_transforms)]
    else:
        backbone_out, temp_1, ctz = outs
        rand_out = []

    output = {"clust_head": temp_1,   # .clone().detach() is a no-op here
              "cTz": ctz}
    return backbone_out, output, rand_out


unsup_forward = jax.jit(
    _unsup_forward,
    static_argnames=("use_sobel", "include_rgb", "normalize", "n_transforms"))


# ----------------------------------------------------------------------------
if __name__ == "__main__":
    key = jax.random.PRNGKey(0)
    k_data, k_params = jax.random.split(key)

    B, C, H, W = 4, 3, 16, 16
    hidden_mlp, out_dim, n_clusters = 128, 64, 16
    backbone_out_dim, n_transforms = 32, 2

    batch = jax.random.normal(k_data, (B, C, H, W), F32)     # NCHW, like PyTorch
    params = init_params(k_params, in_hw=(H, W), hidden_mlp=hidden_mlp,
                         out_dim=out_dim, n_clusters=n_clusters,
                         backbone_out_dim=backbone_out_dim,
                         n_transforms=n_transforms,
                         use_sobel=True, include_rgb=True)

    backbone_out, output, rand_out = unsup_forward(
        batch, params, use_sobel=True, include_rgb=True, normalize=True,
        n_transforms=n_transforms)

    jax.block_until_ready(backbone_out)
    jax.block_until_ready(output["clust_head"])
    jax.block_until_ready(output["cTz"])
    for r in rand_out:
        jax.block_until_ready(r["cTz"])

    assert backbone_out.shape == (B, backbone_out_dim)
    assert output["clust_head"].shape == (B, out_dim)
    assert output["cTz"].shape == (B, n_clusters)
    assert len(rand_out) == n_transforms
    assert all(r["cTz"].shape == (B, n_clusters) for r in rand_out)

    print("KERNEL_OK")
</pallas_src>

<mosaic_0001>
module attributes {stable_mosaic.version = 11 : i64} {
  func.func @_fused_dense_kernel(%arg0: memref<4x768xf32, #tpu.memory_space<vmem>>, %arg1: memref<4x512xf32, #tpu.memory_space<vmem>>, %arg2: memref<768x512xf32, #tpu.memory_space<vmem>>, %arg3: memref<512x512xf32, #tpu.memory_space<vmem>>, %arg4: memref<1x512xf32, #tpu.memory_space<vmem>>, %arg5: memref<512x32xf32, #tpu.memory_space<vmem>>, %arg6: memref<1x32xf32, #tpu.memory_space<vmem>>, %arg7: memref<512x128xf32, #tpu.memory_space<vmem>>, %arg8: memref<1x128xf32, #tpu.memory_space<vmem>>, %arg9: memref<1x128xf32, #tpu.memory_space<vmem>>, %arg10: memref<1x128xf32, #tpu.memory_space<vmem>>, %arg11: memref<128x64xf32, #tpu.memory_space<vmem>>, %arg12: memref<1x64xf32, #tpu.memory_space<vmem>>, %arg13: memref<16x64xf32, #tpu.memory_space<vmem>>, %arg14: memref<64x16xf32, #tpu.memory_space<vmem>>, %arg15: memref<64x128xf32, #tpu.memory_space<vmem>>, %arg16: memref<4x32xf32, #tpu.memory_space<vmem>>, %arg17: memref<4x64xf32, #tpu.memory_space<vmem>>, %arg18: memref<4x16xf32, #tpu.memory_space<vmem>>, %arg19: memref<2x4x16xf32, #tpu.memory_space<vmem>>) attributes {dimension_semantics = [], scalar_prefetch = 0 : i64, scratch_operands = 0 : i64, tpu.core_type = #tpu.core_type<tc>} {
    %c0 = arith.constant 0 : index
    %c0_0 = arith.constant 0 : index
    %0 = vector.load %arg4[%c0, %c0_0] : memref<1x512xf32, #tpu.memory_space<vmem>>, vector<1x512xf32>
    %c0_1 = arith.constant 0 : index
    %c0_2 = arith.constant 0 : index
    %1 = vector.load %arg0[%c0_1, %c0_2] : memref<4x768xf32, #tpu.memory_space<vmem>>, vector<4x768xf32>
    %c0_3 = arith.constant 0 : index
    %c0_4 = arith.constant 0 : index
    %2 = vector.load %arg2[%c0_3, %c0_4] : memref<768x512xf32, #tpu.memory_space<vmem>>, vector<768x512xf32>
    %cst = arith.constant dense<0.000000e+00> : vector<4x512xf32>
    %3 = tpu.matmul %1, %2, %cst {dimension_numbers = #tpu.dot_dimension_numbers<[1], [0], [0], [1], [0, 0, 1, 1], [], []>} : vector<4x768xf32>, vector<768x512xf32>, vector<4x512xf32> -> vector<4x512xf32>
    %4 = vector.broadcast %0 : vector<1x512xf32> to vector<4x512xf32>
    %5 = arith.addf %4, %3 : vector<4x512xf32>
    %c0_5 = arith.constant 0 : index
    %c0_6 = arith.constant 0 : index
    %6 = vector.load %arg1[%c0_5, %c0_6] : memref<4x512xf32, #tpu.memory_space<vmem>>, vector<4x512xf32>
    %c0_7 = arith.constant 0 : index
    %c0_8 = arith.constant 0 : index
    %7 = vector.load %arg3[%c0_7, %c0_8] : memref<512x512xf32, #tpu.memory_space<vmem>>, vector<512x512xf32>
    %cst_9 = arith.constant dense<0.000000e+00> : vector<4x512xf32>
    %8 = tpu.matmul %6, %7, %cst_9 {dimension_numbers = #tpu.dot_dimension_numbers<[1], [0], [0], [1], [0, 0, 1, 1], [], []>} : vector<4x512xf32>, vector<512x512xf32>, vector<4x512xf32> -> vector<4x512xf32>
    %9 = arith.addf %5, %8 : vector<4x512xf32>
    %c0_10 = arith.constant 0 : index
    %c0_11 = arith.constant 0 : index
    %10 = vector.load %arg5[%c0_10, %c0_11] : memref<512x32xf32, #tpu.memory_space<vmem>>, vector<512x32xf32>
    %cst_12 = arith.constant dense<0.000000e+00> : vector<4x32xf32>
    %11 = tpu.matmul %9, %10, %cst_12 {dimension_numbers = #tpu.dot_dimension_numbers<[1], [0], [0], [1], [0, 0, 1, 1], [], []>} : vector<4x512xf32>, vector<512x32xf32>, vector<4x32xf32> -> vector<4x32xf32>
    %c0_13 = arith.constant 0 : index
    %c0_14 = arith.constant 0 : index
    %12 = vector.load %arg6[%c0_13, %c0_14] : memref<1x32xf32, #tpu.memory_space<vmem>>, vector<1x32xf32>
    %13 = vector.broadcast %12 : vector<1x32xf32> to vector<4x32xf32>
    %14 = arith.addf %11, %13 : vector<4x32xf32>
    %c0_15 = arith.constant 0 : index
    %c0_16 = arith.constant 0 : index
    %15 = vector.load %arg16[%c0_15, %c0_16] : memref<4x32xf32, #tpu.memory_space<vmem>>, vector<4x32xf32>
    tpu.vector_store %arg16[%c0_15, %c0_16], %14 {strides = array<i32>} : memref<4x32xf32, #tpu.memory_space<vmem>>, vector<4x32xf32>,
    %c0_17 = arith.constant 0 : index
    %c0_18 = arith.constant 0 : index
    %16 = vector.load %arg7[%c0_17, %c0_18] : memref<512x128xf32, #tpu.memory_space<vmem>>, vector<512x128xf32>
    %cst_19 = arith.constant dense<0.000000e+00> : vector<4x128xf32>
    %17 = tpu.matmul %9, %16, %cst_19 {dimension_numbers = #tpu.dot_dimension_numbers<[1], [0], [0], [1], [0, 0, 1, 1], [], []>} : vector<4x512xf32>, vector<512x128xf32>, vector<4x128xf32> -> vector<4x128xf32>
    %c0_20 = arith.constant 0 : index
    %c0_21 = arith.constant 0 : index
    %18 = vector.load %arg8[%c0_20, %c0_21] : memref<1x128xf32, #tpu.memory_space<vmem>>, vector<1x128xf32>
    %19 = vector.broadcast %18 : vector<1x128xf32> to vector<4x128xf32>
    %20 = arith.addf %17, %19 : vector<4x128xf32>
    %cst_22 = arith.constant dense<0.000000e+00> : vector<128xf32>
    %21 = vector.multi_reduction <add>, %20, %cst_22 [0] : vector<4x128xf32> to vector<128xf32>
    %22 = vector.shape_cast %21 : vector<128xf32> to vector<1x128xf32>
    %cst_23 = arith.constant 4.000000e+00 : f32
    %23 = vector.broadcast %cst_23 : f32 to vector<1x128xf32>
    %24 = arith.divf %22, %23 : vector<1x128xf32>
    %25 = vector.broadcast %24 : vector<1x128xf32> to vector<4x128xf32>
    %26 = arith.subf %20, %25 : vector<4x128xf32>
    %27 = vector.broadcast %24 : vector<1x128xf32> to vector<4x128xf32>
    %28 = arith.subf %20, %27 : vector<4x128xf32>
    %29 = arith.mulf %26, %28 : vector<4x128xf32>
    %cst_24 = arith.constant dense<0.000000e+00> : vector<128xf32>
    %30 = vector.multi_reduction <add>, %29, %cst_24 [0] : vector<4x128xf32> to vector<128xf32>
    %31 = vector.shape_cast %30 : vector<128xf32> to vector<1x128xf32>
    %cst_25 = arith.constant 4.000000e+00 : f32
    %32 = vector.broadcast %cst_25 : f32 to vector<1x128xf32>
    %33 = arith.divf %31, %32 : vector<1x128xf32>
    %34 = vector.broadcast %24 : vector<1x128xf32> to vector<4x128xf32>
    %35 = arith.subf %20, %34 : vector<4x128xf32>
    %cst_26 = arith.constant 9.99999974E-6 : f32
    %36 = vector.broadcast %cst_26 : f32 to vector<1x128xf32>
    %37 = arith.addf %33, %36 : vector<1x128xf32>
    %38 = math.rsqrt %37 : vector<1x128xf32>
    %39 = vector.broadcast %38 : vector<1x128xf32> to vector<4x128xf32>
    %40 = arith.mulf %35, %39 : vector<4x128xf32>
    %c0_27 = arith.constant 0 : index
    %c0_28 = arith.constant 0 : index
    %41 = vector.load %arg9[%c0_27, %c0_28] : memref<1x128xf32, #tpu.memory_space<vmem>>, vector<1x128xf32>
    %42 = vector.broadcast %41 : vector<1x128xf32> to vector<4x128xf32>
    %43 = arith.mulf %40, %42 : vector<4x128xf32>
    %c0_29 = arith.constant 0 : index
    %c0_30 = arith.constant 0 : index
    %44 = vector.load %arg10[%c0_29, %c0_30] : memref<1x128xf32, #tpu.memory_space<vmem>>, vector<1x128xf32>
    %45 = vector.broadcast %44 : vector<1x128xf32> to vector<4x128xf32>
    %46 = arith.addf %43, %45 : vector<4x128xf32>
    %cst_31 = arith.constant 0.000000e+00 : f32
    %47 = vector.broadcast %cst_31 : f32 to vector<4x128xf32>
    %48 = arith.maximumf %46, %47 : vector<4x128xf32>
    %c0_32 = arith.constant 0 : index
    %c0_33 = arith.constant 0 : index
    %49 = vector.load %arg11[%c0_32, %c0_33] : memref<128x64xf32, #tpu.memory_space<vmem>>, vector<128x64xf32>
    %cst_34 = arith.constant dense<0.000000e+00> : vector<4x64xf32>
    %50 = tpu.matmul %48, %49, %cst_34 {dimension_numbers = #tpu.dot_dimension_numbers<[1], [0], [0], [1], [0, 0, 1, 1], [], []>} : vector<4x128xf32>, vector<128x64xf32>, vector<4x64xf32> -> vector<4x64xf32>
    %c0_35 = arith.constant 0 : index
    %c0_36 = arith.constant 0 : index
    %51 = vector.load %arg12[%c0_35, %c0_36] : memref<1x64xf32, #tpu.memory_space<vmem>>, vector<1x64xf32>
    %52 = vector.broadcast %51 : vector<1x64xf32> to vector<4x64xf32>
    %53 = arith.addf %50, %52 : vector<4x64xf32>
    %c0_37 = arith.constant 0 : index
    %c0_38 = arith.constant 0 : index
    %54 = vector.load %arg17[%c0_37, %c0_38] : memref<4x64xf32, #tpu.memory_space<vmem>>, vector<4x64xf32>
    tpu.vector_store %arg17[%c0_37, %c0_38], %53 {strides = array<i32>} : memref<4x64xf32, #tpu.memory_space<vmem>>, vector<4x64xf32>,
    %c0_39 = arith.constant 0 : index
    %c0_40 = arith.constant 0 : index
    %55 = vector.load %arg15[%c0_39, %c0_40] : memref<64x128xf32, #tpu.memory_space<vmem>>, vector<64x128xf32>
    %cst_41 = arith.constant dense<0.000000e+00> : vector<4x128xf32>
    %56 = tpu.matmul %53, %55, %cst_41 {dimension_numbers = #tpu.dot_dimension_numbers<[1], [0], [0], [1], [0, 0, 1, 1], [], []>} : vector<4x64xf32>, vector<64x128xf32>, vector<4x128xf32> -> vector<4x128xf32>
    %c0_42 = arith.constant 0 : index
    %c0_43 = arith.constant 0 : index
    %57 = vector.load %arg13[%c0_42, %c0_43] : memref<16x64xf32, #tpu.memory_space<vmem>>, vector<16x64xf32>
    %c0_44 = arith.constant 0 : index
    %c0_45 = arith.constant 0 : index
    %58 = vector.load %arg15[%c0_44, %c0_45] : memref<64x128xf32, #tpu.memory_space<vmem>>, vector<64x128xf32>
    %cst_46 = arith.constant dense<0.000000e+00> : vector<16x128xf32>
    %59 = tpu.matmul %57, %58, %cst_46 {dimension_numbers = #tpu.dot_dimension_numbers<[1], [0], [0], [1], [0, 0, 1, 1], [], []>} : vector<16x64xf32>, vector<64x128xf32>, vector<16x128xf32> -> vector<16x128xf32>
    %60 = vector.extract_strided_slice %56 {offsets = [0, 0], sizes = [4, 64], strides = [1, 1]} : vector<4x128xf32> to vector<4x64xf32>
    %61 = vector.extract_strided_slice %59 {offsets = [0, 0], sizes = [16, 64], strides = [1, 1]} : vector<16x128xf32> to vector<16x64xf32>
    %62 = arith.mulf %60, %60 : vector<4x64xf32>
    %cst_47 = arith.constant dense<0.000000e+00> : vector<4xf32>
    %63 = vector.multi_reduction <add>, %62, %cst_47 [1] : vector<4x64xf32> to vector<4xf32>
    %64 = vector.shape_cast %63 : vector<4xf32> to vector<4x1xf32>
    %cst_48 = arith.constant 1.000000e-24 : f32
    %65 = vector.broadcast %cst_48 : f32 to vector<4x1xf32>
    %66 = arith.maximumf %64, %65 : vector<4x1xf32>
    %67 = math.rsqrt %66 : vector<4x1xf32>
    %68 = vector.broadcast %67 : vector<4x1xf32> to vector<4x64xf32>
    %69 = arith.mulf %60, %68 : vector<4x64xf32>
    %70 = arith.mulf %61, %61 : vector<16x64xf32>
    %cst_49 = arith.constant dense<0.000000e+00> : vector<16xf32>
    %71 = vector.multi_reduction <add>, %70, %cst_49 [1] : vector<16x64xf32> to vector<16xf32>
    %72 = vector.shape_cast %71 : vector<16xf32> to vector<16x1xf32>
    %cst_50 = arith.constant 1.000000e-24 : f32
    %73 = vector.broadcast %cst_50 : f32 to vector<16x1xf32>
    %74 = arith.maximumf %72, %73 : vector<16x1xf32>
    %75 = math.rsqrt %74 : vector<16x1xf32>
    %76 = vector.broadcast %75 : vector<16x1xf32> to vector<16x64xf32>
    %77 = arith.mulf %61, %76 : vector<16x64xf32>
    %cst_51 = arith.constant dense<0.000000e+00> : vector<4x16xf32>
    %78 = tpu.matmul %69, %77, %cst_51 {dimension_numbers = #tpu.dot_dimension_numbers<[1], [1], [0], [0], [0, 0, 1, 0], [], []>} : vector<4x64xf32>, vector<16x64xf32>, vector<4x16xf32> -> vector<4x16xf32>
    %c0_52 = arith.constant 0 : index
    %c0_53 = arith.constant 0 : index
    %c0_54 = arith.constant 0 : index
    %79 = vector.load %arg19[%c0_52, %c0_53, %c0_54] : memref<2x4x16xf32, #tpu.memory_space<vmem>>, vector<1x4x16xf32>
    %80 = vector.shape_cast %79 : vector<1x4x16xf32> to vector<4x16xf32>
    %81 = vector.shape_cast %78 : vector<4x16xf32> to vector<1x4x16xf32>
    tpu.vector_store %arg19[%c0_52, %c0_53, %c0_54], %81 {strides = array<i32>} : memref<2x4x16xf32, #tpu.memory_space<vmem>>, vector<1x4x16xf32>,
    %82 = vector.extract_strided_slice %56 {offsets = [0, 64], sizes = [4, 64], strides = [1, 1]} : vector<4x128xf32> to vector<4x64xf32>
    %83 = vector.extract_strided_slice %59 {offsets = [0, 64], sizes = [16, 64], strides = [1, 1]} : vector<16x128xf32> to vector<16x64xf32>
    %84 = arith.mulf %82, %82 : vector<4x64xf32>
    %cst_55 = arith.constant dense<0.000000e+00> : vector<4xf32>
    %85 = vector.multi_reduction <add>, %84, %cst_55 [1] : vector<4x64xf32> to vector<4xf32>
    %86 = vector.shape_cast %85 : vector<4xf32> to vector<4x1xf32>
    %cst_56 = arith.constant 1.000000e-24 : f32
    %87 = vector.broadcast %cst_56 : f32 to vector<4x1xf32>
    %88 = arith.maximumf %86, %87 : vector<4x1xf32>
    %89 = math.rsqrt %88 : vector<4x1xf32>
    %90 = vector.broadcast %89 : vector<4x1xf32> to vector<4x64xf32>
    %91 = arith.mulf %82, %90 : vector<4x64xf32>
    %92 = arith.mulf %83, %83 : vector<16x64xf32>
    %cst_57 = arith.constant dense<0.000000e+00> : vector<16xf32>
    %93 = vector.multi_reduction <add>, %92, %cst_57 [1] : vector<16x64xf32> to vector<16xf32>
    %94 = vector.shape_cast %93 : vector<16xf32> to vector<16x1xf32>
    %cst_58 = arith.constant 1.000000e-24 : f32
    %95 = vector.broadcast %cst_58 : f32 to vector<16x1xf32>
    %96 = arith.maximumf %94, %95 : vector<16x1xf32>
    %97 = math.rsqrt %96 : vector<16x1xf32>
    %98 = vector.broadcast %97 : vector<16x1xf32> to vector<16x64xf32>
    %99 = arith.mulf %83, %98 : vector<16x64xf32>
    %cst_59 = arith.constant dense<0.000000e+00> : vector<4x16xf32>
    %100 = tpu.matmul %91, %99, %cst_59 {dimension_numbers = #tpu.dot_dimension_numbers<[1], [1], [0], [0], [0, 0, 1, 0], [], []>} : vector<4x64xf32>, vector<16x64xf32>, vector<4x16xf32> -> vector<4x16xf32>
    %c1 = arith.constant 1 : index
    %c0_60 = arith.constant 0 : index
    %c0_61 = arith.constant 0 : index
    %101 = vector.load %arg19[%c1, %c0_60, %c0_61] : memref<2x4x16xf32, #tpu.memory_space<vmem>>, vector<1x4x16xf32>
    %102 = vector.shape_cast %101 : vector<1x4x16xf32> to vector<4x16xf32>
    %103 = vector.shape_cast %100 : vector<4x16xf32> to vector<1x4x16xf32>
    tpu.vector_store %arg19[%c1, %c0_60, %c0_61], %103 {strides = array<i32>} : memref<2x4x16xf32, #tpu.memory_space<vmem>>, vector<1x4x16xf32>,
    %104 = arith.mulf %53, %53 : vector<4x64xf32>
    %cst_62 = arith.constant dense<0.000000e+00> : vector<4xf32>
    %105 = vector.multi_reduction <add>, %104, %cst_62 [1] : vector<4x64xf32> to vector<4xf32>
    %106 = vector.shape_cast %105 : vector<4xf32> to vector<4x1xf32>
    %cst_63 = arith.constant 1.000000e-24 : f32
    %107 = vector.broadcast %cst_63 : f32 to vector<4x1xf32>
    %108 = arith.maximumf %106, %107 : vector<4x1xf32>
    %109 = math.rsqrt %108 : vector<4x1xf32>
    %110 = vector.broadcast %109 : vector<4x1xf32> to vector<4x64xf32>
    %111 = arith.mulf %53, %110 : vector<4x64xf32>
    %c0_64 = arith.constant 0 : index
    %c0_65 = arith.constant 0 : index
    %112 = vector.load %arg14[%c0_64, %c0_65] : memref<64x16xf32, #tpu.memory_space<vmem>>, vector<64x16xf32>
    %cst_66 = arith.constant dense<0.000000e+00> : vector<4x16xf32>
    %113 = tpu.matmul %111, %112, %cst_66 {dimension_numbers = #tpu.dot_dimension_numbers<[1], [0], [0], [1], [0, 0, 1, 1], [], []>} : vector<4x64xf32>, vector<64x16xf32>, vector<4x16xf32> -> vector<4x16xf32>
    %c0_67 = arith.constant 0 : index
    %c0_68 = arith.constant 0 : index
    %114 = vector.load %arg18[%c0_67, %c0_68] : memref<4x16xf32, #tpu.memory_space<vmem>>, vector<4x16xf32>
    tpu.vector_store %arg18[%c0_67, %c0_68], %113 {strides = array<i32>} : memref<4x16xf32, #tpu.memory_space<vmem>>, vector<4x16xf32>,
    return
  }
}

module attributes {stable_mosaic.version = 11 : i64} {
  func.func @sobel_kernel(%arg0: memref<4x3x18x18xf32, #tpu.memory_space<vmem>>, %arg1: memref<4x2x16x16xf32, #tpu.memory_space<vmem>>) attributes {dimension_semantics = [], scalar_prefetch = 0 : i64, scratch_operands = 0 : i64, tpu.core_type = #tpu.core_type<tc>} {
    %c0 = arith.constant 0 : index
    %c0_0 = arith.constant 0 : index
    %c0_1 = arith.constant 0 : index
    %c0_2 = arith.constant 0 : index
    %0 = vector.load %arg0[%c0, %c0_0, %c0_1, %c0_2] : memref<4x3x18x18xf32, #tpu.memory_space<vmem>>, vector<4x1x18x18xf32>
    %1 = vector.shape_cast %0 : vector<4x1x18x18xf32> to vector<4x18x18xf32>
    %c0_3 = arith.constant 0 : index
    %c1 = arith.constant 1 : index
    %c0_4 = arith.constant 0 : index
    %c0_5 = arith.constant 0 : index
    %2 = vector.load %arg0[%c0_3, %c1, %c0_4, %c0_5] : memref<4x3x18x18xf32, #tpu.memory_space<vmem>>, vector<4x1x18x18xf32>
    %3 = vector.shape_cast %2 : vector<4x1x18x18xf32> to vector<4x18x18xf32>
    %4 = arith.addf %1, %3 : vector<4x18x18xf32>
    %c0_6 = arith.constant 0 : index
    %c2 = arith.constant 2 : index
    %c0_7 = arith.constant 0 : index
    %c0_8 = arith.constant 0 : index
    %5 = vector.load %arg0[%c0_6, %c2, %c0_7, %c0_8] : memref<4x3x18x18xf32, #tpu.memory_space<vmem>>, vector<4x1x18x18xf32>
    %6 = vector.shape_cast %5 : vector<4x1x18x18xf32> to vector<4x18x18xf32>
    %7 = arith.addf %4, %6 : vector<4x18x18xf32>
    %cst = arith.constant 0.333333343 : f32
    %8 = vector.broadcast %cst : f32 to vector<4x18x18xf32>
    %9 = arith.mulf %7, %8 : vector<4x18x18xf32>
    %cst_9 = arith.constant 0.000000e+00 : f32
    %10 = vector.broadcast %cst_9 : f32 to vector<4x16x16xf32>
    %cst_10 = arith.constant 0.000000e+00 : f32
    %11 = vector.broadcast %cst_10 : f32 to vector<4x16x16xf32>
    %12 = vector.extract_strided_slice %9 {offsets = [0, 0, 0], sizes = [4, 16, 16], strides = [1, 1, 1]} : vector<4x18x18xf32> to vector<4x16x16xf32>
    %cst_11 = arith.constant 1.000000e+00 : f32
    %13 = vector.broadcast %cst_11 : f32 to vector<4x16x16xf32>
    %14 = arith.mulf %13, %12 : vector<4x16x16xf32>
    %15 = arith.addf %10, %14 : vector<4x16x16xf32>
    %cst_12 = arith.constant 1.000000e+00 : f32
    %16 = vector.broadcast %cst_12 : f32 to vector<4x16x16xf32>
    %17 = arith.mulf %16, %12 : vector<4x16x16xf32>
    %18 = arith.addf %11, %17 : vector<4x16x16xf32>
    %19 = vector.extract_strided_slice %9 {offsets = [0, 0, 1], sizes = [4, 16, 16], strides = [1, 1, 1]} : vector<4x18x18xf32> to vector<4x16x16xf32>
    %cst_13 = arith.constant 2.000000e+00 : f32
    %20 = vector.broadcast %cst_13 : f32 to vector<4x16x16xf32>
    %21 = arith.mulf %20, %19 : vector<4x16x16xf32>
    %22 = arith.addf %18, %21 : vector<4x16x16xf32>
    %23 = vector.extract_strided_slice %9 {offsets = [0, 0, 2], sizes = [4, 16, 16], strides = [1, 1, 1]} : vector<4x18x18xf32> to vector<4x16x16xf32>
    %cst_14 = arith.constant -1.000000e+00 : f32
    %24 = vector.broadcast %cst_14 : f32 to vector<4x16x16xf32>
    %25 = arith.mulf %24, %23 : vector<4x16x16xf32>
    %26 = arith.addf %15, %25 : vector<4x16x16xf32>
    %cst_15 = arith.constant 1.000000e+00 : f32
    %27 = vector.broadcast %cst_15 : f32 to vector<4x16x16xf32>
    %28 = arith.mulf %27, %23 : vector<4x16x16xf32>
    %29 = arith.addf %22, %28 : vector<4x16x16xf32>
    %30 = vector.extract_strided_slice %9 {offsets = [0, 1, 0], sizes = [4, 16, 16], strides = [1, 1, 1]} : vector<4x18x18xf32> to vector<4x16x16xf32>
    %cst_16 = arith.constant 2.000000e+00 : f32
    %31 = vector.broadcast %cst_16 : f32 to vector<4x16x16xf32>
    %32 = arith.mulf %31, %30 : vector<4x16x16xf32>
    %33 = arith.addf %26, %32 : vector<4x16x16xf32>
    %34 = vector.extract_strided_slice %9 {offsets = [0, 1, 2], sizes = [4, 16, 16], strides = [1, 1, 1]} : vector<4x18x18xf32> to vector<4x16x16xf32>
    %cst_17 = arith.constant -2.000000e+00 : f32
    %35 = vector.broadcast %cst_17 : f32 to vector<4x16x16xf32>
    %36 = arith.mulf %35, %34 : vector<4x16x16xf32>
    %37 = arith.addf %33, %36 : vector<4x16x16xf32>
    %38 = vector.extract_strided_slice %9 {offsets = [0, 2, 0], sizes = [4, 16, 16], strides = [1, 1, 1]} : vector<4x18x18xf32> to vector<4x16x16xf32>
    %cst_18 = arith.constant 1.000000e+00 : f32
    %39 = vector.broadcast %cst_18 : f32 to vector<4x16x16xf32>
    %40 = arith.mulf %39, %38 : vector<4x16x16xf32>
    %41 = arith.addf %37, %40 : vector<4x16x16xf32>
    %cst_19 = arith.constant -1.000000e+00 : f32
    %42 = vector.broadcast %cst_19 : f32 to vector<4x16x16xf32>
    %43 = arith.mulf %42, %38 : vector<4x16x16xf32>
    %44 = arith.addf %29, %43 : vector<4x16x16xf32>
    %45 = vector.extract_strided_slice %9 {offsets = [0, 2, 1], sizes = [4, 16, 16], strides = [1, 1, 1]} : vector<4x18x18xf32> to vector<4x16x16xf32>
    %cst_20 = arith.constant -2.000000e+00 : f32
    %46 = vector.broadcast %cst_20 : f32 to vector<4x16x16xf32>
    %47 = arith.mulf %46, %45 : vector<4x16x16xf32>
    %48 = arith.addf %44, %47 : vector<4x16x16xf32>
    %49 = vector.extract_strided_slice %9 {offsets = [0, 2, 2], sizes = [4, 16, 16], strides = [1, 1, 1]} : vector<4x18x18xf32> to vector<4x16x16xf32>
    %cst_21 = arith.constant -1.000000e+00 : f32
    %50 = vector.broadcast %cst_21 : f32 to vector<4x16x16xf32>
    %51 = arith.mulf %50, %49 : vector<4x16x16xf32>
    %52 = arith.addf %41, %51 : vector<4x16x16xf32>
    %cst_22 = arith.constant -1.000000e+00 : f32
    %53 = vector.broadcast %cst_22 : f32 to vector<4x16x16xf32>
    %54 = arith.mulf %53, %49 : vector<4x16x16xf32>
    %55 = arith.addf %48, %54 : vector<4x16x16xf32>
    %c0_23 = arith.constant 0 : index
    %c0_24 = arith.constant 0 : index
    %c0_25 = arith.constant 0 : index
    %c0_26 = arith.constant 0 : index
    %56 = vector.load %arg1[%c0_23, %c0_24, %c0_25, %c0_26] : memref<4x2x16x16xf32, #tpu.memory_space<vmem>>, vector<4x1x16x16xf32>
    %57 = vector.shape_cast %56 : vector<4x1x16x16xf32> to vector<4x16x16xf32>
    %58 = vector.shape_cast %52 : vector<4x16x16xf32> to vector<4x1x16x16xf32>
    tpu.vector_store %arg1[%c0_23, %c0_24, %c0_25, %c0_26], %58 {strides = array<i32>} : memref<4x2x16x16xf32, #tpu.memory_space<vmem>>, vector<4x1x16x16xf32>,
    %c0_27 = arith.constant 0 : index
    %c1_28 = arith.constant 1 : index
    %c0_29 = arith.constant 0 : index
    %c0_30 = arith.constant 0 : index
    %59 = vector.load %arg1[%c0_27, %c1_28, %c0_29, %c0_30] : memref<4x2x16x16xf32, #tpu.memory_space<vmem>>, vector<4x1x16x16xf32>
    %60 = vector.shape_cast %59 : vector<4x1x16x16xf32> to vector<4x16x16xf32>
    %61 = vector.shape_cast %55 : vector<4x16x16xf32> to vector<4x1x16x16xf32>
    tpu.vector_store %arg1[%c0_27, %c1_28, %c0_29, %c0_30], %61 {strides = array<i32>} : memref<4x2x16x16xf32, #tpu.memory_space<vmem>>, vector<4x1x16x16xf32>,
    return
  }
}

</mosaic_0001>

<bundles_post_ra>
// kernel: _unsup_forward.2
= control target key start
LH: loop header
LB: loop body
LE: loop exit
PB: predicated region body
PF: predicated region fallthrough
CT: control target
= control target key end

     0   :  { %s580_s25 = smov 127   ;;  %s581_s5 = smov 126   ;;  %vm234_vm0 = vcmask 1046528   ;;  %vm351_vm1 = vcmask 1045504   ;;  %vm524_vm2 = vcmask 130048   ;;  %s1165_s0 = inlined_call_operand.vmem [shape: f32[4,3,18,18], index: 0, kind: input, shape index: {}]   ;;  %s1166_s1 = inlined_call_operand.vmem [shape: f32[4,2,16,16], index: 1, kind: output, shape index: {}]  }
   0x1   :  { %v11_v0 = vld [vmem:[%s1165_s0 + $0x48] sm:$0xff]  ;;  %v549_v1 = vld [vmem:[%s1165_s0 + $0x60] sm:$0xff]  ;;  %v561_v2 = vld [vmem:[%s1165_s0 + $0x78] sm:$0xff] }
   0x2   :  { %v36_v3 = vadd.f32 %v549_v1, %v11_v0  ;;  %v8_v4 = vld [vmem:[%s1165_s0] sm:$0xff]  ;;  %v546_v5 = vld [vmem:[%s1165_s0 + $0x18] sm:$0xff]  ;;  %v558_v6 = vld [vmem:[%s1165_s0 + $0x30] sm:$0xff] }
   0x3   :  { %v33_v7 = vadd.f32 %v546_v5, %v8_v4  ;;  %v12_v8 = vld [vmem:[%s1165_s0 + $0x50] sm:$0xff]  ;;  %v550_v9 = vld [vmem:[%s1165_s0 + $0x68] sm:$0xff]  ;;  %v562_v10 = vld [vmem:[%s1165_s0 + $0x80] sm:$0xff] }
   0x4   :  { %v61_v11 = vadd.f32 %v561_v2, %v36_v3  ;;  %v37_v12 = vadd.f32 %v550_v9, %v12_v8  ;;  %v9_v13 = vld [vmem:[%s1165_s0 + $0x8] sm:$0xff]  ;;  %v547_v14 = vld [vmem:[%s1165_s0 + $0x20] sm:$0xff]  ;;  %v559_v15 = vld [vmem:[%s1165_s0 + $0x38] sm:$0xff] }
   0x5   :  { %v58_v16 = vadd.f32 %v558_v6, %v33_v7  ;;  %v34_v17 = vadd.f32 %v547_v14, %v9_v13  ;;  %v15_v18 = vld [vmem:[%s1165_s0 + $0x98] sm:$0xff]  ;;  %v553_v19 = vld [vmem:[%s1165_s0 + $0xb0] sm:$0xff]  ;;  %v565_v20 = vld [vmem:[%s1165_s0 + $0xc8] sm:$0xff] }
   0x6   :  { %v637_v21 = vmul.f32 0.33333334, %v61_v11  ;;  %v62_v22 = vadd.f32 %v562_v10, %v37_v12  ;;  %v40_v23 = vadd.f32 %v553_v19, %v15_v18  ;;  %v14_v24 = vld [vmem:[%s1165_s0 + $0x90] sm:$0xff]  ;;  %v552_v25 = vld [vmem:[%s1165_s0 + $0xa8] sm:$0xff]  ;;  %v564_v26 = vld [vmem:[%s1165_s0 + $0xc0] sm:$0xff] }
   0x7   :  { %v648_v27 = vmul.f32 0.33333334, %v58_v16  ;;  %v59_v28 = vadd.f32 %v559_v15, %v34_v17  ;;  %v39_v29 = vadd.f32 %v552_v25, %v14_v24  ;;  %v18_v30 = vld [vmem:[%s1165_s0 + $0xe0] sm:$0xff]  ;;  %v556_v31 = vld [vmem:[%s1165_s0 + $0xf8] sm:$0xff]  ;;  %v568_v32 = vld [vmem:[%s1165_s0 + $0x110] sm:$0xff] }
   0x8   :  { %v660_v33 = vmul.f32 2.0, %v637_v21  ;;  %v662_v34 = vmul.f32 0.33333334, %v62_v22  ;;  %v65_v35 = vadd.f32 %v565_v20, %v40_v23  ;;  %v43_v36 = vadd.f32 %v556_v31, %v18_v30  ;;  %v17_v37 = vld [vmem:[%s1165_s0 + $0xd8] sm:$0xff]  ;;  %v555_v38 = vld [vmem:[%s1165_s0 + $0xf0] sm:$0xff]  ;;  %v567_v39 = vld [vmem:[%s1165_s0 + $0x108] sm:$0xff] }
   0x9   :  { %v674_v40 = vmul.f32 2.0, %v648_v27  ;;  %v676_v41 = vmul.f32 0.33333334, %v59_v28  ;;  %v64_v42 = vadd.f32 %v564_v26, %v39_v29  ;;  %v42_v43 = vadd.f32 %v555_v38, %v17_v37  ;;  %v10_v58 = vld [vmem:[%s1165_s0 + $0x10] sm:$0x3] }
   0xa   :  { %110 = vrot.lane.b32.xlu1 %v660_v33, %s580_s25  ;;  %v681_v44 = vmul.f32 2.0, %v662_v34  ;;  %v683_v45 = vmul.f32 0.33333334, %v65_v35  ;;  %v68_v46 = vadd.f32 %v568_v32, %v43_v36  ;;  %v724_v57 = vmul.f32 -1.0, %v648_v27  ;;  %v548_v59 = vld [vmem:[%s1165_s0 + $0x28] sm:$0x3] }
   0xb   :  { %106 = vrot.lane.b32.xlu0 %v674_v40, %s580_s25  ;;  %v688_v47 = vmul.f32 2.0, %v676_v41  ;;  %v690_v48 = vmul.f32 0.33333334, %v64_v42  ;;  %v67_v49 = vadd.f32 %v567_v39, %v42_v43  ;;  %v719_v56 = vmul.f32 -1.0, %v676_v41  ;;  %v13_v60 = vld [vmem:[%s1165_s0 + $0x58] sm:$0x3] }
   0xc   :  { %v695_v50 = vmul.f32 2.0, %v683_v45  ;;  %v697_v51 = vmul.f32 0.33333334, %v68_v46  ;;  %v551_v61 = vld [vmem:[%s1165_s0 + $0x70] sm:$0x3]  ;;  %v741_v62 = vmul.f32 -1.0, %v662_v34  ;;  %v35_v2 = vadd.f32 %v548_v59, %v10_v58 }
   0xd   :  { %v702_v52 = vmul.f32 2.0, %v690_v48  ;;  %v704_v53 = vmul.f32 0.33333334, %v67_v49  ;;  %v16_v63 = vld [vmem:[%s1165_s0 + $0xa0] sm:$0x3]  ;;  %v752_v1 = vmul.f32 -1.0, %v637_v21  ;;  %v38_v4 = vadd.f32 %v551_v61, %v13_v60 }
   0xe   :  { %112 = vrot.lane.b32.xlu1 %v681_v44, %s580_s25  ;;  %v709_v54 = vmul.f32 2.0, %v697_v51  ;;  %v554_v0 = vld [vmem:[%s1165_s0 + $0xb8] sm:$0x3]  ;;  %v560_v3 = vld [vmem:[%s1165_s0 + $0x40] sm:$0x3]  ;;  %v769_v9 = vmul.f32 -1.0, %v683_v45 }
   0xf   :  { %108 = vrot.lane.b32.xlu0 %v688_v47, %s580_s25  ;;  %v714_v55 = vmul.f32 2.0, %v704_v53  ;;  %v19_v5 = vld [vmem:[%s1165_s0 + $0xe8] sm:$0x3]  ;;  %v557_v6 = vld [vmem:[%s1165_s0 + $0x100] sm:$0x3]  ;;  %v41_v8 = vadd.f32 %v554_v0, %v16_v63  ;;  %v777_v11 = vmul.f32 -1.0, %v690_v48  ;;  %v60_v12 = vadd.f32 %v560_v3, %v35_v2 }
  0x10   :  { %v563_v7 = vld [vmem:[%s1165_s0 + $0x88] sm:$0x3]  ;;  %v566_v10 = vld [vmem:[%s1165_s0 + $0xd0] sm:$0x3]  ;;  %v44_v13 = vadd.f32 %v557_v6, %v19_v5  ;;  %v569_v15 = vld [vmem:[%s1165_s0 + $0x118] sm:$0x3] }
  0x11   :  { %v63_v14 = vadd.f32 %v563_v7, %v38_v4  ;;  %v235_v16 = vrot.slane %v674_v40, 1  ;;  %v236_v17 = vrot.slane %v688_v47, 1  ;;  %v66_v18 = vadd.f32 %v566_v10, %v41_v8 }
  0x12   :  { %116 = vrot.lane.b32.xlu1 %v695_v50, %s580_s25  ;;  %v240_v19 = vrot.slane %v660_v33, 1  ;;  %v788_v20 = vmul.f32 -1.0, %v697_v51  ;;  %v241_v22 = vrot.slane %v681_v44, 1  ;;  %v794_v23 = vmul.f32 -1.0, %v704_v53 }
  0x13   :  { %114 = vrot.lane.b32.xlu0 %v702_v52, %s580_s25  ;;  %v796_v24 = vmul.f32 0.33333334, %v60_v12  ;;  %v69_v25 = vadd.f32 %v569_v15, %v44_v13  ;;  %v246_v26 = vrot.slane %v695_v50, 1  ;;  %v245_v28 = vrot.slane %v702_v52, 1 }
  0x14   :  { %v251_v29 = vrot.slane %v709_v54, 1  ;;  %v801_v30 = vmul.f32 0.33333334, %v63_v14  ;;  %v250_v31 = vrot.slane %v714_v55, 1  ;;  %v804_v32 = vmul.f32 0.33333334, %v66_v18 }
  0x15   :  { %v226_v33 = vmul.f32 2.0, %v796_v24  ;;  %v808_v35 = vsel %vm234_vm0, %v235_v16, %v236_v17  ;;  %v815_v37 = vmul.f32 0.33333334, %v69_v25  ;;  %v818_v39 = vsel %vm234_vm0, %v240_v19, %v241_v22 }
  0x16   :  { %120 = vrot.lane.b32.xlu1 %v709_v54, %s580_s25  ;;  %v227_v36 = vmul.f32 2.0, %v801_v30  ;;  %v228_v40 = vmul.f32 2.0, %v804_v32  ;;  %v822_v43 = vsel %vm234_vm0, %v245_v28, %v246_v26  ;;  %v829_v49 = vsel %vm234_vm0, %v250_v31, %v251_v29 }
  0x17   :  { %118 = vrot.lane.b32.xlu0 %v714_v55, %s580_s25  ;;  %v238_v38 = vrot.slane %v226_v33, 1  ;;  %v229_v47 = vmul.f32 2.0, %v815_v37  ;;  %v353_v50 = vrot.slane %v676_v41, 2  ;;  %v355_v52 = vrot.slane %v796_v24, 2 }
  0x18   :  { %v243_v42 = vrot.slane %v227_v36, 1  ;;  %v248_v46 = vrot.slane %v228_v40, 1  ;;  %v272_v61 = vmul.f32 -2.0, %v676_v41  ;;  %v273_v63 = vmul.f32 -2.0, %v796_v24 }
  0x19   :  { %v825_v44 = vsel %vm234_vm0, %v236_v17, %v238_v38  ;;  %v253_v58 = vrot.slane %v229_v47, 1  ;;  %v846_v59 = vsel %vm351_vm1, %v353_v50, %v355_v52  ;;  %v271_v0 = vmul.f32 -2.0, %v648_v27 }
  0x1a   :  { %156 = vrot.lane.b32.xlu1 %v719_v56, %s581_s5  ;;  %v836_v54 = vsel %vm234_vm0, %v241_v22, %v243_v42  ;;  %v841_v55 = vsel %vm234_vm0, %v246_v26, %v248_v46  ;;  %v1169_v2 = vrot.slane %v662_v34, 2  ;;  %v360_v3 = vrot.slane %v801_v30, 2 }
  0x1b   :  { %154 = vrot.lane.b32.xlu0 %v724_v57, %s581_s5  ;;  %v849_v60 = vsel %vm234_vm0, %v251_v29, %v253_v58  ;;  %v296_v5 = vrot.slane %v272_v61, 1  ;;  %v298_v6 = vrot.slane %v273_v63, 1  ;;  %v275_v7 = vmul.f32 -2.0, %v662_v34 }
  0x1c   :  { %v865_v4 = vsel %vm351_vm1, %v1169_v2, %v360_v3  ;;  %v276_v8 = vmul.f32 -2.0, %v801_v30  ;;  %v295_v10 = vrot.slane %v271_v0, 1  ;;  %v274_v12 = vmul.f32 -2.0, %v637_v21 }
  0x1d   :  { %v1168_v13 = vrot.slane %v683_v45, 2  ;;  %v365_v14 = vrot.slane %v804_v32, 2  ;;  %v278_v15 = vmul.f32 -2.0, %v683_v45  ;;  %v299_v17 = vsel %vm234_vm0, %v296_v5, %v298_v6 }
  0x1e   :  { %160 = vrot.lane.b32.xlu1 %v741_v62, %s581_s5  ;;  %v301_v18 = vrot.slane %v275_v7, 1  ;;  %v303_v19 = vrot.slane %v276_v8, 1  ;;  %v279_v22 = vmul.f32 -2.0, %v804_v32  ;;  %v297_v25 = vsel %vm234_vm0, %v295_v10, %v296_v5 }
  0x1f   :  { %158 = vrot.lane.b32.xlu0 %v752_v1, %s581_s5  ;;  %v880_v16 = vsel %vm351_vm1, %v1168_v13, %v365_v14  ;;  %v300_v26 = vrot.slane %v274_v12, 1  ;;  %v277_v28 = vmul.f32 -2.0, %v690_v48  ;;  %v1167_v29 = vrot.slane %v697_v51, 2 }
  0x20   :  { %v370_v31 = vrot.slane %v815_v37, 2  ;;  %v306_v33 = vrot.slane %v278_v15, 1  ;;  %v281_v36 = vmul.f32 -2.0, %v697_v51  ;;  %v304_v38 = vsel %vm234_vm0, %v301_v18, %v303_v19 }
  0x21   :  { %v308_v40 = vrot.slane %v279_v22, 1  ;;  %v282_v42 = vmul.f32 -2.0, %v815_v37  ;;  %v302_v47 = vsel %vm234_vm0, %v300_v26, %v301_v18  ;;  %v305_v52 = vrot.slane %v277_v28, 1 }
  0x22   :  { %164 = vrot.lane.b32.xlu1 %v769_v9, %s581_s5  ;;  %v898_v46 = vsel %vm351_vm1, %v1167_v29, %v370_v31  ;;  %v280_v58 = vmul.f32 -2.0, %v704_v53  ;;  %v311_v5 = vrot.slane %v281_v36, 1  ;;  %v433_v18 = vrot.slane %v272_v61, 2 }
  0x23   :  { %162 = vrot.lane.b32.xlu0 %v777_v11, %s581_s5  ;;  %v309_v3 = vsel %vm234_vm0, %v306_v33, %v308_v40  ;;  %v313_v6 = vrot.slane %v282_v42, 1  ;;  %v307_v10 = vsel %vm234_vm0, %v305_v52, %v306_v33  ;;  %v435_v19 = vrot.slane %v273_v63, 2 }
  0x24   :  { %v310_v14 = vrot.slane %v280_v58, 1  ;;  %v432_v26 = vrot.slane %v271_v0, 2  ;;  %v440_v33 = vrot.slane %v276_v8, 2  ;;  %v443_v63 = vrot.slane %v278_v15, 2 }
  0x25   :  { %v436_v31 = vsel %vm351_vm1, %v433_v18, %v435_v19  ;;  %v445_v52 = vrot.slane %v279_v22, 2  ;;  %v448_v8 = vrot.slane %v281_v36, 2  ;;  %v397_v15 = vrot.slane %v719_v56, 2 }
  0x26   :  { %168 = vrot.lane.b32.xlu1 %v788_v20, %s581_s5  ;;  %v434_v40 = vsel %vm351_vm1, %v432_v26, %v433_v18  ;;  %v401_v18 = vrot.slane %v752_v1, 2  ;;  %v412_v26 = vrot.slane %v788_v20, 2  ;;  %v357_v13 = vrot.slane %v637_v21, 2 }
  0x27   :  { %166 = vrot.lane.b32.xlu0 %v794_v23, %s581_s5 }
  0x2a   :  { %196 = vrot.lane.b32.xlu1 %v676_v41, %s581_s5 }
  0x2b   :  { %194 = vrot.lane.b32.xlu0 %v648_v27, %s581_s5 }
  0x2e   :  { %200 = vrot.lane.b32.xlu1 %v662_v34, %s581_s5 }
  0x2f   :  { %198 = vrot.lane.b32.xlu0 %v637_v21, %s581_s5 }
  0x32   :  { %204 = vrot.lane.b32.xlu1 %v683_v45, %s581_s5 }
  0x33   :  { %202 = vrot.lane.b32.xlu0 %v690_v48, %s581_s5 }
  0x36   :  { %208 = vrot.lane.b32.xlu1 %v697_v51, %s581_s5 }
  0x37   :  { %206 = vrot.lane.b32.xlu0 %v704_v53, %s581_s5 }
  0x3a   :  { %317 = vrot.lane.b32.xlu1 %v299_v17, %s581_s5  ;;  %v314_v17 = vsel %vm234_vm0, %v311_v5, %v313_v6 }
  0x3b   :  { %315 = vrot.lane.b32.xlu0 %v297_v25, %s581_s5  ;;  %v312_v25 = vsel %vm234_vm0, %v310_v14, %v311_v5  ;;  %v450_v5 = vrot.slane %v282_v42, 2  ;;  %v389_v14 = vmul.f32 -1.0, %v801_v30 }
  0x3d   :  { %v451_v22 = vsel %vm351_vm1, %v448_v8, %v450_v5  ;;  %v404_v56 = vrot.slane %v389_v14, 2 }
  0x3e   :  { %321 = vrot.lane.b32.xlu1 %v304_v38, %s581_s5  ;;  %v438_v38 = vrot.slane %v275_v7, 2  ;;  %v446_v7 = vsel %vm351_vm1, %v443_v63, %v445_v52 }
  0x3f   :  { %319 = vrot.lane.b32.xlu0 %v302_v47, %s581_s5  ;;  %v437_v47 = vrot.slane %v274_v12, 2  ;;  %v388_v12 = vmul.f32 -1.0, %v796_v24  ;;  %v402_v24 = vrot.slane %v741_v62, 2 }
  0x40   :  { %v441_v61 = vsel %vm351_vm1, %v438_v38, %v440_v33 }
  0x41   :  { %v439_v0 = vsel %vm351_vm1, %v437_v47, %v438_v38  ;;  %v947_v62 = vsel %vm351_vm1, %v402_v24, %v404_v56  ;;  %v952_v1 = vsel %vm351_vm1, %v401_v18, %v402_v24  ;;  %v411_v38 = vrot.slane %v794_v23, 2 }
  0x42   :  { %325 = vrot.lane.b32.xlu1 %v309_v3, %s581_s5  ;;  %v442_v3 = vrot.slane %v277_v28, 2  ;;  %v399_v28 = vrot.slane %v388_v12, 2 }
  0x43   :  { %323 = vrot.lane.b32.xlu0 %v307_v10, %s581_s5  ;;  %v447_v10 = vrot.slane %v280_v58, 2  ;;  %v390_v58 = vmul.f32 -1.0, %v804_v32  ;;  %v406_v32 = vrot.slane %v777_v11, 2  ;;  %v974_v20 = vsel %vm351_vm1, %v411_v38, %v412_v26 }
  0x44   :  { %v444_v6 = vsel %vm351_vm1, %v442_v3, %v443_v63  ;;  %v934_v42 = vsel %vm351_vm1, %v397_v15, %v399_v28  ;;  %1171 = vst [vmem:[#allocation2_spill] sm:$0xff] %v974_v20 }
  0x45   :  { %v449_v36 = vsel %vm351_vm1, %v447_v10, %v448_v8  ;;  %v409_v19 = vrot.slane %v390_v58, 2 }
  0x46   :  { %329 = vrot.lane.b32.xlu1 %v314_v17, %s581_s5  ;;  %v396_v17 = vrot.slane %v724_v57, 2  ;;  %v407_v57 = vrot.slane %v769_v9, 2 }
  0x47   :  { %327 = vrot.lane.b32.xlu0 %v312_v25, %s581_s5  ;;  %v391_v25 = vmul.f32 -1.0, %v815_v37 }
  0x48   :  { %v939_v30 = vsel %vm351_vm1, %v396_v17, %v397_v15  ;;  %v960_v9 = vsel %vm351_vm1, %v407_v57, %v409_v19  ;;  %v964_v37 = vsel %vm351_vm1, %v406_v32, %v407_v57  ;;  %v352_v19 = vrot.slane %v648_v27, 2 }
  0x4a   :  { %454 = vrot.lane.b32.xlu1 %v436_v31, %s580_s25  ;;  %v414_v31 = vrot.slane %v391_v25, 2 }
  0x4b   :  { %452 = vrot.lane.b32.xlu0 %v434_v40, %s580_s25 }
  0x4c   :  { %v971_v11 = vsel %vm351_vm1, %v412_v26, %v414_v31 }
  0x4e   :  { %458 = vrot.lane.b32.xlu1 %v441_v61, %s580_s25 }
  0x4f   :  { %456 = vrot.lane.b32.xlu0 %v439_v0, %s580_s25 }
  0x52   :  { %462 = vrot.lane.b32.xlu1 %v446_v7, %s580_s25 }
  0x53   :  { %460 = vrot.lane.b32.xlu0 %v444_v6, %s580_s25 }
  0x56   :  { %466 = vrot.lane.b32.xlu1 %v451_v22, %s580_s25 }
  0x57   :  { %464 = vrot.lane.b32.xlu0 %v449_v36, %s580_s25 }
  0x5a   :  { %486 = vrot.lane.b32.xlu1 %v934_v42, %s581_s5 }
  0x5b   :  { %484 = vrot.lane.b32.xlu0 %v939_v30, %s581_s5 }
  0x5e   :  { %490 = vrot.lane.b32.xlu1 %v947_v62, %s581_s5 }
  0x5f   :  { %488 = vrot.lane.b32.xlu0 %v952_v1, %s581_s5 }
  0x62   :  { %494 = vrot.lane.b32.xlu1 %v960_v9, %s581_s5 }
  0x63   :  { %492 = vrot.lane.b32.xlu0 %v964_v37, %s581_s5 }
  0x66   :  { %498 = vrot.lane.b32.xlu1 %v971_v11, %s581_s5 }
  0x67   :  { %496 = vrot.lane.b32.xlu0 %v974_v20, %s581_s5 }
  0x7c   :  { %v980_v23 = vpop.permute.xlu1 %110 }
  0x7d   :  { %v982_v33 = vpop.permute.xlu0 %106 }
  0x80   :  { %v984_v40 = vpop.permute.xlu1 %112 }
  0x81   :  { %v986_v47 = vpop.permute.xlu0 %108 }
  0x84   :  { %v988_v61 = vpop.permute.xlu1 %116 }
  0x85   :  { %v990_v63 = vpop.permute.xlu0 %114 }
  0x88   :  { %v992_v52 = vpop.permute.xlu1 %120 }
  0x89   :  { %v994_v0 = vpop.permute.xlu0 %118 }
  0x8c   :  { %v157_v3 = vpop.permute.xlu1 %156 }
  0x8d   :  { %v155_v7 = vpop.permute.xlu0 %154  ;;  %v179_v56 = vadd.f32 %v157_v3, %v676_v41  ;;  %v354_v3 = vsel %vm351_vm1, %v352_v19, %v353_v50  ;;  %v1172_v50 = vrot.slane %v662_v34, 2 }
  0x8e   :  { %v178_v58 = vadd.f32 %v155_v7, %v648_v27 }
  0x8f   :  { %v264_v32 = vadd.f32 %v825_v44, %v179_v56  ;;  %v359_v19 = vsel %vm351_vm1, %v357_v13, %v1172_v50  ;;  %v1173_v13 = vrot.slane %v683_v45, 2 }
  0x90   :  { %v161_v8 = vpop.permute.xlu1 %160  ;;  %v263_v38 = vadd.f32 %v808_v35, %v178_v58 }
  0x91   :  { %v159_v5 = vpop.permute.xlu0 %158  ;;  %v181_v25 = vadd.f32 %v161_v8, %v662_v34 }
  0x92   :  { %v180_v26 = vadd.f32 %v159_v5, %v637_v21 }
  0x93   :  { %v266_v44 = vadd.f32 %v836_v54, %v181_v25 }
  0x94   :  { %v165_v12 = vpop.permute.xlu1 %164  ;;  %v265_v58 = vadd.f32 %v818_v39, %v180_v26 }
  0x95   :  { %v163_v6 = vpop.permute.xlu0 %162  ;;  %v183_v20 = vadd.f32 %v165_v12, %v683_v45 }
  0x96   :  { %v182_v5 = vadd.f32 %v163_v6, %v690_v48 }
  0x98   :  { %v169_v10 = vpop.permute.xlu1 %168  ;;  %v267_v25 = vadd.f32 %v822_v43, %v182_v5 }
  0x99   :  { %v167_v15 = vpop.permute.xlu0 %166 }
  0x9c   :  { %v996_v22 = vpop.permute.xlu1 %196 }
  0x9d   :  { %v998_v28 = vpop.permute.xlu0 %194 }
  0xa0   :  { %v1000_v14 = vpop.permute.xlu1 %200 }
  0xa1   :  { %v1002_v17 = vpop.permute.xlu0 %198 }
  0xa4   :  { %v1004_v36 = vpop.permute.xlu1 %204 }
  0xa5   :  { %v1006_v24 = vpop.permute.xlu0 %202 }
  0xa8   :  { %v1010_v18 = vpop.permute.xlu1 %208 }
  0xa9   :  { %v1012_v57 = vpop.permute.xlu0 %206 }
  0xac   :  { %v318_v31 = vpop.permute.xlu1 %317 }
  0xad   :  { %v340_v29 = vadd.f32 %v318_v31, %v264_v32  ;;  %v316_v7 = vpop.permute.xlu0 %315 }
  0xae   :  { %v339_v2 = vadd.f32 %v316_v7, %v263_v38  ;;  %v362_v38 = vrot.slane %v690_v48, 2 }
  0xaf   :  { %v381_v8 = vadd.f32 %v846_v59, %v340_v29  ;;  %v185_v59 = vadd.f32 %v169_v10, %v697_v51  ;;  %v184_v29 = vadd.f32 %v167_v15, %v704_v53  ;;  %v367_v10 = vrot.slane %v704_v53, 2 }
  0xb0   :  { %v1027_v56 = vadd.f32 %v354_v3, %v339_v2  ;;  %v322_v35 = vpop.permute.xlu1 %321  ;;  %v268_v2 = vadd.f32 %v841_v55, %v183_v20  ;;  %v364_v3 = vsel %vm351_vm1, %v362_v38, %v1173_v13 }
  0xb1   :  { %v342_v32 = vadd.f32 %v322_v35, %v266_v44  ;;  %v320_v31 = vpop.permute.xlu0 %319  ;;  %v270_v55 = vadd.f32 %v849_v60, %v185_v59  ;;  %v269_v35 = vadd.f32 %v829_v49, %v184_v29  ;;  %v131_v59 = vadd.f32 %v986_v47, %v676_v41 }
  0xb2   :  { %v341_v12 = vadd.f32 %v320_v31, %v265_v58  ;;  %v1174_v58 = vrot.slane %v697_v51, 2  ;;  %v130_v49 = vadd.f32 %v982_v33, %v648_v27 }
  0xb3   :  { %v1036_v54 = vadd.f32 %v865_v4, %v342_v32  ;;  %v219_v29 = vadd.f32 %v996_v22, %v131_v59  ;;  %v135_v22 = vadd.f32 %v988_v61, %v683_v45 }
  0xb4   :  { %v1040_v6 = vadd.f32 %v359_v19, %v341_v12  ;;  %v326_v39 = vpop.permute.xlu1 %325  ;;  %v369_v32 = vsel %vm351_vm1, %v367_v10, %v1174_v58 }
  0xb5   :  { %v344_v26 = vadd.f32 %v326_v39, %v268_v2  ;;  %v324_v7 = vpop.permute.xlu0 %323  ;;  %v425_v41 = vadd.f32 %v934_v42, %v219_v29 }
  0xb6   :  { %v343_v44 = vadd.f32 %v324_v7, %v267_v25  ;;  %v218_v25 = vadd.f32 %v998_v28, %v130_v49 }
  0xb7   :  { %v1048_v4 = vadd.f32 %v880_v16, %v344_v26  ;;  %v132_v26 = vadd.f32 %v980_v23, %v637_v21  ;;  %v223_v23 = vadd.f32 %v1004_v36, %v135_v22 }
  0xb8   :  { %v1051_v20 = vadd.f32 %v364_v3, %v343_v44  ;;  %v330_v15 = vpop.permute.xlu1 %329  ;;  %v424_v33 = vadd.f32 %v939_v30, %v218_v25 }
  0xb9   :  { %v346_v43 = vadd.f32 %v330_v15, %v270_v55  ;;  %v328_v5 = vpop.permute.xlu0 %327  ;;  %v220_v27 = vadd.f32 %v1002_v17, %v132_v26  ;;  %v429_v36 = vadd.f32 %v960_v9, %v223_v23 }
  0xba   :  { %v345_v50 = vadd.f32 %v328_v5, %v269_v35  ;;  %v1175_v35 = vld [vmem:[#allocation2_spill] sm:$0xff] }
  0xbb   :  { %v1058_v19 = vadd.f32 %v898_v46, %v346_v43  ;;  %v133_v46 = vadd.f32 %v984_v40, %v662_v34  ;;  %v134_v34 = vadd.f32 %v990_v63, %v690_v48  ;;  %v426_v30 = vadd.f32 %v952_v1, %v220_v27 }
  0xbc   :  { %v455_v31 = vpop.permute.xlu1 %454  ;;  %v1060_v16 = vadd.f32 %v369_v32, %v345_v50  ;;  %v137_v48 = vadd.f32 %v992_v52, %v697_v51 }
  0xbd   :  { %v453_v38 = vpop.permute.xlu0 %452  ;;  %v221_v3 = vadd.f32 %v1000_v14, %v133_v46  ;;  %v477_v28 = vadd.f32 %v455_v31, %v425_v41  ;;  %v222_v17 = vadd.f32 %v1006_v24, %v134_v34 }
  0xbe   :  { %v476_v40 = vadd.f32 %v453_v38, %v424_v33  ;;  %v225_v52 = vadd.f32 %v1010_v18, %v137_v48 }
  0xbf   :  { %v427_v14 = vadd.f32 %v947_v62, %v221_v3  ;;  %v136_v62 = vadd.f32 %v994_v0, %v704_v53 }
  0xc0   :  { %v459_v60 = vpop.permute.xlu1 %458  ;;  %v431_v18 = vadd.f32 %v971_v11, %v225_v52 }
  0xc1   :  { %v457_v12 = vpop.permute.xlu0 %456  ;;  %v479_v63 = vadd.f32 %v459_v60, %v427_v14  ;;  %v224_v0 = vadd.f32 %v1012_v57, %v136_v62 }
  0xc2   :  { %v478_v1 = vadd.f32 %v457_v12, %v426_v30 }
  0xc3   :  { %v430_v43 = vadd.f32 %v1175_v35, %v224_v0 }
  0xc4   :  { %v463_v2 = vpop.permute.xlu1 %462 }
  0xc5   :  { %v461_v39 = vpop.permute.xlu0 %460  ;;  %v481_v15 = vadd.f32 %v463_v2, %v429_v36 }
  0xc8   :  { %v467_v13 = vpop.permute.xlu1 %466 }
  0xc9   :  { %v465_v47 = vpop.permute.xlu0 %464  ;;  %v483_v32 = vadd.f32 %v467_v13, %v431_v18 }
  0xca   :  { %v482_v11 = vadd.f32 %v465_v47, %v430_v43 }
  0xcc   :  { %v487_v21 = vpop.permute.xlu1 %486 }
  0xcd   :  { %v509_v42 = vadd.f32 %v487_v21, %v381_v8  ;;  %v517_v7 = vadd.f32 %v487_v21, %v477_v28  ;;  %v485_v10 = vpop.permute.xlu0 %484 }
  0xce   :  { %v508_v45 = vadd.f32 %v485_v10, %v1027_v56  ;;  %v516_v61 = vadd.f32 %v485_v10, %v476_v40  ;;  %v428_v56 = vadd.f32 %v964_v37, %v222_v17 }
  0xcf   :  { %526 = vst.msk [vmem:[%s1166_s1 + $0x8] sm:$0xff] %vm524_vm2, %v509_v42  ;;  %571 = vst.msk [vmem:[%s1166_s1 + $0x18] sm:$0xff] %vm524_vm2, %v517_v7 }
  0xd0   :  { %525 = vst.msk [vmem:[%s1166_s1] sm:$0xff] %vm524_vm2, %v508_v45  ;;  %570 = vst.msk [vmem:[%s1166_s1 + $0x10] sm:$0xff] %vm524_vm2, %v516_v61  ;;  %v491_v51 = vpop.permute.xlu1 %490  ;;  %v480_v9 = vadd.f32 %v461_v39, %v428_v56 }
  0xd1   :  { %v511_v24 = vadd.f32 %v491_v51, %v1036_v54  ;;  %v519_v8 = vadd.f32 %v491_v51, %v479_v63  ;;  %v489_v53 = vpop.permute.xlu0 %488 }
  0xd2   :  { %v510_v44 = vadd.f32 %v489_v53, %v1040_v6  ;;  %v518_v55 = vadd.f32 %v489_v53, %v478_v1 }
  0xd3   :  { %528 = vst.msk [vmem:[%s1166_s1 + $0x28] sm:$0xff] %vm524_vm2, %v511_v24  ;;  %573 = vst.msk [vmem:[%s1166_s1 + $0x38] sm:$0xff] %vm524_vm2, %v519_v8 }
  0xd4   :  { %527 = vst.msk [vmem:[%s1166_s1 + $0x20] sm:$0xff] %vm524_vm2, %v510_v44  ;;  %572 = vst.msk [vmem:[%s1166_s1 + $0x30] sm:$0xff] %vm524_vm2, %v518_v55  ;;  %v495_v37 = vpop.permute.xlu1 %494 }
  0xd5   :  { %v513_v57 = vadd.f32 %v495_v37, %v1048_v4  ;;  %v521_v54 = vadd.f32 %v495_v37, %v481_v15  ;;  %v493_v6 = vpop.permute.xlu0 %492 }
  0xd6   :  { %v512_v5 = vadd.f32 %v493_v6, %v1051_v20  ;;  %v520_v58 = vadd.f32 %v493_v6, %v480_v9 }
  0xd7   :  { %530 = vst.msk [vmem:[%s1166_s1 + $0x48] sm:$0xff] %vm524_vm2, %v513_v57  ;;  %575 = vst.msk [vmem:[%s1166_s1 + $0x58] sm:$0xff] %vm524_vm2, %v521_v54 }
  0xd8   :  { %529 = vst.msk [vmem:[%s1166_s1 + $0x40] sm:$0xff] %vm524_vm2, %v512_v5  ;;  %574 = vst.msk [vmem:[%s1166_s1 + $0x50] sm:$0xff] %vm524_vm2, %v520_v58  ;;  %v499_v4 = vpop.permute.xlu1 %498 }
  0xd9   :  { %v515_v20 = vadd.f32 %v499_v4, %v1058_v19  ;;  %v523_v50 = vadd.f32 %v499_v4, %v483_v32  ;;  %v497_v31 = vpop.permute.xlu0 %496 }
  0xda   :  { %v514_v38 = vadd.f32 %v497_v31, %v1060_v16  ;;  %v522_v60 = vadd.f32 %v497_v31, %v482_v11 }
  0xdb   :  { %532 = vst.msk [vmem:[%s1166_s1 + $0x68] sm:$0xff] %vm524_vm2, %v515_v20  ;;  %577 = vst.msk [vmem:[%s1166_s1 + $0x78] sm:$0xff] %vm524_vm2, %v523_v50 }
  0xdc   :  { %531 = vst.msk [vmem:[%s1166_s1 + $0x60] sm:$0xff] %vm524_vm2, %v514_v38  ;;  %576 = vst.msk [vmem:[%s1166_s1 + $0x70] sm:$0xff] %vm524_vm2, %v522_v60 }

// kernel: _unsup_forward.3
= control target key start
LH: loop header
LB: loop body
LE: loop exit
PB: predicated region body
PF: predicated region fallthrough
CT: control target
= control target key end

     0   :  { %s4718_s0 = inlined_call_operand.vmem [shape: f32[4,768], index: 0, kind: input, shape index: {}]   ;;  %s4719_s1 = inlined_call_operand.vmem [shape: f32[4,512], index: 1, kind: input, shape index: {}]   ;;  %s4720_s2 = inlined_call_operand.hbm [shape: f32[768,512], index: 2, kind: input, shape index: {}]   ;;  %s4721_s3 = inlined_call_operand.vmem [shape: f32[512,512], index: 3, kind: input, shape index: {}]   ;;  %s4722_s4 = inlined_call_operand.hbm [shape: f32[1,512], index: 4, kind: input, shape index: {}]   ;;  %s4723_s5 = inlined_call_operand.vmem [shape: f32[512,32], index: 5, kind: input, shape index: {}]   ;;  %s4724_s6 = inlined_call_operand.hbm [shape: f32[1,32], index: 6, kind: input, shape index: {}]   ;;  %s4725_s7 = inlined_call_operand.hbm [shape: f32[512,128], index: 7, kind: input, shape index: {}]   ;;  %s4726_s8 = inlined_call_operand.hbm [shape: f32[1,128], index: 8, kind: input, shape index: {}]   ;;  %s4727_s9 = inlined_call_operand.hbm [shape: f32[1,128], index: 9, kind: input, shape index: {}]   ;;  %s4728_s10 = inlined_call_operand.hbm [shape: f32[1,128], index: 10, kind: input, shape index: {}]   ;;  %s4729_s11 = inlined_call_operand.vmem [shape: f32[128,64], index: 11, kind: input, shape index: {}]   ;;  %s4730_s12 = inlined_call_operand.hbm [shape: f32[1,64], index: 12, kind: input, shape index: {}]   ;;  %s4731_s13 = inlined_call_operand.hbm [shape: f32[16,64], index: 13, kind: input, shape index: {}]   ;;  %s4732_s14 = inlined_call_operand.vmem [shape: f32[64,16], index: 14, kind: input, shape index: {}]   ;;  %s4733_s15 = inlined_call_operand.hbm [shape: f32[64,128], index: 15, kind: input, shape index: {}]   ;;  %s4734_s16 = inlined_call_operand.hbm [shape: f32[4,32], index: 16, kind: output, shape index: {0}]   ;;  %s4735_s17 = inlined_call_operand.hbm [shape: f32[4,64], index: 17, kind: output, shape index: {1}]   ;;  %s4736_s18 = inlined_call_operand.hbm [shape: f32[4,16], index: 18, kind: output, shape index: {2}]   ;;  %s4737_s19 = inlined_call_operand.vmem [shape: f32[2,4,16], index: 19, kind: output, shape index: {3}]  }
   0x1   :  { %4741 = sst [smem:[#allocation31_spill]] %s4718_s0 }
   0x2   :  { %4742 = sst [smem:[#allocation32_spill]] %s4719_s1 }
   0x3   :  { %4743 = sst [smem:[#allocation33_spill]] %s4720_s2 }
   0x4   :  { %4744 = sst [smem:[#allocation34_spill]] %s4721_s3 }
   0x5   :  { %25 = vsyncpa [#allocation3], 0 }
   0x6   :  { %26 = vsyncpa [#allocation6], 0 }
   0x7   :  { %27 = vsyncpa [#allocation9], 0 }
   0x8   :  { %28 = vsyncpa [#allocation12], 0 }
   0x9   :  { %29 = vsyncpa [#allocation15], 0 }
   0xa   :  { %30 = vsyncpa [#allocation18], 0 }
   0xb   :  { %31 = vsyncpa [#allocation4], 0 }
   0xc   :  { %32 = vsyncpa [#allocation21], 0  ;;  %s3297_s0 = smov [#allocation5]   ;;  %s3298_s20 = smov [#allocation8]  }
   0xd   :  { %s57_s30 = sshll.u32 %s3297_s0, 4  ;;  %s78_s21 = sshll.u32 %s3298_s20, 4  ;;  %s58_s30 = int_to_ptr.vmem [resolvable:$true] %s57_s30  ;;  %s79_s21 = int_to_ptr.vmem [resolvable:$true] %s78_s21 }
   0xe   :  { %s3029_s1 = scalar_lea.vmem %s58_s30, 64  ;;  %p3034_p1 = scmp.lt.s32.totalorder %s58_s30, %s58_s30 }
   0xf   :  { %p3030_p0 = scmp.ne.s32.totalorder %s58_s30, %s3029_s1  ;;  %p3035_p2 = scmp.lt.s32.totalorder %s3029_s1, %s3029_s1 }
  0x11   :  { %p3036_p3 = por %p3035_p2, %p3034_p1 }
  0x13   :  { %p3037_p4 = pnand %p3036_p3, %p3030_p0 }
  0x15   :  { %3040 = shalt.err (!%p3037_p4)
}
  0x16   :  { %60 = dma.hbm_to_vmem [thread:$0]  %s4722_s4, 64, %s58_s30, [#allocation6]  }
  0x17   :  { %s3049_s23 = scalar_lea.vmem %s79_s21, 8192  ;;  %p3054_p6 = scmp.lt.s32.totalorder %s79_s21, %s79_s21 }
  0x18   :  { %p3050_p5 = scmp.ne.s32.totalorder %s79_s21, %s3049_s23  ;;  %p3055_p7 = scmp.lt.s32.totalorder %s3049_s23, %s3049_s23 }
  0x1a   :  { %p3056_p8 = por %p3055_p7, %p3054_p6 }
  0x1c   :  { %p3057_p9 = pnand %p3056_p8, %p3050_p5 }
  0x1e   :  { %3060 = shalt.err (!%p3057_p9)
}
  0x1f   :  { %s3299_s24 = smov 128   ;;  %s3300_s25 = smov 8  }
  0x20   :  { %84 = dma.hbm_to_vmem [thread:$0]  %s4725_s7, 8192, %s79_s21, [#allocation9], %s3299_s24, %s3299_s24, %s3300_s25  }
  0x21   :  { %s3301_s27 = smov [#allocation11]   ;;  %s3302_s29 = smov [#allocation14]  }
  0x22   :  { %s101_s28 = sshll.u32 %s3301_s27, 4  ;;  %s123_s4 = sshll.u32 %s3302_s29, 4  ;;  %s102_s28 = int_to_ptr.vmem [resolvable:$true] %s101_s28  ;;  %s124_s4 = int_to_ptr.vmem [resolvable:$true] %s123_s4 }
  0x23   :  { %s3069_s0 = scalar_lea.vmem %s102_s28, 16  ;;  %s3073_s30 = scalar_lea.vmem %s102_s28, 32 }
  0x24   :  { %p3070_p10 = scmp.ne.s32.totalorder %s102_s28, %s3069_s0  ;;  %p3074_p11 = scmp.lt.s32.totalorder %s102_s28, %s102_s28 }
  0x25   :  { %p3075_p12 = scmp.lt.s32.totalorder %s3073_s30, %s3069_s0 }
  0x27   :  { %p3076_p13 = por %p3075_p12, %p3074_p11 }
  0x29   :  { %p3077_p0 = pnand %p3076_p13, %p3070_p10 }
  0x2b   :  { %3080 = shalt.err (!%p3077_p0)
}
  0x2c   :  { %104 = dma.hbm_to_vmem [thread:$0]  %s4727_s9, 16, %s102_s28, [#allocation12]  }
  0x2d   :  { %s3089_s22 = scalar_lea.vmem %s124_s4, 16  ;;  %s3093_s7 = scalar_lea.vmem %s124_s4, 32 }
  0x2e   :  { %p3090_p1 = scmp.ne.s32.totalorder %s124_s4, %s3089_s22  ;;  %p3094_p2 = scmp.lt.s32.totalorder %s124_s4, %s124_s4 }
  0x2f   :  { %p3095_p3 = scmp.lt.s32.totalorder %s3093_s7, %s3089_s22 }
  0x31   :  { %p3096_p4 = por %p3095_p3, %p3094_p2 }
  0x33   :  { %p3097_p5 = pnand %p3096_p4, %p3090_p1 }
  0x35   :  { %3100 = shalt.err (!%p3097_p5)
}
  0x36   :  { %126 = dma.hbm_to_vmem [thread:$0]  %s4730_s12, 16, %s124_s4, [#allocation15]  }
  0x37   :  { %s3303_s23 = smov [#allocation2]  }
  0x38   :  { %s42_s3 = sshll.u32 %s3303_s23, 4  ;;  %s43_s3 = int_to_ptr.vmem [resolvable:$true] %s42_s3 }
  0x39   :  { %s3109_s26 = scalar_lea.vmem %s43_s3, 49152  ;;  %p3114_p7 = scmp.lt.s32.totalorder %s43_s3, %s43_s3 }
  0x3a   :  { %p3110_p6 = scmp.ne.s32.totalorder %s43_s3, %s3109_s26  ;;  %p3115_p8 = scmp.lt.s32.totalorder %s3109_s26, %s3109_s26 }
  0x3c   :  { %p3116_p9 = por %p3115_p8, %p3114_p7 }
  0x3e   :  { %p3117_p10 = pnand %p3116_p9, %p3110_p6 }
  0x40   :  { %3120 = shalt.err (!%p3117_p10)
}
  0x41   :  { %s3304_s9 = smov 512   ;;  %s3305_s27 = smov 32  }
  0x42   :  { %s4745_s0 = sld [smem:[#allocation33_spill]]  ;;  %s3306_s30 = smov [#allocation7]  }
  0x43   :  { %s69_s20 = sshll.u32 %s3306_s30, 4  ;;  %s3307_s12 = smov [#allocation10]   ;;  %s70_s20 = int_to_ptr.vmem [resolvable:$true] %s69_s20 }
  0x44   :  { %s91_s4 = sshll.u32 %s3307_s12, 4  ;;  %s3129_s1 = scalar_lea.vmem %s70_s20, 16  ;;  %s92_s4 = int_to_ptr.vmem [resolvable:$true] %s91_s4 }
  0x45   :  { %p3130_p11 = scmp.ne.s32.totalorder %s70_s20, %s3129_s1  ;;  %s3133_s22 = scalar_lea.vmem %s70_s20, 32 }
  0x46   :  { %p3134_p12 = scmp.lt.s32.totalorder %s70_s20, %s70_s20  ;;  %p3135_p13 = scmp.lt.s32.totalorder %s3133_s22, %s3129_s1 }
  0x48   :  { %48 = dma.hbm_to_vmem [thread:$0]  %s4745_s0, 49152, %s43_s3, [#allocation3], %s3304_s9, %s3304_s9, %s3305_s27  }
  0x49   :  { %p3136_p0 = por %p3135_p13, %p3134_p12 }
  0x4b   :  { %p3137_p1 = pnand %p3136_p0, %p3130_p11 }
  0x4d   :  { %3140 = shalt.err (!%p3137_p1)
}
  0x4e   :  { %72 = dma.hbm_to_vmem [thread:$0]  %s4724_s6, 16, %s70_s20, [#allocation6]  }
  0x4f   :  { %s3149_s2 = scalar_lea.vmem %s92_s4, 16  ;;  %s3153_s23 = scalar_lea.vmem %s92_s4, 32 }
  0x50   :  { %p3150_p2 = scmp.ne.s32.totalorder %s92_s4, %s3149_s2  ;;  %p3154_p3 = scmp.lt.s32.totalorder %s92_s4, %s92_s4 }
  0x51   :  { %p3155_p4 = scmp.lt.s32.totalorder %s3153_s23, %s3149_s2 }
  0x53   :  { %p3156_p5 = por %p3155_p4, %p3154_p3 }
  0x55   :  { %p3157_p6 = pnand %p3156_p5, %p3150_p2 }
  0x57   :  { %3160 = shalt.err (!%p3157_p6)
}
  0x58   :  { %94 = dma.hbm_to_vmem [thread:$0]  %s4726_s8, 16, %s92_s4, [#allocation9]  }
  0x59   :  { %s3308_s9 = smov [#allocation13]   ;;  %s3309_s28 = smov [#allocation16]  }
  0x5a   :  { %s111_s27 = sshll.u32 %s3308_s9, 4  ;;  %s132_s29 = sshll.u32 %s3309_s28, 4  ;;  %s112_s27 = int_to_ptr.vmem [resolvable:$true] %s111_s27  ;;  %s133_s29 = int_to_ptr.vmem [resolvable:$true] %s132_s29 }
  0x5b   :  { %s3169_s0 = scalar_lea.vmem %s112_s27, 16  ;;  %s3173_s6 = scalar_lea.vmem %s112_s27, 32 }
  0x5c   :  { %p3170_p7 = scmp.ne.s32.totalorder %s112_s27, %s3169_s0  ;;  %p3174_p8 = scmp.lt.s32.totalorder %s112_s27, %s112_s27 }
  0x5d   :  { %p3175_p9 = scmp.lt.s32.totalorder %s3173_s6, %s3169_s0 }
  0x5f   :  { %p3176_p10 = por %p3175_p9, %p3174_p8 }
  0x61   :  { %p3177_p11 = pnand %p3176_p10, %p3170_p7 }
  0x63   :  { %3180 = shalt.err (!%p3177_p11)
}
  0x64   :  { %114 = dma.hbm_to_vmem [thread:$0]  %s4728_s10, 16, %s112_s27, [#allocation12]  }
  0x65   :  { %s3189_s12 = scalar_lea.vmem %s133_s29, 256  ;;  %p3194_p13 = scmp.lt.s32.totalorder %s133_s29, %s133_s29 }
  0x66   :  { %p3190_p12 = scmp.ne.s32.totalorder %s133_s29, %s3189_s12  ;;  %p3195_p0 = scmp.lt.s32.totalorder %s3189_s12, %s3189_s12 }
  0x68   :  { %p3196_p1 = por %p3195_p0, %p3194_p13 }
  0x6a   :  { %p3197_p2 = pnand %p3196_p1, %p3190_p12 }
  0x6c   :  { %3200 = shalt.err (!%p3197_p2)
}
  0x6d   :  { %138 = dma.hbm_to_vmem [thread:$0]  %s4731_s13, 256, %s133_s29, [#allocation15], %s3299_s24, %s3299_s24, %s3300_s25  }
  0x6e   :  { %s3310_s1 = smov [#allocation17]  }
  0x6f   :  { %s146_s22 = sshll.u32 %s3310_s1, 4  ;;  %s147_s22 = int_to_ptr.vmem [resolvable:$true] %s146_s22 }
  0x70   :  { %s3209_s7 = scalar_lea.vmem %s147_s22, 1024  ;;  %p3214_p4 = scmp.lt.s32.totalorder %s147_s22, %s147_s22 }
  0x71   :  { %p3210_p3 = scmp.ne.s32.totalorder %s147_s22, %s3209_s7  ;;  %p3215_p5 = scmp.lt.s32.totalorder %s3209_s7, %s3209_s7 }
  0x73   :  { %p3216_p6 = por %p3215_p5, %p3214_p4 }
  0x75   :  { %p3217_p7 = pnand %p3216_p6, %p3210_p3 }
  0x77   :  { %3220 = shalt.err (!%p3217_p7)
}
  0x78   :  { %152 = dma.hbm_to_vmem [thread:$0]  %s4733_s15, 1024, %s147_s22, [#allocation18], %s3299_s24, %s3299_s24, %s3300_s25  }
  0x79   :  { %3281 = dma.done.wait [#allocation3], 49152  }
  0x7a   :  { %3282 = vsyncadd [#allocation3], 4294918144 }
  0x7b   :  { %3283 = dma.done.wait [#allocation6], 80  }
  0x7c   :  { %3284 = vsyncadd [#allocation6], 4294967216 }
  0x7d   :  { %3285 = dma.done.wait [#allocation9], 8208  }
  0x7e   :  { %3286 = vsyncadd [#allocation9], 4294959088 }
  0x7f   :  { %3287 = dma.done.wait [#allocation12], 32  }
  0x80   :  { %3288 = vsyncadd [#allocation12], 4294967264 }
  0x81   :  { %3289 = dma.done.wait [#allocation15], 272  }
  0x82   :  { %3290 = vsyncadd [#allocation15], 4294967024 }
  0x83   :  { %3291 = dma.done.wait [#allocation18], 1024  }
  0x84   :  { %3292 = vsyncadd [#allocation18], 4294966272  ;;  %v248_v0 = vld [vmem:[#allocation2 + $0x1e8] sm:$0xff]  ;;  %v247_v2 = vld [vmem:[#allocation2 + $0x1e0] sm:$0xff]  ;;  %s4746_s24 = sld [smem:[#allocation31_spill]]  ;;  %vm3312_vm0 = vmmov 0  }
  0x85   :  { %v376_v1 = vld [vmem:[#allocation2 + $0x5e8] sm:$0xff]  ;;  %580 = vmatprep.subr.mxu0 %v248_v0  ;;  %v375_v3 = vld [vmem:[#allocation2 + $0x5e0] sm:$0xff]  ;;  %s4747_s27 = sld [smem:[#allocation34_spill]]  ;;  %vm1794_vm1 = vcmask 257024   ;;  %vm2007_vm2 = vcmask 1043456   ;;  %vm2150_vm3 = vcmask 523264  }
  0x86   :  { %651 = vmatprep.subr.mxu1 %v376_v1  ;;  %v244_v4 = vld [vmem:[#allocation2 + $0x1c8] sm:$0xff]  ;;  %581 = vmatpush1.msra.mxu0 %v247_v2  ;;  %v243_v6 = vld [vmem:[#allocation2 + $0x1c0] sm:$0xff]  ;;  %s4748_s10 = sld [smem:[#allocation32_spill]]  ;;  %vm2140_vm4 = vcmask 519168   ;;  %s3315_s25 = smov [#allocation19]  }
  0x87   :  { %v372_v5 = vld [vmem:[#allocation2 + $0x5c8] sm:$0xff]  ;;  %652 = vmatpush1.msra.mxu1 %v375_v3  ;;  %v371_v7 = vld [vmem:[#allocation2 + $0x5c0] sm:$0xff]  ;;  %582 = vmatprep.subr.mxu0 %v244_v4 }
  0x88   :  { %v240_v8 = vld [vmem:[#allocation2 + $0x1a8] sm:$0xff]  ;;  %653 = vmatprep.subr.mxu1 %v372_v5  ;;  %v239_v10 = vld [vmem:[#allocation2 + $0x1a0] sm:$0xff]  ;;  %583 = vmatpush1.msra.mxu0 %v243_v6 }
  0x89   :  { %v368_v9 = vld [vmem:[#allocation2 + $0x5a8] sm:$0xff]  ;;  %v367_v11 = vld [vmem:[#allocation2 + $0x5a0] sm:$0xff]  ;;  %654 = vmatpush1.msra.mxu1 %v371_v7  ;;  %584 = vmatprep.subr.mxu0 %v240_v8 }
  0x8a   :  { %v236_v12 = vld [vmem:[#allocation2 + $0x188] sm:$0xff]  ;;  %655 = vmatprep.subr.mxu1 %v368_v9  ;;  %v235_v14 = vld [vmem:[#allocation2 + $0x180] sm:$0xff]  ;;  %585 = vmatpush1.msra.mxu0 %v239_v10 }
  0x8b   :  { %v364_v13 = vld [vmem:[#allocation2 + $0x588] sm:$0xff]  ;;  %v363_v15 = vld [vmem:[#allocation2 + $0x580] sm:$0xff]  ;;  %656 = vmatpush1.msra.mxu1 %v367_v11  ;;  %586 = vmatprep.subr.mxu0 %v236_v12 }
  0x8c   :  { %v232_v16 = vld [vmem:[#allocation2 + $0x168] sm:$0xff]  ;;  %657 = vmatprep.subr.mxu1 %v364_v13  ;;  %v231_v18 = vld [vmem:[#allocation2 + $0x160] sm:$0xff]  ;;  %587 = vmatpush1.msra.mxu0 %v235_v14 }
  0x8d   :  { %v360_v17 = vld [vmem:[#allocation2 + $0x568] sm:$0xff]  ;;  %v359_v19 = vld [vmem:[#allocation2 + $0x560] sm:$0xff]  ;;  %658 = vmatpush1.msra.mxu1 %v363_v15  ;;  %588 = vmatprep.subr.mxu0 %v232_v16 }
  0x8e   :  { %v228_v20 = vld [vmem:[#allocation2 + $0x148] sm:$0xff]  ;;  %659 = vmatprep.subr.mxu1 %v360_v17  ;;  %v227_v22 = vld [vmem:[#allocation2 + $0x140] sm:$0xff]  ;;  %589 = vmatpush1.msra.mxu0 %v231_v18 }
  0x8f   :  { %v356_v21 = vld [vmem:[#allocation2 + $0x548] sm:$0xff]  ;;  %v355_v23 = vld [vmem:[#allocation2 + $0x540] sm:$0xff]  ;;  %660 = vmatpush1.msra.mxu1 %v359_v19  ;;  %590 = vmatprep.subr.mxu0 %v228_v20 }
  0x90   :  { %v224_v24 = vld [vmem:[#allocation2 + $0x128] sm:$0xff]  ;;  %661 = vmatprep.subr.mxu1 %v356_v21  ;;  %v223_v26 = vld [vmem:[#allocation2 + $0x120] sm:$0xff]  ;;  %591 = vmatpush1.msra.mxu0 %v227_v22 }
  0x91   :  { %v352_v25 = vld [vmem:[#allocation2 + $0x528] sm:$0xff]  ;;  %v351_v27 = vld [vmem:[#allocation2 + $0x520] sm:$0xff]  ;;  %662 = vmatpush1.msra.mxu1 %v355_v23  ;;  %592 = vmatprep.subr.mxu0 %v224_v24 }
  0x92   :  { %v220_v28 = vld [vmem:[#allocation2 + $0x108] sm:$0xff]  ;;  %663 = vmatprep.subr.mxu1 %v352_v25  ;;  %v219_v30 = vld [vmem:[#allocation2 + $0x100] sm:$0xff]  ;;  %593 = vmatpush1.msra.mxu0 %v223_v26 }
  0x93   :  { %v348_v29 = vld [vmem:[#allocation2 + $0x508] sm:$0xff]  ;;  %v347_v31 = vld [vmem:[#allocation2 + $0x500] sm:$0xff]  ;;  %664 = vmatpush1.msra.mxu1 %v351_v27  ;;  %594 = vmatprep.subr.mxu0 %v220_v28 }
  0x94   :  { %v216_v32 = vld [vmem:[#allocation2 + $0xe8] sm:$0xff]  ;;  %665 = vmatprep.subr.mxu1 %v348_v29  ;;  %v215_v34 = vld [vmem:[#allocation2 + $0xe0] sm:$0xff]  ;;  %595 = vmatpush1.msra.mxu0 %v219_v30 }
  0x95   :  { %v344_v33 = vld [vmem:[#allocation2 + $0x4e8] sm:$0xff]  ;;  %v343_v35 = vld [vmem:[#allocation2 + $0x4e0] sm:$0xff]  ;;  %666 = vmatpush1.msra.mxu1 %v347_v31  ;;  %596 = vmatprep.subr.mxu0 %v216_v32 }
  0x96   :  { %v212_v36 = vld [vmem:[#allocation2 + $0xc8] sm:$0xff]  ;;  %667 = vmatprep.subr.mxu1 %v344_v33  ;;  %v211_v38 = vld [vmem:[#allocation2 + $0xc0] sm:$0xff]  ;;  %597 = vmatpush1.msra.mxu0 %v215_v34 }
  0x97   :  { %v340_v37 = vld [vmem:[#allocation2 + $0x4c8] sm:$0xff]  ;;  %v339_v39 = vld [vmem:[#allocation2 + $0x4c0] sm:$0xff]  ;;  %668 = vmatpush1.msra.mxu1 %v343_v35  ;;  %598 = vmatprep.subr.mxu0 %v212_v36 }
  0x98   :  { %v208_v40 = vld [vmem:[#allocation2 + $0xa8] sm:$0xff]  ;;  %669 = vmatprep.subr.mxu1 %v340_v37  ;;  %v207_v42 = vld [vmem:[#allocation2 + $0xa0] sm:$0xff]  ;;  %599 = vmatpush1.msra.mxu0 %v211_v38 }
  0x99   :  { %v336_v41 = vld [vmem:[#allocation2 + $0x4a8] sm:$0xff]  ;;  %v335_v43 = vld [vmem:[#allocation2 + $0x4a0] sm:$0xff]  ;;  %670 = vmatpush1.msra.mxu1 %v339_v39  ;;  %600 = vmatprep.subr.mxu0 %v208_v40 }
  0x9a   :  { %v204_v44 = vld [vmem:[#allocation2 + $0x88] sm:$0xff]  ;;  %671 = vmatprep.subr.mxu1 %v336_v41  ;;  %v203_v46 = vld [vmem:[#allocation2 + $0x80] sm:$0xff]  ;;  %601 = vmatpush1.msra.mxu0 %v207_v42 }
  0x9b   :  { %v332_v45 = vld [vmem:[#allocation2 + $0x488] sm:$0xff]  ;;  %v331_v47 = vld [vmem:[#allocation2 + $0x480] sm:$0xff]  ;;  %672 = vmatpush1.msra.mxu1 %v335_v43  ;;  %602 = vmatprep.subr.mxu0 %v204_v44 }
  0x9c   :  { %v200_v48 = vld [vmem:[#allocation2 + $0x68] sm:$0xff]  ;;  %673 = vmatprep.subr.mxu1 %v332_v45  ;;  %v199_v50 = vld [vmem:[#allocation2 + $0x60] sm:$0xff]  ;;  %603 = vmatpush1.msra.mxu0 %v203_v46 }
  0x9d   :  { %v328_v49 = vld [vmem:[#allocation2 + $0x468] sm:$0xff]  ;;  %v327_v51 = vld [vmem:[#allocation2 + $0x460] sm:$0xff]  ;;  %674 = vmatpush1.msra.mxu1 %v331_v47  ;;  %604 = vmatprep.subr.mxu0 %v200_v48 }
  0x9e   :  { %v196_v52 = vld [vmem:[#allocation2 + $0x48] sm:$0xff]  ;;  %675 = vmatprep.subr.mxu1 %v328_v49  ;;  %v195_v54 = vld [vmem:[#allocation2 + $0x40] sm:$0xff]  ;;  %605 = vmatpush1.msra.mxu0 %v199_v50 }
  0x9f   :  { %v324_v53 = vld [vmem:[#allocation2 + $0x448] sm:$0xff]  ;;  %v323_v55 = vld [vmem:[#allocation2 + $0x440] sm:$0xff]  ;;  %676 = vmatpush1.msra.mxu1 %v327_v51  ;;  %606 = vmatprep.subr.mxu0 %v196_v52 }
  0xa0   :  { %v192_v56 = vld [vmem:[#allocation2 + $0x28] sm:$0xff]  ;;  %677 = vmatprep.subr.mxu1 %v324_v53  ;;  %v191_v58 = vld [vmem:[#allocation2 + $0x20] sm:$0xff]  ;;  %607 = vmatpush1.msra.mxu0 %v195_v54 }
  0xa1   :  { %v320_v57 = vld [vmem:[#allocation2 + $0x428] sm:$0xff]  ;;  %v319_v59 = vld [vmem:[#allocation2 + $0x420] sm:$0xff]  ;;  %678 = vmatpush1.msra.mxu1 %v323_v55  ;;  %608 = vmatprep.subr.mxu0 %v192_v56 }
  0xa2   :  { %v188_v60 = vld [vmem:[#allocation2 + $0x8] sm:$0xff]  ;;  %679 = vmatprep.subr.mxu1 %v320_v57  ;;  %v187_v62 = vld [vmem:[#allocation2] sm:$0xff]  ;;  %609 = vmatpush1.msra.mxu0 %v191_v58 }
  0xa3   :  { %v316_v61 = vld [vmem:[#allocation2 + $0x408] sm:$0xff]  ;;  %v315_v63 = vld [vmem:[#allocation2 + $0x400] sm:$0xff]  ;;  %680 = vmatpush1.msra.mxu1 %v319_v59  ;;  %610 = vmatprep.subr.mxu0 %v188_v60 }
  0xa4   :  { %v312_v0 = vld [vmem:[#allocation2 + $0x3e8] sm:$0xff]  ;;  %681 = vmatprep.subr.mxu1 %v316_v61  ;;  %v311_v2 = vld [vmem:[#allocation2 + $0x3e0] sm:$0xff]  ;;  %611 = vmatpush1.msra.mxu0 %v187_v62 }
  0xa5   :  { %v440_v1 = vld [vmem:[#allocation2 + $0x7e8] sm:$0xff]  ;;  %v439_v3 = vld [vmem:[#allocation2 + $0x7e0] sm:$0xff]  ;;  %682 = vmatpush1.msra.mxu1 %v315_v63  ;;  %612 = vmatprep.subr.mxu0 %v312_v0 }
  0xa6   :  { %v308_v4 = vld [vmem:[#allocation2 + $0x3c8] sm:$0xff]  ;;  %683 = vmatprep.subr.mxu1 %v440_v1  ;;  %v307_v6 = vld [vmem:[#allocation2 + $0x3c0] sm:$0xff]  ;;  %613 = vmatpush2.msra.mxu0 %v311_v2 }
  0xa7   :  { %v436_v5 = vld [vmem:[#allocation2 + $0x7c8] sm:$0xff]  ;;  %v435_v7 = vld [vmem:[#allocation2 + $0x7c0] sm:$0xff]  ;;  %684 = vmatpush2.msra.mxu1 %v439_v3  ;;  %614 = vmatprep.subr.mxu0 %v308_v4 }
  0xa8   :  { %v304_v8 = vld [vmem:[#allocation2 + $0x3a8] sm:$0xff]  ;;  %685 = vmatprep.subr.mxu1 %v436_v5  ;;  %v303_v10 = vld [vmem:[#allocation2 + $0x3a0] sm:$0xff]  ;;  %615 = vmatpush2.msra.mxu0 %v307_v6  ;;  %v250_v5 = vld [vmem:[#allocation2 + $0x1f8] sm:$0xff] }
  0xa9   :  { %v432_v9 = vld [vmem:[#allocation2 + $0x7a8] sm:$0xff]  ;;  %v431_v11 = vld [vmem:[#allocation2 + $0x7a0] sm:$0xff]  ;;  %686 = vmatpush2.msra.mxu1 %v435_v7  ;;  %616 = vmatprep.subr.mxu0 %v304_v8  ;;  %v249_v7 = vld [vmem:[#allocation2 + $0x1f0] sm:$0xff] }
  0xaa   :  { %v300_v12 = vld [vmem:[#allocation2 + $0x388] sm:$0xff]  ;;  %687 = vmatprep.subr.mxu1 %v432_v9  ;;  %v299_v14 = vld [vmem:[#allocation2 + $0x380] sm:$0xff]  ;;  %617 = vmatpush2.msra.mxu0 %v303_v10  ;;  %v246_v9 = vld [vmem:[#allocation2 + $0x1d8] sm:$0xff] }
  0xab   :  { %v428_v13 = vld [vmem:[#allocation2 + $0x788] sm:$0xff]  ;;  %v427_v15 = vld [vmem:[#allocation2 + $0x780] sm:$0xff]  ;;  %688 = vmatpush2.msra.mxu1 %v431_v11  ;;  %618 = vmatprep.subr.mxu0 %v300_v12  ;;  %v245_v11 = vld [vmem:[#allocation2 + $0x1d0] sm:$0xff] }
  0xac   :  { %v296_v16 = vld [vmem:[#allocation2 + $0x368] sm:$0xff]  ;;  %689 = vmatprep.subr.mxu1 %v428_v13  ;;  %v295_v18 = vld [vmem:[#allocation2 + $0x360] sm:$0xff]  ;;  %619 = vmatpush2.msra.mxu0 %v299_v14  ;;  %v242_v13 = vld [vmem:[#allocation2 + $0x1b8] sm:$0xff] }
  0xad   :  { %v424_v17 = vld [vmem:[#allocation2 + $0x768] sm:$0xff]  ;;  %v423_v19 = vld [vmem:[#allocation2 + $0x760] sm:$0xff]  ;;  %690 = vmatpush2.msra.mxu1 %v427_v15  ;;  %620 = vmatprep.subr.mxu0 %v296_v16  ;;  %v241_v15 = vld [vmem:[#allocation2 + $0x1b0] sm:$0xff] }
  0xae   :  { %v292_v20 = vld [vmem:[#allocation2 + $0x348] sm:$0xff]  ;;  %691 = vmatprep.subr.mxu1 %v424_v17  ;;  %v291_v22 = vld [vmem:[#allocation2 + $0x340] sm:$0xff]  ;;  %621 = vmatpush2.msra.mxu0 %v295_v18  ;;  %v238_v17 = vld [vmem:[#allocation2 + $0x198] sm:$0xff] }
  0xaf   :  { %v420_v21 = vld [vmem:[#allocation2 + $0x748] sm:$0xff]  ;;  %v419_v23 = vld [vmem:[#allocation2 + $0x740] sm:$0xff]  ;;  %692 = vmatpush2.msra.mxu1 %v423_v19  ;;  %622 = vmatprep.subr.mxu0 %v292_v20  ;;  %v237_v19 = vld [vmem:[#allocation2 + $0x190] sm:$0xff] }
  0xb0   :  { %v288_v24 = vld [vmem:[#allocation2 + $0x328] sm:$0xff]  ;;  %693 = vmatprep.subr.mxu1 %v420_v21  ;;  %v287_v26 = vld [vmem:[#allocation2 + $0x320] sm:$0xff]  ;;  %623 = vmatpush2.msra.mxu0 %v291_v22  ;;  %v234_v21 = vld [vmem:[#allocation2 + $0x178] sm:$0xff] }
  0xb1   :  { %v416_v25 = vld [vmem:[#allocation2 + $0x728] sm:$0xff]  ;;  %v415_v27 = vld [vmem:[#allocation2 + $0x720] sm:$0xff]  ;;  %694 = vmatpush2.msra.mxu1 %v419_v23  ;;  %624 = vmatprep.subr.mxu0 %v288_v24  ;;  %v233_v23 = vld [vmem:[#allocation2 + $0x170] sm:$0xff] }
  0xb2   :  { %v284_v28 = vld [vmem:[#allocation2 + $0x308] sm:$0xff]  ;;  %695 = vmatprep.subr.mxu1 %v416_v25  ;;  %v283_v30 = vld [vmem:[#allocation2 + $0x300] sm:$0xff]  ;;  %625 = vmatpush2.msra.mxu0 %v287_v26  ;;  %v230_v25 = vld [vmem:[#allocation2 + $0x158] sm:$0xff] }
  0xb3   :  { %v412_v29 = vld [vmem:[#allocation2 + $0x708] sm:$0xff]  ;;  %v411_v31 = vld [vmem:[#allocation2 + $0x700] sm:$0xff]  ;;  %696 = vmatpush2.msra.mxu1 %v415_v27  ;;  %626 = vmatprep.subr.mxu0 %v284_v28  ;;  %v229_v27 = vld [vmem:[#allocation2 + $0x150] sm:$0xff] }
  0xb4   :  { %v280_v32 = vld [vmem:[#allocation2 + $0x2e8] sm:$0xff]  ;;  %697 = vmatprep.subr.mxu1 %v412_v29  ;;  %v279_v34 = vld [vmem:[#allocation2 + $0x2e0] sm:$0xff]  ;;  %627 = vmatpush2.msra.mxu0 %v283_v30  ;;  %v226_v29 = vld [vmem:[#allocation2 + $0x138] sm:$0xff] }
  0xb5   :  { %v408_v33 = vld [vmem:[#allocation2 + $0x6e8] sm:$0xff]  ;;  %v407_v35 = vld [vmem:[#allocation2 + $0x6e0] sm:$0xff]  ;;  %698 = vmatpush2.msra.mxu1 %v411_v31  ;;  %628 = vmatprep.subr.mxu0 %v280_v32  ;;  %v225_v31 = vld [vmem:[#allocation2 + $0x130] sm:$0xff] }
  0xb6   :  { %v276_v36 = vld [vmem:[#allocation2 + $0x2c8] sm:$0xff]  ;;  %699 = vmatprep.subr.mxu1 %v408_v33  ;;  %v275_v38 = vld [vmem:[#allocation2 + $0x2c0] sm:$0xff]  ;;  %629 = vmatpush2.msra.mxu0 %v279_v34  ;;  %v222_v33 = vld [vmem:[#allocation2 + $0x118] sm:$0xff] }
  0xb7   :  { %v404_v37 = vld [vmem:[#allocation2 + $0x6c8] sm:$0xff]  ;;  %v403_v39 = vld [vmem:[#allocation2 + $0x6c0] sm:$0xff]  ;;  %700 = vmatpush2.msra.mxu1 %v407_v35  ;;  %630 = vmatprep.subr.mxu0 %v276_v36  ;;  %v221_v35 = vld [vmem:[#allocation2 + $0x110] sm:$0xff] }
  0xb8   :  { %v272_v40 = vld [vmem:[#allocation2 + $0x2a8] sm:$0xff]  ;;  %701 = vmatprep.subr.mxu1 %v404_v37  ;;  %v271_v42 = vld [vmem:[#allocation2 + $0x2a0] sm:$0xff]  ;;  %631 = vmatpush2.msra.mxu0 %v275_v38  ;;  %v218_v37 = vld [vmem:[#allocation2 + $0xf8] sm:$0xff] }
  0xb9   :  { %v400_v41 = vld [vmem:[#allocation2 + $0x6a8] sm:$0xff]  ;;  %v399_v43 = vld [vmem:[#allocation2 + $0x6a0] sm:$0xff]  ;;  %702 = vmatpush2.msra.mxu1 %v403_v39  ;;  %632 = vmatprep.subr.mxu0 %v272_v40  ;;  %v217_v39 = vld [vmem:[#allocation2 + $0xf0] sm:$0xff] }
  0xba   :  { %v268_v44 = vld [vmem:[#allocation2 + $0x288] sm:$0xff]  ;;  %703 = vmatprep.subr.mxu1 %v400_v41  ;;  %v267_v46 = vld [vmem:[#allocation2 + $0x280] sm:$0xff]  ;;  %633 = vmatpush2.msra.mxu0 %v271_v42  ;;  %v214_v41 = vld [vmem:[#allocation2 + $0xd8] sm:$0xff] }
  0xbb   :  { %v396_v45 = vld [vmem:[#allocation2 + $0x688] sm:$0xff]  ;;  %v395_v47 = vld [vmem:[#allocation2 + $0x680] sm:$0xff]  ;;  %704 = vmatpush2.msra.mxu1 %v399_v43  ;;  %634 = vmatprep.subr.mxu0 %v268_v44  ;;  %v213_v43 = vld [vmem:[#allocation2 + $0xd0] sm:$0xff] }
  0xbc   :  { %v264_v48 = vld [vmem:[#allocation2 + $0x268] sm:$0xff]  ;;  %705 = vmatprep.subr.mxu1 %v396_v45  ;;  %v263_v50 = vld [vmem:[#allocation2 + $0x260] sm:$0xff]  ;;  %635 = vmatpush2.msra.mxu0 %v267_v46  ;;  %v210_v45 = vld [vmem:[#allocation2 + $0xb8] sm:$0xff] }
  0xbd   :  { %v392_v49 = vld [vmem:[#allocation2 + $0x668] sm:$0xff]  ;;  %v391_v51 = vld [vmem:[#allocation2 + $0x660] sm:$0xff]  ;;  %706 = vmatpush2.msra.mxu1 %v395_v47  ;;  %636 = vmatprep.subr.mxu0 %v264_v48  ;;  %v209_v47 = vld [vmem:[#allocation2 + $0xb0] sm:$0xff] }
  0xbe   :  { %v260_v52 = vld [vmem:[#allocation2 + $0x248] sm:$0xff]  ;;  %707 = vmatprep.subr.mxu1 %v392_v49  ;;  %v259_v54 = vld [vmem:[#allocation2 + $0x240] sm:$0xff]  ;;  %637 = vmatpush2.msra.mxu0 %v263_v50  ;;  %v206_v49 = vld [vmem:[#allocation2 + $0x98] sm:$0xff] }
  0xbf   :  { %v388_v53 = vld [vmem:[#allocation2 + $0x648] sm:$0xff]  ;;  %v387_v55 = vld [vmem:[#allocation2 + $0x640] sm:$0xff]  ;;  %708 = vmatpush2.msra.mxu1 %v391_v51  ;;  %638 = vmatprep.subr.mxu0 %v260_v52  ;;  %v205_v51 = vld [vmem:[#allocation2 + $0x90] sm:$0xff] }
  0xc0   :  { %v3459_v56 = vld [vmem:[%s4746_s24] sm:$0xff]  ;;  %v256_v57 = vld [vmem:[#allocation2 + $0x228] sm:$0xff]  ;;  %709 = vmatprep.subr.mxu1 %v388_v53  ;;  %639 = vmatpush2.msra.mxu0 %v259_v54  ;;  %v202_v53 = vld [vmem:[#allocation2 + $0x78] sm:$0xff] }
  0xc1   :  { %v384_v58 = vld [vmem:[#allocation2 + $0x628] sm:$0xff]  ;;  %v255_v60 = vld [vmem:[#allocation2 + $0x220] sm:$0xff]  ;;  %710 = vmatpush2.msra.mxu1 %v387_v55  ;;  %v3466_v0 = vcombine.high %v3459_v56, %v3459_v56  ;;  %640 = vmatprep.subr.mxu0 %v256_v57  ;;  %v201_v55 = vld [vmem:[#allocation2 + $0x70] sm:$0xff] }
  0xc2   :  { %v185_v59 = vld [vmem:[%s4746_s24 + $0x8] sm:$0xff]  ;;  %v383_v61 = vld [vmem:[#allocation2 + $0x620] sm:$0xff]  ;;  %711 = vmatprep.subr.mxu1 %v384_v58  ;;  %641 = vmatpush2.msra.mxu0 %v255_v60  ;;  %v198_v58 = vld [vmem:[#allocation2 + $0x58] sm:$0xff] }
  0xc3   :  { %v252_v62 = vld [vmem:[#allocation2 + $0x208] sm:$0xff]  ;;  %v251_v1 = vld [vmem:[#allocation2 + $0x200] sm:$0xff]  ;;  %v3468_v2 = vcombine.high %v185_v59, %v185_v59  ;;  %712 = vmatpush2.msra.mxu1 %v383_v61  ;;  %644 = vmatprep.mubr.f32.mxu0 %v3466_v0  ;;  %v197_v60 = vld [vmem:[#allocation2 + $0x50] sm:$0xff] }
  0xc4   :  { %v380_v63 = vld [vmem:[#allocation2 + $0x608] sm:$0xff]  ;;  %v379_v3 = vld [vmem:[#allocation2 + $0x600] sm:$0xff]  ;;  %642 = vmatprep.subr.mxu0 %v252_v62  ;;  %v194_v62 = vld [vmem:[#allocation2 + $0x38] sm:$0xff] }
  0xc5   :  { %713 = vmatprep.subr.mxu1 %v380_v63  ;;  %643 = vmatpush2.msra.mxu0 %v251_v1  ;;  %v504_v4 = vld [vmem:[#allocation2 + $0x9e8] sm:$0xff]  ;;  %v503_v6 = vld [vmem:[#allocation2 + $0x9e0] sm:$0xff]  ;;  %v193_v1 = vld [vmem:[#allocation2 + $0x30] sm:$0xff] }
  0xc6   :  { %714 = vmatpush2.msra.mxu1 %v379_v3  ;;  %715 = vmatprep.mubr.f32.mxu1 %v3468_v2  ;;  %v500_v8 = vld [vmem:[#allocation2 + $0x9c8] sm:$0xff]  ;;  %v499_v10 = vld [vmem:[#allocation2 + $0x9c0] sm:$0xff] }
  0xc7   :  { %645 = vmatmul.mubr.f32.vlgmr.msra.gmra.mxu0 %v3459_v56  ;;  %716 = vmatmul.mubr.f32.vlgmr.msra.gmra.mxu1 %v185_v59  ;;  %v496_v12 = vld [vmem:[#allocation2 + $0x9a8] sm:$0xff]  ;;  %v495_v14 = vld [vmem:[#allocation2 + $0x9a0] sm:$0xff] }
  0xc8   :  { %722 = vmatprep.subr.mxu0 %v504_v4  ;;  %793 = vmatprep.subr.mxu1 %v250_v5  ;;  %v492_v16 = vld [vmem:[#allocation2 + $0x988] sm:$0xff]  ;;  %v491_v18 = vld [vmem:[#allocation2 + $0x980] sm:$0xff]  ;;  %v190_v4 = vld [vmem:[#allocation2 + $0x18] sm:$0xff] }
  0xc9   :  { %723 = vmatpush1.msra.mxu0 %v503_v6  ;;  %794 = vmatpush1.msra.mxu1 %v249_v7  ;;  %v488_v20 = vld [vmem:[#allocation2 + $0x968] sm:$0xff]  ;;  %v487_v22 = vld [vmem:[#allocation2 + $0x960] sm:$0xff]  ;;  %v189_v6 = vld [vmem:[#allocation2 + $0x10] sm:$0xff] }
  0xca   :  { %724 = vmatprep.subr.mxu0 %v500_v8  ;;  %795 = vmatprep.subr.mxu1 %v246_v9  ;;  %v484_v24 = vld [vmem:[#allocation2 + $0x948] sm:$0xff]  ;;  %v483_v26 = vld [vmem:[#allocation2 + $0x940] sm:$0xff]  ;;  %v314_v8 = vld [vmem:[#allocation2 + $0x3f8] sm:$0xff] }
  0xcb   :  { %725 = vmatpush1.msra.mxu0 %v499_v10  ;;  %796 = vmatpush1.msra.mxu1 %v245_v11  ;;  %v480_v28 = vld [vmem:[#allocation2 + $0x928] sm:$0xff]  ;;  %v479_v30 = vld [vmem:[#allocation2 + $0x920] sm:$0xff]  ;;  %v313_v10 = vld [vmem:[#allocation2 + $0x3f0] sm:$0xff] }
  0xcc   :  { %726 = vmatprep.subr.mxu0 %v496_v12  ;;  %797 = vmatprep.subr.mxu1 %v242_v13  ;;  %v476_v32 = vld [vmem:[#allocation2 + $0x908] sm:$0xff]  ;;  %v475_v34 = vld [vmem:[#allocation2 + $0x900] sm:$0xff]  ;;  %v310_v12 = vld [vmem:[#allocation2 + $0x3d8] sm:$0xff] }
  0xcd   :  { %727 = vmatpush1.msra.mxu0 %v495_v14  ;;  %798 = vmatpush1.msra.mxu1 %v241_v15  ;;  %v472_v36 = vld [vmem:[#allocation2 + $0x8e8] sm:$0xff]  ;;  %v471_v38 = vld [vmem:[#allocation2 + $0x8e0] sm:$0xff]  ;;  %v309_v14 = vld [vmem:[#allocation2 + $0x3d0] sm:$0xff] }
  0xce   :  { %728 = vmatprep.subr.mxu0 %v492_v16  ;;  %799 = vmatprep.subr.mxu1 %v238_v17  ;;  %v468_v40 = vld [vmem:[#allocation2 + $0x8c8] sm:$0xff]  ;;  %v467_v42 = vld [vmem:[#allocation2 + $0x8c0] sm:$0xff]  ;;  %v306_v16 = vld [vmem:[#allocation2 + $0x3b8] sm:$0xff] }
  0xcf   :  { %729 = vmatpush1.msra.mxu0 %v491_v18  ;;  %800 = vmatpush1.msra.mxu1 %v237_v19  ;;  %v464_v44 = vld [vmem:[#allocation2 + $0x8a8] sm:$0xff]  ;;  %v463_v46 = vld [vmem:[#allocation2 + $0x8a0] sm:$0xff]  ;;  %v305_v18 = vld [vmem:[#allocation2 + $0x3b0] sm:$0xff] }
  0xd0   :  { %730 = vmatprep.subr.mxu0 %v488_v20  ;;  %801 = vmatprep.subr.mxu1 %v234_v21  ;;  %v460_v48 = vld [vmem:[#allocation2 + $0x888] sm:$0xff]  ;;  %v459_v50 = vld [vmem:[#allocation2 + $0x880] sm:$0xff]  ;;  %v302_v20 = vld [vmem:[#allocation2 + $0x398] sm:$0xff] }
  0xd1   :  { %731 = vmatpush1.msra.mxu0 %v487_v22  ;;  %802 = vmatpush1.msra.mxu1 %v233_v23  ;;  %v456_v52 = vld [vmem:[#allocation2 + $0x868] sm:$0xff]  ;;  %v455_v54 = vld [vmem:[#allocation2 + $0x860] sm:$0xff]  ;;  %v301_v22 = vld [vmem:[#allocation2 + $0x390] sm:$0xff] }
  0xd2   :  { %732 = vmatprep.subr.mxu0 %v484_v24  ;;  %803 = vmatprep.subr.mxu1 %v230_v25  ;;  %v452_v57 = vld [vmem:[#allocation2 + $0x848] sm:$0xff]  ;;  %v451_v59 = vld [vmem:[#allocation2 + $0x840] sm:$0xff]  ;;  %v298_v24 = vld [vmem:[#allocation2 + $0x378] sm:$0xff] }
  0xd3   :  { %733 = vmatpush1.msra.mxu0 %v483_v26  ;;  %804 = vmatpush1.msra.mxu1 %v229_v27  ;;  %v448_v61 = vld [vmem:[#allocation2 + $0x828] sm:$0xff]  ;;  %v447_v63 = vld [vmem:[#allocation2 + $0x820] sm:$0xff]  ;;  %v297_v26 = vld [vmem:[#allocation2 + $0x370] sm:$0xff] }
  0xd4   :  { %734 = vmatprep.subr.mxu0 %v480_v28  ;;  %805 = vmatprep.subr.mxu1 %v226_v29  ;;  %v444_v3 = vld [vmem:[#allocation2 + $0x808] sm:$0xff]  ;;  %v443_v5 = vld [vmem:[#allocation2 + $0x800] sm:$0xff]  ;;  %v294_v28 = vld [vmem:[#allocation2 + $0x358] sm:$0xff] }
  0xd5   :  { %735 = vmatpush1.msra.mxu0 %v479_v30  ;;  %806 = vmatpush1.msra.mxu1 %v225_v31  ;;  %v568_v7 = vld [vmem:[#allocation2 + $0xbe8] sm:$0xff]  ;;  %v567_v9 = vld [vmem:[#allocation2 + $0xbe0] sm:$0xff]  ;;  %v293_v30 = vld [vmem:[#allocation2 + $0x350] sm:$0xff] }
  0xd6   :  { %736 = vmatprep.subr.mxu0 %v476_v32  ;;  %807 = vmatprep.subr.mxu1 %v222_v33  ;;  %v564_v11 = vld [vmem:[#allocation2 + $0xbc8] sm:$0xff]  ;;  %v563_v13 = vld [vmem:[#allocation2 + $0xbc0] sm:$0xff]  ;;  %v290_v32 = vld [vmem:[#allocation2 + $0x338] sm:$0xff] }
  0xd7   :  { %737 = vmatpush1.msra.mxu0 %v475_v34  ;;  %808 = vmatpush1.msra.mxu1 %v221_v35  ;;  %v560_v15 = vld [vmem:[#allocation2 + $0xba8] sm:$0xff]  ;;  %v559_v17 = vld [vmem:[#allocation2 + $0xba0] sm:$0xff]  ;;  %v289_v34 = vld [vmem:[#allocation2 + $0x330] sm:$0xff] }
  0xd8   :  { %738 = vmatprep.subr.mxu0 %v472_v36  ;;  %809 = vmatprep.subr.mxu1 %v218_v37  ;;  %v556_v19 = vld [vmem:[#allocation2 + $0xb88] sm:$0xff]  ;;  %v555_v21 = vld [vmem:[#allocation2 + $0xb80] sm:$0xff]  ;;  %v286_v36 = vld [vmem:[#allocation2 + $0x318] sm:$0xff] }
  0xd9   :  { %739 = vmatpush1.msra.mxu0 %v471_v38  ;;  %810 = vmatpush1.msra.mxu1 %v217_v39  ;;  %v552_v23 = vld [vmem:[#allocation2 + $0xb68] sm:$0xff]  ;;  %v551_v25 = vld [vmem:[#allocation2 + $0xb60] sm:$0xff]  ;;  %v285_v38 = vld [vmem:[#allocation2 + $0x310] sm:$0xff] }
  0xda   :  { %740 = vmatprep.subr.mxu0 %v468_v40  ;;  %811 = vmatprep.subr.mxu1 %v214_v41  ;;  %v548_v27 = vld [vmem:[#allocation2 + $0xb48] sm:$0xff]  ;;  %v547_v29 = vld [vmem:[#allocation2 + $0xb40] sm:$0xff]  ;;  %v282_v40 = vld [vmem:[#allocation2 + $0x2f8] sm:$0xff] }
  0xdb   :  { %741 = vmatpush1.msra.mxu0 %v467_v42  ;;  %812 = vmatpush1.msra.mxu1 %v213_v43  ;;  %v544_v31 = vld [vmem:[#allocation2 + $0xb28] sm:$0xff]  ;;  %v543_v33 = vld [vmem:[#allocation2 + $0xb20] sm:$0xff]  ;;  %v281_v42 = vld [vmem:[#allocation2 + $0x2f0] sm:$0xff] }
  0xdc   :  { %742 = vmatprep.subr.mxu0 %v464_v44  ;;  %813 = vmatprep.subr.mxu1 %v210_v45  ;;  %v540_v35 = vld [vmem:[#allocation2 + $0xb08] sm:$0xff]  ;;  %v539_v37 = vld [vmem:[#allocation2 + $0xb00] sm:$0xff]  ;;  %v278_v44 = vld [vmem:[#allocation2 + $0x2d8] sm:$0xff] }
  0xdd   :  { %743 = vmatpush1.msra.mxu0 %v463_v46  ;;  %814 = vmatpush1.msra.mxu1 %v209_v47  ;;  %v536_v39 = vld [vmem:[#allocation2 + $0xae8] sm:$0xff]  ;;  %v535_v41 = vld [vmem:[#allocation2 + $0xae0] sm:$0xff]  ;;  %v277_v46 = vld [vmem:[#allocation2 + $0x2d0] sm:$0xff] }
  0xde   :  { %744 = vmatprep.subr.mxu0 %v460_v48  ;;  %815 = vmatprep.subr.mxu1 %v206_v49  ;;  %v532_v43 = vld [vmem:[#allocation2 + $0xac8] sm:$0xff]  ;;  %v531_v45 = vld [vmem:[#allocation2 + $0xac0] sm:$0xff]  ;;  %v274_v48 = vld [vmem:[#allocation2 + $0x2b8] sm:$0xff] }
  0xdf   :  { %745 = vmatpush1.msra.mxu0 %v459_v50  ;;  %816 = vmatpush1.msra.mxu1 %v205_v51  ;;  %v528_v47 = vld [vmem:[#allocation2 + $0xaa8] sm:$0xff]  ;;  %v527_v49 = vld [vmem:[#allocation2 + $0xaa0] sm:$0xff]  ;;  %v273_v50 = vld [vmem:[#allocation2 + $0x2b0] sm:$0xff] }
  0xe0   :  { %746 = vmatprep.subr.mxu0 %v456_v52  ;;  %817 = vmatprep.subr.mxu1 %v202_v53  ;;  %v524_v51 = vld [vmem:[#allocation2 + $0xa88] sm:$0xff]  ;;  %v270_v52 = vld [vmem:[#allocation2 + $0x298] sm:$0xff]  ;;  %v523_v53 = vld [vmem:[#allocation2 + $0xa80] sm:$0xff] }
  0xe1   :  { %747 = vmatpush1.msra.mxu0 %v455_v54  ;;  %818 = vmatpush1.msra.mxu1 %v201_v55  ;;  %v269_v54 = vld [vmem:[#allocation2 + $0x290] sm:$0xff]  ;;  %v520_v55 = vld [vmem:[#allocation2 + $0xa68] sm:$0xff] }
  0xe2   :  { %748 = vmatprep.subr.mxu0 %v452_v57  ;;  %819 = vmatprep.subr.mxu1 %v198_v58  ;;  %v266_v57 = vld [vmem:[#allocation2 + $0x278] sm:$0xff]  ;;  %v519_v58 = vld [vmem:[#allocation2 + $0xa60] sm:$0xff] }
  0xe3   :  { %749 = vmatpush1.msra.mxu0 %v451_v59  ;;  %820 = vmatpush1.msra.mxu1 %v197_v60  ;;  %v265_v59 = vld [vmem:[#allocation2 + $0x270] sm:$0xff]  ;;  %v516_v60 = vld [vmem:[#allocation2 + $0xa48] sm:$0xff] }
  0xe4   :  { %750 = vmatprep.subr.mxu0 %v448_v61  ;;  %821 = vmatprep.subr.mxu1 %v194_v62  ;;  %v262_v61 = vld [vmem:[#allocation2 + $0x258] sm:$0xff]  ;;  %v515_v62 = vld [vmem:[#allocation2 + $0xa40] sm:$0xff] }
  0xe5   :  { %751 = vmatpush1.msra.mxu0 %v447_v63  ;;  %822 = vmatpush1.msra.mxu1 %v193_v1  ;;  %v261_v63 = vld [vmem:[#allocation2 + $0x250] sm:$0xff] }
  0xe6   :  { %752 = vmatprep.subr.mxu0 %v444_v3  ;;  %823 = vmatprep.subr.mxu1 %v190_v4  ;;  %v3476_v1 = vld [vmem:[%s4746_s24 + $0x10] sm:$0xff]  ;;  %v512_v3 = vld [vmem:[#allocation2 + $0xa28] sm:$0xff]  ;;  %v258_v4 = vld [vmem:[#allocation2 + $0x238] sm:$0xff] }
  0xe7   :  { %753 = vmatpush1.msra.mxu0 %v443_v5  ;;  %824 = vmatpush1.msra.mxu1 %v189_v6  ;;  %v511_v5 = vld [vmem:[#allocation2 + $0xa20] sm:$0xff]  ;;  %v257_v6 = vld [vmem:[#allocation2 + $0x230] sm:$0xff] }
  0xe8   :  { %754 = vmatprep.subr.mxu0 %v568_v7  ;;  %825 = vmatprep.subr.mxu1 %v314_v8  ;;  %v508_v7 = vld [vmem:[#allocation2 + $0xa08] sm:$0xff]  ;;  %v254_v8 = vld [vmem:[#allocation2 + $0x218] sm:$0xff] }
  0xe9   :  { %755 = vmatpush2.msra.mxu0 %v567_v9  ;;  %826 = vmatpush2.msra.mxu1 %v313_v10  ;;  %v3480_v9 = vcombine.high %v3476_v1, %v3476_v1  ;;  %v507_v10 = vld [vmem:[#allocation2 + $0xa00] sm:$0xff] }
  0xea   :  { %756 = vmatprep.subr.mxu0 %v564_v11  ;;  %827 = vmatprep.subr.mxu1 %v310_v12  ;;  %v253_v11 = vld [vmem:[#allocation2 + $0x210] sm:$0xff]  ;;  %v378_v12 = vld [vmem:[#allocation2 + $0x5f8] sm:$0xff] }
  0xeb   :  { %757 = vmatpush2.msra.mxu0 %v563_v13  ;;  %828 = vmatpush2.msra.mxu1 %v309_v14  ;;  %v506_v13 = vld [vmem:[#allocation2 + $0x9f8] sm:$0xff]  ;;  %v377_v14 = vld [vmem:[#allocation2 + $0x5f0] sm:$0xff] }
  0xec   :  { %758 = vmatprep.subr.mxu0 %v560_v15  ;;  %829 = vmatprep.subr.mxu1 %v306_v16  ;;  %v505_v15 = vld [vmem:[#allocation2 + $0x9f0] sm:$0xff]  ;;  %v374_v16 = vld [vmem:[#allocation2 + $0x5d8] sm:$0xff] }
  0xed   :  { %759 = vmatpush2.msra.mxu0 %v559_v17  ;;  %830 = vmatpush2.msra.mxu1 %v305_v18  ;;  %v502_v17 = vld [vmem:[#allocation2 + $0x9d8] sm:$0xff]  ;;  %v373_v18 = vld [vmem:[#allocation2 + $0x5d0] sm:$0xff] }
  0xee   :  { %760 = vmatprep.subr.mxu0 %v556_v19  ;;  %831 = vmatprep.subr.mxu1 %v302_v20  ;;  %v501_v19 = vld [vmem:[#allocation2 + $0x9d0] sm:$0xff]  ;;  %v370_v20 = vld [vmem:[#allocation2 + $0x5b8] sm:$0xff] }
  0xef   :  { %761 = vmatpush2.msra.mxu0 %v555_v21  ;;  %832 = vmatpush2.msra.mxu1 %v301_v22  ;;  %v498_v21 = vld [vmem:[#allocation2 + $0x9b8] sm:$0xff]  ;;  %v369_v22 = vld [vmem:[#allocation2 + $0x5b0] sm:$0xff] }
  0xf0   :  { %762 = vmatprep.subr.mxu0 %v552_v23  ;;  %833 = vmatprep.subr.mxu1 %v298_v24  ;;  %v366_v23 = vld [vmem:[#allocation2 + $0x598] sm:$0xff] }
  0xf1   :  { %763 = vmatpush2.msra.mxu0 %v551_v25  ;;  %834 = vmatpush2.msra.mxu1 %v297_v26  ;;  %v494_v24 = vld [vmem:[#allocation2 + $0x998] sm:$0xff]  ;;  %v493_v25 = vld [vmem:[#allocation2 + $0x990] sm:$0xff] }
  0xf2   :  { %764 = vmatprep.subr.mxu0 %v548_v27  ;;  %835 = vmatprep.subr.mxu1 %v294_v28  ;;  %v362_v26 = vld [vmem:[#allocation2 + $0x578] sm:$0xff]  ;;  %v361_v28 = vld [vmem:[#allocation2 + $0x570] sm:$0xff] }
  0xf3   :  { %765 = vmatpush2.msra.mxu0 %v547_v29  ;;  %836 = vmatpush2.msra.mxu1 %v293_v30  ;;  %v490_v27 = vld [vmem:[#allocation2 + $0x978] sm:$0xff]  ;;  %v489_v29 = vld [vmem:[#allocation2 + $0x970] sm:$0xff] }
  0xf4   :  { %766 = vmatprep.subr.mxu0 %v544_v31  ;;  %837 = vmatprep.subr.mxu1 %v290_v32  ;;  %v358_v30 = vld [vmem:[#allocation2 + $0x558] sm:$0xff]  ;;  %v357_v32 = vld [vmem:[#allocation2 + $0x550] sm:$0xff] }
  0xf5   :  { %767 = vmatpush2.msra.mxu0 %v543_v33  ;;  %838 = vmatpush2.msra.mxu1 %v289_v34  ;;  %v486_v31 = vld [vmem:[#allocation2 + $0x958] sm:$0xff]  ;;  %v485_v33 = vld [vmem:[#allocation2 + $0x950] sm:$0xff] }
  0xf6   :  { %768 = vmatprep.subr.mxu0 %v540_v35  ;;  %839 = vmatprep.subr.mxu1 %v286_v36  ;;  %v354_v34 = vld [vmem:[#allocation2 + $0x538] sm:$0xff]  ;;  %v353_v36 = vld [vmem:[#allocation2 + $0x530] sm:$0xff] }
  0xf7   :  { %769 = vmatpush2.msra.mxu0 %v539_v37  ;;  %840 = vmatpush2.msra.mxu1 %v285_v38  ;;  %v482_v35 = vld [vmem:[#allocation2 + $0x938] sm:$0xff]  ;;  %v481_v37 = vld [vmem:[#allocation2 + $0x930] sm:$0xff] }
  0xf8   :  { %770 = vmatprep.subr.mxu0 %v536_v39  ;;  %841 = vmatprep.subr.mxu1 %v282_v40  ;;  %v350_v38 = vld [vmem:[#allocation2 + $0x518] sm:$0xff]  ;;  %v349_v40 = vld [vmem:[#allocation2 + $0x510] sm:$0xff] }
  0xf9   :  { %771 = vmatpush2.msra.mxu0 %v535_v41  ;;  %842 = vmatpush2.msra.mxu1 %v281_v42  ;;  %v478_v39 = vld [vmem:[#allocation2 + $0x918] sm:$0xff]  ;;  %v477_v41 = vld [vmem:[#allocation2 + $0x910] sm:$0xff] }
  0xfa   :  { %772 = vmatprep.subr.mxu0 %v532_v43  ;;  %843 = vmatprep.subr.mxu1 %v278_v44  ;;  %v346_v42 = vld [vmem:[#allocation2 + $0x4f8] sm:$0xff]  ;;  %v345_v44 = vld [vmem:[#allocation2 + $0x4f0] sm:$0xff] }
  0xfb   :  { %773 = vmatpush2.msra.mxu0 %v531_v45  ;;  %844 = vmatpush2.msra.mxu1 %v277_v46  ;;  %v474_v43 = vld [vmem:[#allocation2 + $0x8f8] sm:$0xff]  ;;  %v473_v45 = vld [vmem:[#allocation2 + $0x8f0] sm:$0xff] }
  0xfc   :  { %774 = vmatprep.subr.mxu0 %v528_v47  ;;  %845 = vmatprep.subr.mxu1 %v274_v48  ;;  %v342_v46 = vld [vmem:[#allocation2 + $0x4d8] sm:$0xff]  ;;  %v341_v48 = vld [vmem:[#allocation2 + $0x4d0] sm:$0xff] }
  0xfd   :  { %775 = vmatpush2.msra.mxu0 %v527_v49  ;;  %846 = vmatpush2.msra.mxu1 %v273_v50  ;;  %v470_v47 = vld [vmem:[#allocation2 + $0x8d8] sm:$0xff]  ;;  %v469_v49 = vld [vmem:[#allocation2 + $0x8d0] sm:$0xff] }
  0xfe   :  { %776 = vmatprep.subr.mxu0 %v524_v51  ;;  %847 = vmatprep.subr.mxu1 %v270_v52  ;;  %v338_v50 = vld [vmem:[#allocation2 + $0x4b8] sm:$0xff]  ;;  %v337_v52 = vld [vmem:[#allocation2 + $0x4b0] sm:$0xff] }
  0xff   :  { %777 = vmatpush2.msra.mxu0 %v523_v53  ;;  %848 = vmatpush2.msra.mxu1 %v269_v54  ;;  %v466_v51 = vld [vmem:[#allocation2 + $0x8b8] sm:$0xff]  ;;  %v465_v53 = vld [vmem:[#allocation2 + $0x8b0] sm:$0xff] }
 0x100   :  { %778 = vmatprep.subr.mxu0 %v520_v55  ;;  %849 = vmatprep.subr.mxu1 %v266_v57  ;;  %v334_v54 = vld [vmem:[#allocation2 + $0x498] sm:$0xff]  ;;  %v333_v57 = vld [vmem:[#allocation2 + $0x490] sm:$0xff] }
 0x101   :  { %779 = vmatpush2.msra.mxu0 %v519_v58  ;;  %850 = vmatpush2.msra.mxu1 %v265_v59  ;;  %v462_v55 = vld [vmem:[#allocation2 + $0x898] sm:$0xff]  ;;  %v461_v58 = vld [vmem:[#allocation2 + $0x890] sm:$0xff] }
 0x102   :  { %780 = vmatprep.subr.mxu0 %v516_v60  ;;  %851 = vmatprep.subr.mxu1 %v262_v61  ;;  %v330_v59 = vld [vmem:[#allocation2 + $0x478] sm:$0xff]  ;;  %v329_v61 = vld [vmem:[#allocation2 + $0x470] sm:$0xff] }
 0x103   :  { %781 = vmatpush2.msra.mxu0 %v515_v62  ;;  %852 = vmatpush2.msra.mxu1 %v261_v63  ;;  %v458_v60 = vld [vmem:[#allocation2 + $0x878] sm:$0xff]  ;;  %v457_v62 = vld [vmem:[#allocation2 + $0x870] sm:$0xff] }
 0x104   :  { %782 = vmatprep.subr.mxu0 %v512_v3  ;;  %853 = vmatprep.subr.mxu1 %v258_v4  ;;  %v326_v63 = vld [vmem:[#allocation2 + $0x458] sm:$0xff]  ;;  %v325_v4 = vld [vmem:[#allocation2 + $0x450] sm:$0xff] }
 0x105   :  { %783 = vmatpush2.msra.mxu0 %v511_v5  ;;  %854 = vmatpush2.msra.mxu1 %v257_v6  ;;  %v454_v3 = vld [vmem:[#allocation2 + $0x858] sm:$0xff]  ;;  %v453_v5 = vld [vmem:[#allocation2 + $0x850] sm:$0xff] }
 0x106   :  { %784 = vmatprep.subr.mxu0 %v508_v7  ;;  %855 = vmatprep.subr.mxu1 %v254_v8  ;;  %v322_v6 = vld [vmem:[#allocation2 + $0x438] sm:$0xff]  ;;  %v321_v8 = vld [vmem:[#allocation2 + $0x430] sm:$0xff] }
 0x107   :  { %785 = vmatpush2.msra.mxu0 %v507_v10  ;;  %786 = vmatprep.mubr.f32.mxu0 %v3480_v9  ;;  %v450_v7 = vld [vmem:[#allocation2 + $0x838] sm:$0xff]  ;;  %v449_v10 = vld [vmem:[#allocation2 + $0x830] sm:$0xff] }
 0x108   :  { %856 = vmatpush2.msra.mxu1 %v253_v11  ;;  %857 = vmatprep.mubr.f32.mxu1 %v3466_v0  ;;  %v497_v0 = vld [vmem:[#allocation2 + $0x9b0] sm:$0xff]  ;;  %v318_v11 = vld [vmem:[#allocation2 + $0x418] sm:$0xff] }
 0x109   :  { %787 = vmatmul.mubr.f32.vlgmr.msra.gmra.mxu0 %v3476_v1  ;;  %858 = vmatmul.mubr.f32.vlgmr.msra.gmra.mxu1 %v3459_v56  ;;  %v365_v56 = vld [vmem:[#allocation2 + $0x590] sm:$0xff] }
 0x10a   :  { %864 = vmatprep.subr.mxu0 %v378_v12  ;;  %935 = vmatprep.subr.mxu1 %v506_v13  ;;  %v446_v12 = vld [vmem:[#allocation2 + $0x818] sm:$0xff]  ;;  %v317_v13 = vld [vmem:[#allocation2 + $0x410] sm:$0xff] }
 0x10b   :  { %865 = vmatpush1.msra.mxu0 %v377_v14  ;;  %936 = vmatpush1.msra.mxu1 %v505_v15  ;;  %v445_v14 = vld [vmem:[#allocation2 + $0x810] sm:$0xff]  ;;  %v442_v15 = vld [vmem:[#allocation2 + $0x7f8] sm:$0xff] }
 0x10c   :  { %866 = vmatprep.subr.mxu0 %v374_v16  ;;  %937 = vmatprep.subr.mxu1 %v502_v17  ;;  %v570_v16 = vld [vmem:[#allocation2 + $0xbf8] sm:$0xff]  ;;  %v441_v17 = vld [vmem:[#allocation2 + $0x7f0] sm:$0xff] }
 0x10d   :  { %867 = vmatpush1.msra.mxu0 %v373_v18  ;;  %938 = vmatpush1.msra.mxu1 %v501_v19  ;;  %v569_v18 = vld [vmem:[#allocation2 + $0xbf0] sm:$0xff]  ;;  %v438_v19 = vld [vmem:[#allocation2 + $0x7d8] sm:$0xff] }
 0x10e   :  { %868 = vmatprep.subr.mxu0 %v370_v20  ;;  %939 = vmatprep.subr.mxu1 %v498_v21  ;;  %v566_v20 = vld [vmem:[#allocation2 + $0xbd8] sm:$0xff]  ;;  %v437_v21 = vld [vmem:[#allocation2 + $0x7d0] sm:$0xff] }
 0x10f   :  { %869 = vmatpush1.msra.mxu0 %v369_v22  ;;  %940 = vmatpush1.msra.mxu1 %v497_v0  ;;  %v565_v22 = vld [vmem:[#allocation2 + $0xbd0] sm:$0xff]  ;;  %v434_v0 = vld [vmem:[#allocation2 + $0x7b8] sm:$0xff] }
 0x110   :  { %870 = vmatprep.subr.mxu0 %v366_v23  ;;  %941 = vmatprep.subr.mxu1 %v494_v24  ;;  %v562_v23 = vld [vmem:[#allocation2 + $0xbb8] sm:$0xff]  ;;  %v433_v24 = vld [vmem:[#allocation2 + $0x7b0] sm:$0xff] }
 0x111   :  { %871 = vmatpush1.msra.mxu0 %v365_v56  ;;  %942 = vmatpush1.msra.mxu1 %v493_v25  ;;  %v561_v56 = vld [vmem:[#allocation2 + $0xbb0] sm:$0xff]  ;;  %v430_v25 = vld [vmem:[#allocation2 + $0x798] sm:$0xff] }
 0x112   :  { %872 = vmatprep.subr.mxu0 %v362_v26  ;;  %943 = vmatprep.subr.mxu1 %v490_v27  ;;  %v558_v26 = vld [vmem:[#allocation2 + $0xb98] sm:$0xff]  ;;  %v429_v27 = vld [vmem:[#allocation2 + $0x790] sm:$0xff] }
 0x113   :  { %873 = vmatpush1.msra.mxu0 %v361_v28  ;;  %944 = vmatpush1.msra.mxu1 %v489_v29  ;;  %v557_v28 = vld [vmem:[#allocation2 + $0xb90] sm:$0xff]  ;;  %v426_v29 = vld [vmem:[#allocation2 + $0x778] sm:$0xff] }
 0x114   :  { %874 = vmatprep.subr.mxu0 %v358_v30  ;;  %945 = vmatprep.subr.mxu1 %v486_v31  ;;  %v554_v30 = vld [vmem:[#allocation2 + $0xb78] sm:$0xff]  ;;  %v425_v31 = vld [vmem:[#allocation2 + $0x770] sm:$0xff] }
 0x115   :  { %875 = vmatpush1.msra.mxu0 %v357_v32  ;;  %946 = vmatpush1.msra.mxu1 %v485_v33  ;;  %v553_v32 = vld [vmem:[#allocation2 + $0xb70] sm:$0xff]  ;;  %v422_v33 = vld [vmem:[#allocation2 + $0x758] sm:$0xff] }
 0x116   :  { %876 = vmatprep.subr.mxu0 %v354_v34  ;;  %947 = vmatprep.subr.mxu1 %v482_v35  ;;  %v550_v34 = vld [vmem:[#allocation2 + $0xb58] sm:$0xff]  ;;  %v421_v35 = vld [vmem:[#allocation2 + $0x750] sm:$0xff] }
 0x117   :  { %877 = vmatpush1.msra.mxu0 %v353_v36  ;;  %948 = vmatpush1.msra.mxu1 %v481_v37  ;;  %v549_v36 = vld [vmem:[#allocation2 + $0xb50] sm:$0xff]  ;;  %v418_v37 = vld [vmem:[#allocation2 + $0x738] sm:$0xff] }
 0x118   :  { %878 = vmatprep.subr.mxu0 %v350_v38  ;;  %949 = vmatprep.subr.mxu1 %v478_v39  ;;  %v546_v38 = vld [vmem:[#allocation2 + $0xb38] sm:$0xff]  ;;  %v417_v39 = vld [vmem:[#allocation2 + $0x730] sm:$0xff] }
 0x119   :  { %879 = vmatpush1.msra.mxu0 %v349_v40  ;;  %950 = vmatpush1.msra.mxu1 %v477_v41  ;;  %v545_v40 = vld [vmem:[#allocation2 + $0xb30] sm:$0xff]  ;;  %v414_v41 = vld [vmem:[#allocation2 + $0x718] sm:$0xff] }
 0x11a   :  { %880 = vmatprep.subr.mxu0 %v346_v42  ;;  %951 = vmatprep.subr.mxu1 %v474_v43  ;;  %v542_v42 = vld [vmem:[#allocation2 + $0xb18] sm:$0xff]  ;;  %v413_v43 = vld [vmem:[#allocation2 + $0x710] sm:$0xff] }
 0x11b   :  { %881 = vmatpush1.msra.mxu0 %v345_v44  ;;  %952 = vmatpush1.msra.mxu1 %v473_v45  ;;  %v541_v44 = vld [vmem:[#allocation2 + $0xb10] sm:$0xff]  ;;  %v410_v45 = vld [vmem:[#allocation2 + $0x6f8] sm:$0xff] }
 0x11c   :  { %882 = vmatprep.subr.mxu0 %v342_v46  ;;  %953 = vmatprep.subr.mxu1 %v470_v47  ;;  %v538_v46 = vld [vmem:[#allocation2 + $0xaf8] sm:$0xff]  ;;  %v409_v47 = vld [vmem:[#allocation2 + $0x6f0] sm:$0xff] }
 0x11d   :  { %883 = vmatpush1.msra.mxu0 %v341_v48  ;;  %954 = vmatpush1.msra.mxu1 %v469_v49  ;;  %v537_v48 = vld [vmem:[#allocation2 + $0xaf0] sm:$0xff]  ;;  %v406_v49 = vld [vmem:[#allocation2 + $0x6d8] sm:$0xff] }
 0x11e   :  { %884 = vmatprep.subr.mxu0 %v338_v50  ;;  %955 = vmatprep.subr.mxu1 %v466_v51  ;;  %v534_v50 = vld [vmem:[#allocation2 + $0xad8] sm:$0xff]  ;;  %v405_v51 = vld [vmem:[#allocation2 + $0x6d0] sm:$0xff] }
 0x11f   :  { %885 = vmatpush1.msra.mxu0 %v337_v52  ;;  %956 = vmatpush1.msra.mxu1 %v465_v53  ;;  %v533_v52 = vld [vmem:[#allocation2 + $0xad0] sm:$0xff]  ;;  %v402_v53 = vld [vmem:[#allocation2 + $0x6b8] sm:$0xff] }
 0x120   :  { %886 = vmatprep.subr.mxu0 %v334_v54  ;;  %957 = vmatprep.subr.mxu1 %v462_v55  ;;  %v530_v54 = vld [vmem:[#allocation2 + $0xab8] sm:$0xff]  ;;  %v401_v55 = vld [vmem:[#allocation2 + $0x6b0] sm:$0xff] }
 0x121   :  { %887 = vmatpush1.msra.mxu0 %v333_v57  ;;  %958 = vmatpush1.msra.mxu1 %v461_v58  ;;  %v529_v57 = vld [vmem:[#allocation2 + $0xab0] sm:$0xff]  ;;  %v398_v58 = vld [vmem:[#allocation2 + $0x698] sm:$0xff] }
 0x122   :  { %888 = vmatprep.subr.mxu0 %v330_v59  ;;  %959 = vmatprep.subr.mxu1 %v458_v60  ;;  %v526_v59 = vld [vmem:[#allocation2 + $0xa98] sm:$0xff]  ;;  %v397_v60 = vld [vmem:[#allocation2 + $0x690] sm:$0xff] }
 0x123   :  { %889 = vmatpush1.msra.mxu0 %v329_v61  ;;  %960 = vmatpush1.msra.mxu1 %v457_v62  ;;  %v525_v61 = vld [vmem:[#allocation2 + $0xa90] sm:$0xff]  ;;  %v394_v62 = vld [vmem:[#allocation2 + $0x678] sm:$0xff] }
 0x124   :  { %890 = vmatprep.subr.mxu0 %v326_v63  ;;  %961 = vmatprep.subr.mxu1 %v454_v3  ;;  %v522_v63 = vld [vmem:[#allocation2 + $0xa78] sm:$0xff]  ;;  %v393_v3 = vld [vmem:[#allocation2 + $0x670] sm:$0xff] }
 0x125   :  { %891 = vmatpush1.msra.mxu0 %v325_v4  ;;  %962 = vmatpush1.msra.mxu1 %v453_v5  ;;  %v521_v4 = vld [vmem:[#allocation2 + $0xa70] sm:$0xff]  ;;  %v390_v5 = vld [vmem:[#allocation2 + $0x658] sm:$0xff] }
 0x126   :  { %892 = vmatprep.subr.mxu0 %v322_v6  ;;  %963 = vmatprep.subr.mxu1 %v450_v7  ;;  %v518_v6 = vld [vmem:[#allocation2 + $0xa58] sm:$0xff]  ;;  %v389_v7 = vld [vmem:[#allocation2 + $0x650] sm:$0xff] }
 0x127   :  { %893 = vmatpush1.msra.mxu0 %v321_v8  ;;  %964 = vmatpush1.msra.mxu1 %v449_v10  ;;  %v517_v8 = vld [vmem:[#allocation2 + $0xa50] sm:$0xff]  ;;  %v386_v10 = vld [vmem:[#allocation2 + $0x638] sm:$0xff] }
 0x128   :  { %894 = vmatprep.subr.mxu0 %v318_v11  ;;  %965 = vmatprep.subr.mxu1 %v446_v12  ;;  %v514_v11 = vld [vmem:[#allocation2 + $0xa38] sm:$0xff]  ;;  %v385_v12 = vld [vmem:[#allocation2 + $0x630] sm:$0xff] }
 0x129   :  { %895 = vmatpush1.msra.mxu0 %v317_v13  ;;  %966 = vmatpush1.msra.mxu1 %v445_v14  ;;  %v513_v13 = vld [vmem:[#allocation2 + $0xa30] sm:$0xff]  ;;  %v382_v14 = vld [vmem:[#allocation2 + $0x618] sm:$0xff] }
 0x12a   :  { %896 = vmatprep.subr.mxu0 %v442_v15  ;;  %967 = vmatprep.subr.mxu1 %v570_v16  ;;  %v510_v15 = vld [vmem:[#allocation2 + $0xa18] sm:$0xff]  ;;  %v381_v16 = vld [vmem:[#allocation2 + $0x610] sm:$0xff] }
 0x12b   :  { %897 = vmatpush2.msra.mxu0 %v441_v17  ;;  %968 = vmatpush2.msra.mxu1 %v569_v18  ;;  %v509_v17 = vld [vmem:[#allocation2 + $0xa10] sm:$0xff]  ;;  %v1094_v18 = vld [vmem:[%s4747_s27 + $0x1e8] sm:$0xff] }
 0x12c   :  { %898 = vmatprep.subr.mxu0 %v438_v19  ;;  %969 = vmatprep.subr.mxu1 %v566_v20  ;;  %v1222_v19 = vld [vmem:[%s4747_s27 + $0x5e8] sm:$0xff]  ;;  %v1093_v20 = vld [vmem:[%s4747_s27 + $0x1e0] sm:$0xff] }
 0x12d   :  { %899 = vmatpush2.msra.mxu0 %v437_v21  ;;  %970 = vmatpush2.msra.mxu1 %v565_v22  ;;  %v1221_v21 = vld [vmem:[%s4747_s27 + $0x5e0] sm:$0xff]  ;;  %v1090_v22 = vld [vmem:[%s4747_s27 + $0x1c8] sm:$0xff] }
 0x12e   :  { %900 = vmatprep.subr.mxu0 %v434_v0  ;;  %971 = vmatprep.subr.mxu1 %v562_v23  ;;  %v1089_v0 = vld [vmem:[%s4747_s27 + $0x1c0] sm:$0xff] }
 0x12f   :  { %901 = vmatpush2.msra.mxu0 %v433_v24  ;;  %972 = vmatpush2.msra.mxu1 %v561_v56  ;;  %v1217_v23 = vld [vmem:[%s4747_s27 + $0x5c0] sm:$0xff]  ;;  %v1214_v24 = vld [vmem:[%s4747_s27 + $0x5a8] sm:$0xff] }
 0x130   :  { %902 = vmatprep.subr.mxu0 %v430_v25  ;;  %973 = vmatprep.subr.mxu1 %v558_v26  ;;  %v1085_v56 = vld [vmem:[%s4747_s27 + $0x1a0] sm:$0xff]  ;;  %v1082_v26 = vld [vmem:[%s4747_s27 + $0x188] sm:$0xff] }
 0x131   :  { %903 = vmatpush2.msra.mxu0 %v429_v27  ;;  %974 = vmatpush2.msra.mxu1 %v557_v28  ;;  %v1213_v25 = vld [vmem:[%s4747_s27 + $0x5a0] sm:$0xff]  ;;  %v1210_v27 = vld [vmem:[%s4747_s27 + $0x588] sm:$0xff] }
 0x132   :  { %904 = vmatprep.subr.mxu0 %v426_v29  ;;  %975 = vmatprep.subr.mxu1 %v554_v30  ;;  %v1081_v28 = vld [vmem:[%s4747_s27 + $0x180] sm:$0xff]  ;;  %v1078_v30 = vld [vmem:[%s4747_s27 + $0x168] sm:$0xff] }
 0x133   :  { %905 = vmatpush2.msra.mxu0 %v425_v31  ;;  %976 = vmatpush2.msra.mxu1 %v553_v32  ;;  %v1209_v29 = vld [vmem:[%s4747_s27 + $0x580] sm:$0xff]  ;;  %v1206_v31 = vld [vmem:[%s4747_s27 + $0x568] sm:$0xff] }
 0x134   :  { %906 = vmatprep.subr.mxu0 %v422_v33  ;;  %977 = vmatprep.subr.mxu1 %v550_v34  ;;  %v1077_v32 = vld [vmem:[%s4747_s27 + $0x160] sm:$0xff]  ;;  %v1074_v34 = vld [vmem:[%s4747_s27 + $0x148] sm:$0xff] }
 0x135   :  { %907 = vmatpush2.msra.mxu0 %v421_v35  ;;  %978 = vmatpush2.msra.mxu1 %v549_v36  ;;  %v1205_v33 = vld [vmem:[%s4747_s27 + $0x560] sm:$0xff]  ;;  %v1202_v35 = vld [vmem:[%s4747_s27 + $0x548] sm:$0xff] }
 0x136   :  { %908 = vmatprep.subr.mxu0 %v418_v37  ;;  %979 = vmatprep.subr.mxu1 %v546_v38  ;;  %v1073_v36 = vld [vmem:[%s4747_s27 + $0x140] sm:$0xff]  ;;  %v1070_v38 = vld [vmem:[%s4747_s27 + $0x128] sm:$0xff] }
 0x137   :  { %909 = vmatpush2.msra.mxu0 %v417_v39  ;;  %980 = vmatpush2.msra.mxu1 %v545_v40  ;;  %v1201_v37 = vld [vmem:[%s4747_s27 + $0x540] sm:$0xff]  ;;  %v1198_v39 = vld [vmem:[%s4747_s27 + $0x528] sm:$0xff] }
 0x138   :  { %910 = vmatprep.subr.mxu0 %v414_v41  ;;  %981 = vmatprep.subr.mxu1 %v542_v42  ;;  %v1069_v40 = vld [vmem:[%s4747_s27 + $0x120] sm:$0xff]  ;;  %v1066_v42 = vld [vmem:[%s4747_s27 + $0x108] sm:$0xff] }
 0x139   :  { %911 = vmatpush2.msra.mxu0 %v413_v43  ;;  %982 = vmatpush2.msra.mxu1 %v541_v44  ;;  %v1197_v41 = vld [vmem:[%s4747_s27 + $0x520] sm:$0xff]  ;;  %v1194_v43 = vld [vmem:[%s4747_s27 + $0x508] sm:$0xff] }
 0x13a   :  { %912 = vmatprep.subr.mxu0 %v410_v45  ;;  %983 = vmatprep.subr.mxu1 %v538_v46  ;;  %v1065_v44 = vld [vmem:[%s4747_s27 + $0x100] sm:$0xff]  ;;  %v1062_v46 = vld [vmem:[%s4747_s27 + $0xe8] sm:$0xff] }
 0x13b   :  { %913 = vmatpush2.msra.mxu0 %v409_v47  ;;  %984 = vmatpush2.msra.mxu1 %v537_v48  ;;  %v1193_v45 = vld [vmem:[%s4747_s27 + $0x500] sm:$0xff]  ;;  %v1190_v47 = vld [vmem:[%s4747_s27 + $0x4e8] sm:$0xff] }
 0x13c   :  { %914 = vmatprep.subr.mxu0 %v406_v49  ;;  %985 = vmatprep.subr.mxu1 %v534_v50  ;;  %v1061_v48 = vld [vmem:[%s4747_s27 + $0xe0] sm:$0xff]  ;;  %v1058_v50 = vld [vmem:[%s4747_s27 + $0xc8] sm:$0xff] }
 0x13d   :  { %915 = vmatpush2.msra.mxu0 %v405_v51  ;;  %986 = vmatpush2.msra.mxu1 %v533_v52  ;;  %v1189_v49 = vld [vmem:[%s4747_s27 + $0x4e0] sm:$0xff]  ;;  %v1186_v51 = vld [vmem:[%s4747_s27 + $0x4c8] sm:$0xff] }
 0x13e   :  { %916 = vmatprep.subr.mxu0 %v402_v53  ;;  %987 = vmatprep.subr.mxu1 %v530_v54  ;;  %v1057_v52 = vld [vmem:[%s4747_s27 + $0xc0] sm:$0xff]  ;;  %v1054_v54 = vld [vmem:[%s4747_s27 + $0xa8] sm:$0xff] }
 0x13f   :  { %917 = vmatpush2.msra.mxu0 %v401_v55  ;;  %988 = vmatpush2.msra.mxu1 %v529_v57  ;;  %v1185_v53 = vld [vmem:[%s4747_s27 + $0x4c0] sm:$0xff]  ;;  %v1182_v55 = vld [vmem:[%s4747_s27 + $0x4a8] sm:$0xff] }
 0x140   :  { %918 = vmatprep.subr.mxu0 %v398_v58  ;;  %989 = vmatprep.subr.mxu1 %v526_v59  ;;  %v1053_v57 = vld [vmem:[%s4747_s27 + $0xa0] sm:$0xff]  ;;  %v1050_v59 = vld [vmem:[%s4747_s27 + $0x88] sm:$0xff] }
 0x141   :  { %919 = vmatpush2.msra.mxu0 %v397_v60  ;;  %990 = vmatpush2.msra.mxu1 %v525_v61  ;;  %v1181_v58 = vld [vmem:[%s4747_s27 + $0x4a0] sm:$0xff]  ;;  %v1178_v60 = vld [vmem:[%s4747_s27 + $0x488] sm:$0xff] }
 0x142   :  { %920 = vmatprep.subr.mxu0 %v394_v62  ;;  %991 = vmatprep.subr.mxu1 %v522_v63  ;;  %v1049_v61 = vld [vmem:[%s4747_s27 + $0x80] sm:$0xff]  ;;  %v1046_v63 = vld [vmem:[%s4747_s27 + $0x68] sm:$0xff] }
 0x143   :  { %921 = vmatpush2.msra.mxu0 %v393_v3  ;;  %992 = vmatpush2.msra.mxu1 %v521_v4  ;;  %v1177_v62 = vld [vmem:[%s4747_s27 + $0x480] sm:$0xff]  ;;  %v1174_v3 = vld [vmem:[%s4747_s27 + $0x468] sm:$0xff] }
 0x144   :  { %922 = vmatprep.subr.mxu0 %v390_v5  ;;  %993 = vmatprep.subr.mxu1 %v518_v6  ;;  %v1045_v4 = vld [vmem:[%s4747_s27 + $0x60] sm:$0xff]  ;;  %v1042_v6 = vld [vmem:[%s4747_s27 + $0x48] sm:$0xff] }
 0x145   :  { %923 = vmatpush2.msra.mxu0 %v389_v7  ;;  %994 = vmatpush2.msra.mxu1 %v517_v8  ;;  %v1173_v5 = vld [vmem:[%s4747_s27 + $0x460] sm:$0xff]  ;;  %v1170_v7 = vld [vmem:[%s4747_s27 + $0x448] sm:$0xff] }
 0x146   :  { %924 = vmatprep.subr.mxu0 %v386_v10  ;;  %995 = vmatprep.subr.mxu1 %v514_v11  ;;  %v1041_v8 = vld [vmem:[%s4747_s27 + $0x40] sm:$0xff]  ;;  %v1038_v11 = vld [vmem:[%s4747_s27 + $0x28] sm:$0xff] }
 0x147   :  { %925 = vmatpush2.msra.mxu0 %v385_v12  ;;  %996 = vmatpush2.msra.mxu1 %v513_v13  ;;  %v1169_v10 = vld [vmem:[%s4747_s27 + $0x440] sm:$0xff]  ;;  %v1166_v12 = vld [vmem:[%s4747_s27 + $0x428] sm:$0xff] }
 0x148   :  { %926 = vmatprep.subr.mxu0 %v382_v14  ;;  %997 = vmatprep.subr.mxu1 %v510_v15  ;;  %v1037_v13 = vld [vmem:[%s4747_s27 + $0x20] sm:$0xff]  ;;  %v1034_v15 = vld [vmem:[%s4747_s27 + $0x8] sm:$0xff] }
 0x149   :  { %927 = vmatpush2.msra.mxu0 %v381_v16  ;;  %928 = vmatprep.mubr.f32.mxu0 %v3468_v2  ;;  %v3020_v2 = vld [vmem:[%s4746_s24 + $0x8] sm:$0xff]  ;;  %v1165_v14 = vld [vmem:[%s4747_s27 + $0x420] sm:$0xff] }
 0x14a   :  { %998 = vmatpush2.msra.mxu1 %v509_v17  ;;  %999 = vmatprep.mubr.f32.mxu1 %v3480_v9  ;;  %v1218_v9 = vld [vmem:[%s4747_s27 + $0x5c8] sm:$0xff]  ;;  %v1033_v17 = vld [vmem:[%s4747_s27] sm:$0xff] }
 0x14b   :  { %929 = vmatmul.mubr.f32.vlgmr.msra.gmra.mxu0 %v3020_v2  ;;  %1000 = vmatmul.mubr.f32.vlgmr.msra.gmra.mxu1 %v3476_v1  ;;  %v1086_v1 = vld [vmem:[%s4747_s27 + $0x1a8] sm:$0xff]  ;;  %v1285_v2 = vld [vmem:[%s4747_s27 + $0x7e0] sm:$0xff] }
 0x14c   :  { %1295 = vmatprep.subr.mxu0 %v1094_v18  ;;  %1366 = vmatprep.subr.mxu1 %v1222_v19  ;;  %v1162_v16 = vld [vmem:[%s4747_s27 + $0x408] sm:$0xff]  ;;  %v1161_v18 = vld [vmem:[%s4747_s27 + $0x400] sm:$0xff] }
 0x14d   :  { %1296 = vmatpush1.msra.mxu0 %v1093_v20  ;;  %1367 = vmatpush1.msra.mxu1 %v1221_v21  ;;  %v1158_v19 = vld [vmem:[%s4747_s27 + $0x3e8] sm:$0xff]  ;;  %v1157_v21 = vld [vmem:[%s4747_s27 + $0x3e0] sm:$0xff] }
 0x14e   :  { %1297 = vmatprep.subr.mxu0 %v1090_v22  ;;  %1368 = vmatprep.subr.mxu1 %v1218_v9  ;;  %v1286_v20 = vld [vmem:[%s4747_s27 + $0x7e8] sm:$0xff] }
 0x14f   :  { %1298 = vmatpush1.msra.mxu0 %v1089_v0  ;;  %1369 = vmatpush1.msra.mxu1 %v1217_v23  ;;  %v1154_v22 = vld [vmem:[%s4747_s27 + $0x3c8] sm:$0xff]  ;;  %v1153_v0 = vld [vmem:[%s4747_s27 + $0x3c0] sm:$0xff] }
 0x150   :  { %1299 = vmatprep.subr.mxu0 %v1086_v1  ;;  %1370 = vmatprep.subr.mxu1 %v1214_v24  ;;  %v1282_v9 = vld [vmem:[%s4747_s27 + $0x7c8] sm:$0xff]  ;;  %v1281_v23 = vld [vmem:[%s4747_s27 + $0x7c0] sm:$0xff] }
 0x151   :  { %1300 = vmatpush1.msra.mxu0 %v1085_v56  ;;  %1371 = vmatpush1.msra.mxu1 %v1213_v25  ;;  %v1150_v1 = vld [vmem:[%s4747_s27 + $0x3a8] sm:$0xff]  ;;  %v1149_v56 = vld [vmem:[%s4747_s27 + $0x3a0] sm:$0xff] }
 0x152   :  { %1301 = vmatprep.subr.mxu0 %v1082_v26  ;;  %1372 = vmatprep.subr.mxu1 %v1210_v27  ;;  %v1278_v24 = vld [vmem:[%s4747_s27 + $0x7a8] sm:$0xff]  ;;  %v1277_v25 = vld [vmem:[%s4747_s27 + $0x7a0] sm:$0xff] }
 0x153   :  { %1302 = vmatpush1.msra.mxu0 %v1081_v28  ;;  %1373 = vmatpush1.msra.mxu1 %v1209_v29  ;;  %v1146_v26 = vld [vmem:[%s4747_s27 + $0x388] sm:$0xff]  ;;  %v1145_v28 = vld [vmem:[%s4747_s27 + $0x380] sm:$0xff] }
 0x154   :  { %1303 = vmatprep.subr.mxu0 %v1078_v30  ;;  %1374 = vmatprep.subr.mxu1 %v1206_v31  ;;  %v1274_v27 = vld [vmem:[%s4747_s27 + $0x788] sm:$0xff]  ;;  %v1273_v29 = vld [vmem:[%s4747_s27 + $0x780] sm:$0xff] }
 0x155   :  { %1304 = vmatpush1.msra.mxu0 %v1077_v32  ;;  %1375 = vmatpush1.msra.mxu1 %v1205_v33  ;;  %v1142_v30 = vld [vmem:[%s4747_s27 + $0x368] sm:$0xff]  ;;  %v1141_v32 = vld [vmem:[%s4747_s27 + $0x360] sm:$0xff] }
 0x156   :  { %1305 = vmatprep.subr.mxu0 %v1074_v34  ;;  %1376 = vmatprep.subr.mxu1 %v1202_v35  ;;  %v1270_v31 = vld [vmem:[%s4747_s27 + $0x768] sm:$0xff]  ;;  %v1269_v33 = vld [vmem:[%s4747_s27 + $0x760] sm:$0xff] }
 0x157   :  { %1306 = vmatpush1.msra.mxu0 %v1073_v36  ;;  %1377 = vmatpush1.msra.mxu1 %v1201_v37  ;;  %v1138_v34 = vld [vmem:[%s4747_s27 + $0x348] sm:$0xff]  ;;  %v1137_v36 = vld [vmem:[%s4747_s27 + $0x340] sm:$0xff] }
 0x158   :  { %1307 = vmatprep.subr.mxu0 %v1070_v38  ;;  %1378 = vmatprep.subr.mxu1 %v1198_v39  ;;  %v1266_v35 = vld [vmem:[%s4747_s27 + $0x748] sm:$0xff]  ;;  %v1265_v37 = vld [vmem:[%s4747_s27 + $0x740] sm:$0xff] }
 0x159   :  { %1308 = vmatpush1.msra.mxu0 %v1069_v40  ;;  %1379 = vmatpush1.msra.mxu1 %v1197_v41  ;;  %v1134_v38 = vld [vmem:[%s4747_s27 + $0x328] sm:$0xff]  ;;  %v1133_v40 = vld [vmem:[%s4747_s27 + $0x320] sm:$0xff] }
 0x15a   :  { %1309 = vmatprep.subr.mxu0 %v1066_v42  ;;  %1380 = vmatprep.subr.mxu1 %v1194_v43  ;;  %v1262_v39 = vld [vmem:[%s4747_s27 + $0x728] sm:$0xff]  ;;  %v1261_v41 = vld [vmem:[%s4747_s27 + $0x720] sm:$0xff] }
 0x15b   :  { %1310 = vmatpush1.msra.mxu0 %v1065_v44  ;;  %1381 = vmatpush1.msra.mxu1 %v1193_v45  ;;  %v1130_v42 = vld [vmem:[%s4747_s27 + $0x308] sm:$0xff]  ;;  %v1129_v44 = vld [vmem:[%s4747_s27 + $0x300] sm:$0xff] }
 0x15c   :  { %1311 = vmatprep.subr.mxu0 %v1062_v46  ;;  %1382 = vmatprep.subr.mxu1 %v1190_v47  ;;  %v1258_v43 = vld [vmem:[%s4747_s27 + $0x708] sm:$0xff]  ;;  %v1257_v45 = vld [vmem:[%s4747_s27 + $0x700] sm:$0xff] }
 0x15d   :  { %1312 = vmatpush1.msra.mxu0 %v1061_v48  ;;  %1383 = vmatpush1.msra.mxu1 %v1189_v49  ;;  %v1126_v46 = vld [vmem:[%s4747_s27 + $0x2e8] sm:$0xff]  ;;  %v1125_v48 = vld [vmem:[%s4747_s27 + $0x2e0] sm:$0xff] }
 0x15e   :  { %1313 = vmatprep.subr.mxu0 %v1058_v50  ;;  %1384 = vmatprep.subr.mxu1 %v1186_v51  ;;  %v1254_v47 = vld [vmem:[%s4747_s27 + $0x6e8] sm:$0xff]  ;;  %v1253_v49 = vld [vmem:[%s4747_s27 + $0x6e0] sm:$0xff] }
 0x15f   :  { %1314 = vmatpush1.msra.mxu0 %v1057_v52  ;;  %1385 = vmatpush1.msra.mxu1 %v1185_v53  ;;  %v1122_v50 = vld [vmem:[%s4747_s27 + $0x2c8] sm:$0xff]  ;;  %v1121_v52 = vld [vmem:[%s4747_s27 + $0x2c0] sm:$0xff] }
 0x160   :  { %1315 = vmatprep.subr.mxu0 %v1054_v54  ;;  %1386 = vmatprep.subr.mxu1 %v1182_v55  ;;  %v1250_v51 = vld [vmem:[%s4747_s27 + $0x6c8] sm:$0xff]  ;;  %v1249_v53 = vld [vmem:[%s4747_s27 + $0x6c0] sm:$0xff] }
 0x161   :  { %1316 = vmatpush1.msra.mxu0 %v1053_v57  ;;  %1387 = vmatpush1.msra.mxu1 %v1181_v58  ;;  %v1118_v54 = vld [vmem:[%s4747_s27 + $0x2a8] sm:$0xff]  ;;  %v1117_v57 = vld [vmem:[%s4747_s27 + $0x2a0] sm:$0xff] }
 0x162   :  { %1317 = vmatprep.subr.mxu0 %v1050_v59  ;;  %1388 = vmatprep.subr.mxu1 %v1178_v60  ;;  %v1246_v55 = vld [vmem:[%s4747_s27 + $0x6a8] sm:$0xff]  ;;  %v1245_v58 = vld [vmem:[%s4747_s27 + $0x6a0] sm:$0xff] }
 0x163   :  { %1318 = vmatpush1.msra.mxu0 %v1049_v61  ;;  %1389 = vmatpush1.msra.mxu1 %v1177_v62  ;;  %v1114_v59 = vld [vmem:[%s4747_s27 + $0x288] sm:$0xff]  ;;  %v1113_v61 = vld [vmem:[%s4747_s27 + $0x280] sm:$0xff] }
 0x164   :  { %1319 = vmatprep.subr.mxu0 %v1046_v63  ;;  %1390 = vmatprep.subr.mxu1 %v1174_v3  ;;  %v1242_v60 = vld [vmem:[%s4747_s27 + $0x688] sm:$0xff]  ;;  %v1241_v62 = vld [vmem:[%s4747_s27 + $0x680] sm:$0xff] }
 0x165   :  { %1320 = vmatpush1.msra.mxu0 %v1045_v4  ;;  %1391 = vmatpush1.msra.mxu1 %v1173_v5  ;;  %v1110_v63 = vld [vmem:[%s4747_s27 + $0x268] sm:$0xff]  ;;  %v1109_v4 = vld [vmem:[%s4747_s27 + $0x260] sm:$0xff] }
 0x166   :  { %1321 = vmatprep.subr.mxu0 %v1042_v6  ;;  %1392 = vmatprep.subr.mxu1 %v1170_v7  ;;  %v1238_v3 = vld [vmem:[%s4747_s27 + $0x668] sm:$0xff]  ;;  %v1237_v5 = vld [vmem:[%s4747_s27 + $0x660] sm:$0xff] }
 0x167   :  { %1322 = vmatpush1.msra.mxu0 %v1041_v8  ;;  %1393 = vmatpush1.msra.mxu1 %v1169_v10  ;;  %v1106_v6 = vld [vmem:[%s4747_s27 + $0x248] sm:$0xff]  ;;  %v1105_v8 = vld [vmem:[%s4747_s27 + $0x240] sm:$0xff] }
 0x168   :  { %1323 = vmatprep.subr.mxu0 %v1038_v11  ;;  %1394 = vmatprep.subr.mxu1 %v1166_v12  ;;  %v1234_v7 = vld [vmem:[%s4747_s27 + $0x648] sm:$0xff]  ;;  %v1233_v10 = vld [vmem:[%s4747_s27 + $0x640] sm:$0xff] }
 0x169   :  { %1324 = vmatpush1.msra.mxu0 %v1037_v13  ;;  %1395 = vmatpush1.msra.mxu1 %v1165_v14  ;;  %v3855_v11 = vld [vmem:[%s4748_s10] sm:$0xff]  ;;  %v1102_v12 = vld [vmem:[%s4747_s27 + $0x228] sm:$0xff] }
 0x16a   :  { %1325 = vmatprep.subr.mxu0 %v1034_v15  ;;  %1396 = vmatprep.subr.mxu1 %v1162_v16  ;;  %v1230_v13 = vld [vmem:[%s4747_s27 + $0x628] sm:$0xff]  ;;  %v1101_v15 = vld [vmem:[%s4747_s27 + $0x220] sm:$0xff] }
 0x16b   :  { %1326 = vmatpush1.msra.mxu0 %v1033_v17  ;;  %1397 = vmatpush1.msra.mxu1 %v1161_v18  ;;  %v3866_v14 = vld [vmem:[%s4748_s10 + $0x8] sm:$0xff]  ;;  %v1229_v16 = vld [vmem:[%s4747_s27 + $0x620] sm:$0xff] }
 0x16c   :  { %1327 = vmatprep.subr.mxu0 %v1158_v19  ;;  %1398 = vmatprep.subr.mxu1 %v1286_v20  ;;  %v1098_v17 = vld [vmem:[%s4747_s27 + $0x208] sm:$0xff]  ;;  %v3882_v19 = vcombine.high %v3855_v11, %v3855_v11  ;;  %v1097_v20 = vld [vmem:[%s4747_s27 + $0x200] sm:$0xff] }
 0x16d   :  { %1328 = vmatpush2.msra.mxu0 %v1157_v21  ;;  %1399 = vmatpush2.msra.mxu1 %v1285_v2  ;;  %v1226_v18 = vld [vmem:[%s4747_s27 + $0x608] sm:$0xff]  ;;  %v3889_v21 = vcombine.high %v3866_v14, %v3866_v14  ;;  %v1225_v2 = vld [vmem:[%s4747_s27 + $0x600] sm:$0xff] }
 0x16e   :  { %1329 = vmatprep.subr.mxu0 %v1154_v22  ;;  %1400 = vmatprep.subr.mxu1 %v1282_v9  ;;  %v1096_v22 = vld [vmem:[%s4747_s27 + $0x1f8] sm:$0xff] }
 0x16f   :  { %1330 = vmatpush2.msra.mxu0 %v1153_v0  ;;  %1401 = vmatpush2.msra.mxu1 %v1281_v23  ;;  %v1224_v9 = vld [vmem:[%s4747_s27 + $0x5f8] sm:$0xff]  ;;  %v1095_v0 = vld [vmem:[%s4747_s27 + $0x1f0] sm:$0xff] }
 0x170   :  { %1331 = vmatprep.subr.mxu0 %v1150_v1  ;;  %1402 = vmatprep.subr.mxu1 %v1278_v24  ;;  %v1223_v23 = vld [vmem:[%s4747_s27 + $0x5f0] sm:$0xff]  ;;  %v1092_v1 = vld [vmem:[%s4747_s27 + $0x1d8] sm:$0xff] }
 0x171   :  { %1332 = vmatpush2.msra.mxu0 %v1149_v56  ;;  %1403 = vmatpush2.msra.mxu1 %v1277_v25  ;;  %v1220_v24 = vld [vmem:[%s4747_s27 + $0x5d8] sm:$0xff]  ;;  %v1091_v56 = vld [vmem:[%s4747_s27 + $0x1d0] sm:$0xff] }
 0x172   :  { %1333 = vmatprep.subr.mxu0 %v1146_v26  ;;  %1404 = vmatprep.subr.mxu1 %v1274_v27  ;;  %v1219_v25 = vld [vmem:[%s4747_s27 + $0x5d0] sm:$0xff]  ;;  %v1088_v26 = vld [vmem:[%s4747_s27 + $0x1b8] sm:$0xff] }
 0x173   :  { %1334 = vmatpush2.msra.mxu0 %v1145_v28  ;;  %1405 = vmatpush2.msra.mxu1 %v1273_v29  ;;  %v1216_v27 = vld [vmem:[%s4747_s27 + $0x5b8] sm:$0xff]  ;;  %v1087_v28 = vld [vmem:[%s4747_s27 + $0x1b0] sm:$0xff] }
 0x174   :  { %1335 = vmatprep.subr.mxu0 %v1142_v30  ;;  %1406 = vmatprep.subr.mxu1 %v1270_v31  ;;  %v1215_v29 = vld [vmem:[%s4747_s27 + $0x5b0] sm:$0xff]  ;;  %v1084_v30 = vld [vmem:[%s4747_s27 + $0x198] sm:$0xff] }
 0x175   :  { %1336 = vmatpush2.msra.mxu0 %v1141_v32  ;;  %1407 = vmatpush2.msra.mxu1 %v1269_v33  ;;  %v1212_v31 = vld [vmem:[%s4747_s27 + $0x598] sm:$0xff]  ;;  %v1083_v32 = vld [vmem:[%s4747_s27 + $0x190] sm:$0xff] }
 0x176   :  { %1337 = vmatprep.subr.mxu0 %v1138_v34  ;;  %1408 = vmatprep.subr.mxu1 %v1266_v35  ;;  %v1211_v33 = vld [vmem:[%s4747_s27 + $0x590] sm:$0xff]  ;;  %v1080_v34 = vld [vmem:[%s4747_s27 + $0x178] sm:$0xff] }
 0x177   :  { %1338 = vmatpush2.msra.mxu0 %v1137_v36  ;;  %1409 = vmatpush2.msra.mxu1 %v1265_v37  ;;  %v1208_v35 = vld [vmem:[%s4747_s27 + $0x578] sm:$0xff]  ;;  %v1079_v36 = vld [vmem:[%s4747_s27 + $0x170] sm:$0xff] }
 0x178   :  { %1339 = vmatprep.subr.mxu0 %v1134_v38  ;;  %1410 = vmatprep.subr.mxu1 %v1262_v39  ;;  %v1207_v37 = vld [vmem:[%s4747_s27 + $0x570] sm:$0xff]  ;;  %v1076_v38 = vld [vmem:[%s4747_s27 + $0x158] sm:$0xff] }
 0x179   :  { %1340 = vmatpush2.msra.mxu0 %v1133_v40  ;;  %1411 = vmatpush2.msra.mxu1 %v1261_v41  ;;  %v1204_v39 = vld [vmem:[%s4747_s27 + $0x558] sm:$0xff]  ;;  %v1075_v40 = vld [vmem:[%s4747_s27 + $0x150] sm:$0xff] }
 0x17a   :  { %1341 = vmatprep.subr.mxu0 %v1130_v42  ;;  %1412 = vmatprep.subr.mxu1 %v1258_v43  ;;  %v1203_v41 = vld [vmem:[%s4747_s27 + $0x550] sm:$0xff]  ;;  %v1072_v42 = vld [vmem:[%s4747_s27 + $0x138] sm:$0xff] }
 0x17b   :  { %1342 = vmatpush2.msra.mxu0 %v1129_v44  ;;  %1413 = vmatpush2.msra.mxu1 %v1257_v45  ;;  %v1200_v43 = vld [vmem:[%s4747_s27 + $0x538] sm:$0xff]  ;;  %v1071_v44 = vld [vmem:[%s4747_s27 + $0x130] sm:$0xff] }
 0x17c   :  { %1343 = vmatprep.subr.mxu0 %v1126_v46  ;;  %1414 = vmatprep.subr.mxu1 %v1254_v47  ;;  %v1199_v45 = vld [vmem:[%s4747_s27 + $0x530] sm:$0xff]  ;;  %v1068_v46 = vld [vmem:[%s4747_s27 + $0x118] sm:$0xff] }
 0x17d   :  { %1344 = vmatpush2.msra.mxu0 %v1125_v48  ;;  %1415 = vmatpush2.msra.mxu1 %v1253_v49  ;;  %v1196_v47 = vld [vmem:[%s4747_s27 + $0x518] sm:$0xff]  ;;  %v1067_v48 = vld [vmem:[%s4747_s27 + $0x110] sm:$0xff] }
 0x17e   :  { %1345 = vmatprep.subr.mxu0 %v1122_v50  ;;  %1416 = vmatprep.subr.mxu1 %v1250_v51  ;;  %v1195_v49 = vld [vmem:[%s4747_s27 + $0x510] sm:$0xff]  ;;  %v1064_v50 = vld [vmem:[%s4747_s27 + $0xf8] sm:$0xff] }
 0x17f   :  { %1346 = vmatpush2.msra.mxu0 %v1121_v52  ;;  %1417 = vmatpush2.msra.mxu1 %v1249_v53  ;;  %v1192_v51 = vld [vmem:[%s4747_s27 + $0x4f8] sm:$0xff]  ;;  %v1063_v52 = vld [vmem:[%s4747_s27 + $0xf0] sm:$0xff] }
 0x180   :  { %1347 = vmatprep.subr.mxu0 %v1118_v54  ;;  %1418 = vmatprep.subr.mxu1 %v1246_v55  ;;  %v1191_v53 = vld [vmem:[%s4747_s27 + $0x4f0] sm:$0xff]  ;;  %v1060_v54 = vld [vmem:[%s4747_s27 + $0xd8] sm:$0xff] }
 0x181   :  { %1348 = vmatpush2.msra.mxu0 %v1117_v57  ;;  %1419 = vmatpush2.msra.mxu1 %v1245_v58  ;;  %v1188_v55 = vld [vmem:[%s4747_s27 + $0x4d8] sm:$0xff]  ;;  %v1059_v57 = vld [vmem:[%s4747_s27 + $0xd0] sm:$0xff] }
 0x182   :  { %1349 = vmatprep.subr.mxu0 %v1114_v59  ;;  %1420 = vmatprep.subr.mxu1 %v1242_v60  ;;  %v1187_v58 = vld [vmem:[%s4747_s27 + $0x4d0] sm:$0xff]  ;;  %v1056_v59 = vld [vmem:[%s4747_s27 + $0xb8] sm:$0xff] }
 0x183   :  { %1350 = vmatpush2.msra.mxu0 %v1113_v61  ;;  %1421 = vmatpush2.msra.mxu1 %v1241_v62  ;;  %v1184_v60 = vld [vmem:[%s4747_s27 + $0x4b8] sm:$0xff]  ;;  %v1055_v61 = vld [vmem:[%s4747_s27 + $0xb0] sm:$0xff] }
 0x184   :  { %1351 = vmatprep.subr.mxu0 %v1110_v63  ;;  %1422 = vmatprep.subr.mxu1 %v1238_v3  ;;  %v1183_v62 = vld [vmem:[%s4747_s27 + $0x4b0] sm:$0xff]  ;;  %v1052_v63 = vld [vmem:[%s4747_s27 + $0x98] sm:$0xff] }
 0x185   :  { %1352 = vmatpush2.msra.mxu0 %v1109_v4  ;;  %1423 = vmatpush2.msra.mxu1 %v1237_v5  ;;  %v1180_v3 = vld [vmem:[%s4747_s27 + $0x498] sm:$0xff]  ;;  %v1051_v4 = vld [vmem:[%s4747_s27 + $0x90] sm:$0xff] }
 0x186   :  { %1353 = vmatprep.subr.mxu0 %v1106_v6  ;;  %1424 = vmatprep.subr.mxu1 %v1234_v7  ;;  %v1179_v5 = vld [vmem:[%s4747_s27 + $0x490] sm:$0xff]  ;;  %v1048_v6 = vld [vmem:[%s4747_s27 + $0x78] sm:$0xff] }
 0x187   :  { %1354 = vmatpush2.msra.mxu0 %v1105_v8  ;;  %1425 = vmatpush2.msra.mxu1 %v1233_v10  ;;  %v1176_v7 = vld [vmem:[%s4747_s27 + $0x478] sm:$0xff]  ;;  %v1047_v8 = vld [vmem:[%s4747_s27 + $0x70] sm:$0xff] }
 0x188   :  { %1355 = vmatprep.subr.mxu0 %v1102_v12  ;;  %1426 = vmatprep.subr.mxu1 %v1230_v13  ;;  %v1175_v10 = vld [vmem:[%s4747_s27 + $0x470] sm:$0xff]  ;;  %v1044_v12 = vld [vmem:[%s4747_s27 + $0x58] sm:$0xff] }
 0x189   :  { %1356 = vmatpush2.msra.mxu0 %v1101_v15  ;;  %1427 = vmatpush2.msra.mxu1 %v1229_v16  ;;  %v1172_v13 = vld [vmem:[%s4747_s27 + $0x458] sm:$0xff]  ;;  %v1043_v15 = vld [vmem:[%s4747_s27 + $0x50] sm:$0xff] }
 0x18a   :  { %1357 = vmatprep.subr.mxu0 %v1098_v17  ;;  %1428 = vmatprep.subr.mxu1 %v1226_v18  ;;  %v1171_v16 = vld [vmem:[%s4747_s27 + $0x450] sm:$0xff]  ;;  %v1040_v17 = vld [vmem:[%s4747_s27 + $0x38] sm:$0xff] }
 0x18b   :  { %1358 = vmatpush2.msra.mxu0 %v1097_v20  ;;  %1359 = vmatprep.mubr.f32.mxu0 %v3882_v19  ;;  %v1168_v18 = vld [vmem:[%s4747_s27 + $0x438] sm:$0xff]  ;;  %v1039_v20 = vld [vmem:[%s4747_s27 + $0x30] sm:$0xff] }
 0x18c   :  { %1429 = vmatpush2.msra.mxu1 %v1225_v2  ;;  %1430 = vmatprep.mubr.f32.mxu1 %v3889_v21  ;;  %v1167_v2 = vld [vmem:[%s4747_s27 + $0x430] sm:$0xff] }
 0x18d   :  { %1360 = vmatmul.mubr.f32.vlgmr.msra.gmra.mxu0 %v3855_v11  ;;  %1431 = vmatmul.mubr.f32.vlgmr.msra.gmra.mxu1 %v3866_v14 }
 0x18e   :  { %1437 = vmatprep.subr.mxu0 %v1096_v22  ;;  %1508 = vmatprep.subr.mxu1 %v1224_v9  ;;  %v1036_v22 = vld [vmem:[%s4747_s27 + $0x18] sm:$0xff] }
 0x18f   :  { %1438 = vmatpush1.msra.mxu0 %v1095_v0  ;;  %1509 = vmatpush1.msra.mxu1 %v1223_v23  ;;  %v1164_v9 = vld [vmem:[%s4747_s27 + $0x418] sm:$0xff]  ;;  %v1035_v0 = vld [vmem:[%s4747_s27 + $0x10] sm:$0xff] }
 0x190   :  { %1439 = vmatprep.subr.mxu0 %v1092_v1  ;;  %1510 = vmatprep.subr.mxu1 %v1220_v24  ;;  %v1163_v23 = vld [vmem:[%s4747_s27 + $0x410] sm:$0xff]  ;;  %v1160_v1 = vld [vmem:[%s4747_s27 + $0x3f8] sm:$0xff] }
 0x191   :  { %1440 = vmatpush1.msra.mxu0 %v1091_v56  ;;  %1511 = vmatpush1.msra.mxu1 %v1219_v25  ;;  %v1288_v24 = vld [vmem:[%s4747_s27 + $0x7f8] sm:$0xff]  ;;  %v1159_v56 = vld [vmem:[%s4747_s27 + $0x3f0] sm:$0xff] }
 0x192   :  { %1441 = vmatprep.subr.mxu0 %v1088_v26  ;;  %1512 = vmatprep.subr.mxu1 %v1216_v27  ;;  %v1287_v25 = vld [vmem:[%s4747_s27 + $0x7f0] sm:$0xff]  ;;  %v1156_v26 = vld [vmem:[%s4747_s27 + $0x3d8] sm:$0xff] }
 0x193   :  { %1442 = vmatpush1.msra.mxu0 %v1087_v28  ;;  %1513 = vmatpush1.msra.mxu1 %v1215_v29  ;;  %v1284_v27 = vld [vmem:[%s4747_s27 + $0x7d8] sm:$0xff]  ;;  %v1155_v28 = vld [vmem:[%s4747_s27 + $0x3d0] sm:$0xff] }
 0x194   :  { %1443 = vmatprep.subr.mxu0 %v1084_v30  ;;  %1514 = vmatprep.subr.mxu1 %v1212_v31  ;;  %v1283_v29 = vld [vmem:[%s4747_s27 + $0x7d0] sm:$0xff]  ;;  %v1152_v30 = vld [vmem:[%s4747_s27 + $0x3b8] sm:$0xff] }
 0x195   :  { %1444 = vmatpush1.msra.mxu0 %v1083_v32  ;;  %1515 = vmatpush1.msra.mxu1 %v1211_v33  ;;  %v1280_v31 = vld [vmem:[%s4747_s27 + $0x7b8] sm:$0xff]  ;;  %v1151_v32 = vld [vmem:[%s4747_s27 + $0x3b0] sm:$0xff] }
 0x196   :  { %1445 = vmatprep.subr.mxu0 %v1080_v34  ;;  %1516 = vmatprep.subr.mxu1 %v1208_v35  ;;  %v1279_v33 = vld [vmem:[%s4747_s27 + $0x7b0] sm:$0xff]  ;;  %v1148_v34 = vld [vmem:[%s4747_s27 + $0x398] sm:$0xff] }
 0x197   :  { %1446 = vmatpush1.msra.mxu0 %v1079_v36  ;;  %1517 = vmatpush1.msra.mxu1 %v1207_v37  ;;  %v1276_v35 = vld [vmem:[%s4747_s27 + $0x798] sm:$0xff]  ;;  %v1147_v36 = vld [vmem:[%s4747_s27 + $0x390] sm:$0xff] }
 0x198   :  { %1447 = vmatprep.subr.mxu0 %v1076_v38  ;;  %1518 = vmatprep.subr.mxu1 %v1204_v39  ;;  %v1275_v37 = vld [vmem:[%s4747_s27 + $0x790] sm:$0xff]  ;;  %v1144_v38 = vld [vmem:[%s4747_s27 + $0x378] sm:$0xff] }
 0x199   :  { %1448 = vmatpush1.msra.mxu0 %v1075_v40  ;;  %1519 = vmatpush1.msra.mxu1 %v1203_v41  ;;  %v1272_v39 = vld [vmem:[%s4747_s27 + $0x778] sm:$0xff]  ;;  %v1143_v40 = vld [vmem:[%s4747_s27 + $0x370] sm:$0xff] }
 0x19a   :  { %1449 = vmatprep.subr.mxu0 %v1072_v42  ;;  %1520 = vmatprep.subr.mxu1 %v1200_v43  ;;  %v1271_v41 = vld [vmem:[%s4747_s27 + $0x770] sm:$0xff]  ;;  %v1140_v42 = vld [vmem:[%s4747_s27 + $0x358] sm:$0xff] }
 0x19b   :  { %1450 = vmatpush1.msra.mxu0 %v1071_v44  ;;  %1521 = vmatpush1.msra.mxu1 %v1199_v45  ;;  %v1268_v43 = vld [vmem:[%s4747_s27 + $0x758] sm:$0xff]  ;;  %v1139_v44 = vld [vmem:[%s4747_s27 + $0x350] sm:$0xff] }
 0x19c   :  { %1451 = vmatprep.subr.mxu0 %v1068_v46  ;;  %1522 = vmatprep.subr.mxu1 %v1196_v47  ;;  %v1267_v45 = vld [vmem:[%s4747_s27 + $0x750] sm:$0xff]  ;;  %v1136_v46 = vld [vmem:[%s4747_s27 + $0x338] sm:$0xff] }
 0x19d   :  { %1452 = vmatpush1.msra.mxu0 %v1067_v48  ;;  %1523 = vmatpush1.msra.mxu1 %v1195_v49  ;;  %v1264_v47 = vld [vmem:[%s4747_s27 + $0x738] sm:$0xff]  ;;  %v1135_v48 = vld [vmem:[%s4747_s27 + $0x330] sm:$0xff] }
 0x19e   :  { %1453 = vmatprep.subr.mxu0 %v1064_v50  ;;  %1524 = vmatprep.subr.mxu1 %v1192_v51  ;;  %v1263_v49 = vld [vmem:[%s4747_s27 + $0x730] sm:$0xff]  ;;  %v1132_v50 = vld [vmem:[%s4747_s27 + $0x318] sm:$0xff] }
 0x19f   :  { %1454 = vmatpush1.msra.mxu0 %v1063_v52  ;;  %1525 = vmatpush1.msra.mxu1 %v1191_v53  ;;  %v1260_v51 = vld [vmem:[%s4747_s27 + $0x718] sm:$0xff]  ;;  %v1131_v52 = vld [vmem:[%s4747_s27 + $0x310] sm:$0xff] }
 0x1a0   :  { %1455 = vmatprep.subr.mxu0 %v1060_v54  ;;  %1526 = vmatprep.subr.mxu1 %v1188_v55  ;;  %v1259_v53 = vld [vmem:[%s4747_s27 + $0x710] sm:$0xff]  ;;  %v1128_v54 = vld [vmem:[%s4747_s27 + $0x2f8] sm:$0xff] }
 0x1a1   :  { %1456 = vmatpush1.msra.mxu0 %v1059_v57  ;;  %1527 = vmatpush1.msra.mxu1 %v1187_v58  ;;  %v1256_v55 = vld [vmem:[%s4747_s27 + $0x6f8] sm:$0xff]  ;;  %v1127_v57 = vld [vmem:[%s4747_s27 + $0x2f0] sm:$0xff] }
 0x1a2   :  { %1457 = vmatprep.subr.mxu0 %v1056_v59  ;;  %1528 = vmatprep.subr.mxu1 %v1184_v60  ;;  %v1255_v58 = vld [vmem:[%s4747_s27 + $0x6f0] sm:$0xff]  ;;  %v1124_v59 = vld [vmem:[%s4747_s27 + $0x2d8] sm:$0xff] }
 0x1a3   :  { %1458 = vmatpush1.msra.mxu0 %v1055_v61  ;;  %1529 = vmatpush1.msra.mxu1 %v1183_v62  ;;  %v1252_v60 = vld [vmem:[%s4747_s27 + $0x6d8] sm:$0xff]  ;;  %v1123_v61 = vld [vmem:[%s4747_s27 + $0x2d0] sm:$0xff] }
 0x1a4   :  { %1459 = vmatprep.subr.mxu0 %v1052_v63  ;;  %1530 = vmatprep.subr.mxu1 %v1180_v3  ;;  %v1251_v62 = vld [vmem:[%s4747_s27 + $0x6d0] sm:$0xff]  ;;  %v1120_v63 = vld [vmem:[%s4747_s27 + $0x2b8] sm:$0xff] }
 0x1a5   :  { %1460 = vmatpush1.msra.mxu0 %v1051_v4  ;;  %1531 = vmatpush1.msra.mxu1 %v1179_v5  ;;  %v1248_v3 = vld [vmem:[%s4747_s27 + $0x6b8] sm:$0xff]  ;;  %v1119_v4 = vld [vmem:[%s4747_s27 + $0x2b0] sm:$0xff] }
 0x1a6   :  { %1461 = vmatprep.subr.mxu0 %v1048_v6  ;;  %1532 = vmatprep.subr.mxu1 %v1176_v7  ;;  %v1247_v5 = vld [vmem:[%s4747_s27 + $0x6b0] sm:$0xff]  ;;  %v1116_v6 = vld [vmem:[%s4747_s27 + $0x298] sm:$0xff] }
 0x1a7   :  { %1462 = vmatpush1.msra.mxu0 %v1047_v8  ;;  %1533 = vmatpush1.msra.mxu1 %v1175_v10  ;;  %v1244_v7 = vld [vmem:[%s4747_s27 + $0x698] sm:$0xff]  ;;  %v1115_v8 = vld [vmem:[%s4747_s27 + $0x290] sm:$0xff] }
 0x1a8   :  { %1463 = vmatprep.subr.mxu0 %v1044_v12  ;;  %1534 = vmatprep.subr.mxu1 %v1172_v13  ;;  %v1243_v10 = vld [vmem:[%s4747_s27 + $0x690] sm:$0xff]  ;;  %v1112_v12 = vld [vmem:[%s4747_s27 + $0x278] sm:$0xff] }
 0x1a9   :  { %1464 = vmatpush1.msra.mxu0 %v1043_v15  ;;  %1535 = vmatpush1.msra.mxu1 %v1171_v16  ;;  %v1240_v13 = vld [vmem:[%s4747_s27 + $0x678] sm:$0xff]  ;;  %v1111_v15 = vld [vmem:[%s4747_s27 + $0x270] sm:$0xff] }
 0x1aa   :  { %1465 = vmatprep.subr.mxu0 %v1040_v17  ;;  %1536 = vmatprep.subr.mxu1 %v1168_v18  ;;  %v1239_v16 = vld [vmem:[%s4747_s27 + $0x670] sm:$0xff]  ;;  %v1108_v17 = vld [vmem:[%s4747_s27 + $0x258] sm:$0xff] }
 0x1ab   :  { %1466 = vmatpush1.msra.mxu0 %v1039_v20  ;;  %1537 = vmatpush1.msra.mxu1 %v1167_v2  ;;  %v1236_v18 = vld [vmem:[%s4747_s27 + $0x658] sm:$0xff]  ;;  %v1107_v20 = vld [vmem:[%s4747_s27 + $0x250] sm:$0xff] }
 0x1ac   :  { %1467 = vmatprep.subr.mxu0 %v1036_v22  ;;  %1538 = vmatprep.subr.mxu1 %v1164_v9  ;;  %v1235_v2 = vld [vmem:[%s4747_s27 + $0x650] sm:$0xff]  ;;  %v1104_v22 = vld [vmem:[%s4747_s27 + $0x238] sm:$0xff] }
 0x1ad   :  { %1468 = vmatpush1.msra.mxu0 %v1035_v0  ;;  %1539 = vmatpush1.msra.mxu1 %v1163_v23  ;;  %v1232_v9 = vld [vmem:[%s4747_s27 + $0x638] sm:$0xff]  ;;  %v1103_v0 = vld [vmem:[%s4747_s27 + $0x230] sm:$0xff] }
 0x1ae   :  { %1469 = vmatprep.subr.mxu0 %v1160_v1  ;;  %1540 = vmatprep.subr.mxu1 %v1288_v24  ;;  %v1231_v23 = vld [vmem:[%s4747_s27 + $0x630] sm:$0xff]  ;;  %v1100_v1 = vld [vmem:[%s4747_s27 + $0x218] sm:$0xff] }
 0x1af   :  { %1470 = vmatpush2.msra.mxu0 %v1159_v56  ;;  %1541 = vmatpush2.msra.mxu1 %v1287_v25  ;;  %v1228_v24 = vld [vmem:[%s4747_s27 + $0x618] sm:$0xff]  ;;  %v1099_v56 = vld [vmem:[%s4747_s27 + $0x210] sm:$0xff] }
 0x1b0   :  { %1471 = vmatprep.subr.mxu0 %v1156_v26  ;;  %1542 = vmatprep.subr.mxu1 %v1284_v27  ;;  %v1227_v25 = vld [vmem:[%s4747_s27 + $0x610] sm:$0xff]  ;;  %v1614_v26 = vld [vmem:[%s4723_s5 + $0xf8] sm:$0xff] }
 0x1b1   :  { %1472 = vmatpush2.msra.mxu0 %v1155_v28  ;;  %1543 = vmatpush2.msra.mxu1 %v1283_v29  ;;  %v1598_v27 = vld [vmem:[%s4723_s5 + $0x78] sm:$0xff]  ;;  %v1613_v28 = vld [vmem:[%s4723_s5 + $0xf0] sm:$0xff]  ;;  %v1595_v29 = vld [vmem:[%s4723_s5 + $0x60] sm:$0xff] }
 0x1b2   :  { %1473 = vmatprep.subr.mxu0 %v1152_v30  ;;  %1544 = vmatprep.subr.mxu1 %v1280_v31  ;;  %v1610_v30 = vld [vmem:[%s4723_s5 + $0xd8] sm:$0xff] }
 0x1b3   :  { %1474 = vmatpush2.msra.mxu0 %v1151_v32  ;;  %1545 = vmatpush2.msra.mxu1 %v1279_v33  ;;  %v1594_v31 = vld [vmem:[%s4723_s5 + $0x58] sm:$0xff]  ;;  %v1609_v32 = vld [vmem:[%s4723_s5 + $0xd0] sm:$0xff] }
 0x1b4   :  { %1475 = vmatprep.subr.mxu0 %v1148_v34  ;;  %1546 = vmatprep.subr.mxu1 %v1276_v35  ;;  %v1593_v33 = vld [vmem:[%s4723_s5 + $0x50] sm:$0xff]  ;;  %v1608_v34 = vld [vmem:[%s4723_s5 + $0xc8] sm:$0xff] }
 0x1b5   :  { %1476 = vmatpush2.msra.mxu0 %v1147_v36  ;;  %1547 = vmatpush2.msra.mxu1 %v1275_v37  ;;  %v1592_v35 = vld [vmem:[%s4723_s5 + $0x48] sm:$0xff]  ;;  %v1607_v36 = vld [vmem:[%s4723_s5 + $0xc0] sm:$0xff] }
 0x1b6   :  { %1477 = vmatprep.subr.mxu0 %v1144_v38  ;;  %1548 = vmatprep.subr.mxu1 %v1272_v39  ;;  %v1591_v37 = vld [vmem:[%s4723_s5 + $0x40] sm:$0xff]  ;;  %v1606_v38 = vld [vmem:[%s4723_s5 + $0xb8] sm:$0xff] }
 0x1b7   :  { %1478 = vmatpush2.msra.mxu0 %v1143_v40  ;;  %1549 = vmatpush2.msra.mxu1 %v1271_v41  ;;  %v1590_v39 = vld [vmem:[%s4723_s5 + $0x38] sm:$0xff]  ;;  %v1605_v40 = vld [vmem:[%s4723_s5 + $0xb0] sm:$0xff] }
 0x1b8   :  { %1479 = vmatprep.subr.mxu0 %v1140_v42  ;;  %1550 = vmatprep.subr.mxu1 %v1268_v43  ;;  %v1589_v41 = vld [vmem:[%s4723_s5 + $0x30] sm:$0xff]  ;;  %v1604_v42 = vld [vmem:[%s4723_s5 + $0xa8] sm:$0xff] }
 0x1b9   :  { %1480 = vmatpush2.msra.mxu0 %v1139_v44  ;;  %1551 = vmatpush2.msra.mxu1 %v1267_v45  ;;  %v1588_v43 = vld [vmem:[%s4723_s5 + $0x28] sm:$0xff]  ;;  %v1603_v44 = vld [vmem:[%s4723_s5 + $0xa0] sm:$0xff] }
 0x1ba   :  { %1481 = vmatprep.subr.mxu0 %v1136_v46  ;;  %1552 = vmatprep.subr.mxu1 %v1264_v47  ;;  %v1587_v45 = vld [vmem:[%s4723_s5 + $0x20] sm:$0xff]  ;;  %v1602_v46 = vld [vmem:[%s4723_s5 + $0x98] sm:$0xff] }
 0x1bb   :  { %1482 = vmatpush2.msra.mxu0 %v1135_v48  ;;  %1553 = vmatpush2.msra.mxu1 %v1263_v49  ;;  %v1586_v47 = vld [vmem:[%s4723_s5 + $0x18] sm:$0xff]  ;;  %v1601_v48 = vld [vmem:[%s4723_s5 + $0x90] sm:$0xff] }
 0x1bc   :  { %1483 = vmatprep.subr.mxu0 %v1132_v50  ;;  %1554 = vmatprep.subr.mxu1 %v1260_v51  ;;  %v1585_v49 = vld [vmem:[%s4723_s5 + $0x10] sm:$0xff]  ;;  %v1600_v50 = vld [vmem:[%s4723_s5 + $0x88] sm:$0xff] }
 0x1bd   :  { %1484 = vmatpush2.msra.mxu0 %v1131_v52  ;;  %1555 = vmatpush2.msra.mxu1 %v1259_v53  ;;  %v1584_v51 = vld [vmem:[%s4723_s5 + $0x8] sm:$0xff]  ;;  %v1599_v52 = vld [vmem:[%s4723_s5 + $0x80] sm:$0xff] }
 0x1be   :  { %1485 = vmatprep.subr.mxu0 %v1128_v54  ;;  %1556 = vmatprep.subr.mxu1 %v1256_v55  ;;  %v1583_v53 = vld [vmem:[%s4723_s5] sm:$0xff]  ;;  %v1646_v55 = vld [vmem:[%s4723_s5 + $0x1f8] sm:$0xff] }
 0x1bf   :  { %1486 = vmatpush2.msra.mxu0 %v1127_v57  ;;  %1557 = vmatpush2.msra.mxu1 %v1255_v58  ;;  %v1827_v54 = vld [vmem:[#allocation8 + $0xf8] sm:$0xff]  ;;  %v1645_v58 = vld [vmem:[%s4723_s5 + $0x1f0] sm:$0xff] }
 0x1c0   :  { %1487 = vmatprep.subr.mxu0 %v1124_v59  ;;  %1558 = vmatprep.subr.mxu1 %v1252_v60  ;;  %v1630_v57 = vld [vmem:[%s4723_s5 + $0x178] sm:$0xff]  ;;  %v1629_v59 = vld [vmem:[%s4723_s5 + $0x170] sm:$0xff]  ;;  %v1644_v60 = vld [vmem:[%s4723_s5 + $0x1e8] sm:$0xff] }
 0x1c1   :  { %1488 = vmatpush2.msra.mxu0 %v1123_v61  ;;  %1559 = vmatpush2.msra.mxu1 %v1251_v62  ;;  %v1628_v61 = vld [vmem:[%s4723_s5 + $0x168] sm:$0xff]  ;;  %v1643_v62 = vld [vmem:[%s4723_s5 + $0x1e0] sm:$0xff] }
 0x1c2   :  { %1489 = vmatprep.subr.mxu0 %v1120_v63  ;;  %1560 = vmatprep.subr.mxu1 %v1248_v3  ;;  %v1627_v63 = vld [vmem:[%s4723_s5 + $0x160] sm:$0xff]  ;;  %v1642_v3 = vld [vmem:[%s4723_s5 + $0x1d8] sm:$0xff] }
 0x1c3   :  { %1490 = vmatpush2.msra.mxu0 %v1119_v4  ;;  %1561 = vmatpush2.msra.mxu1 %v1247_v5  ;;  %v1626_v4 = vld [vmem:[%s4723_s5 + $0x158] sm:$0xff]  ;;  %v1641_v5 = vld [vmem:[%s4723_s5 + $0x1d0] sm:$0xff] }
 0x1c4   :  { %1491 = vmatprep.subr.mxu0 %v1116_v6  ;;  %1562 = vmatprep.subr.mxu1 %v1244_v7  ;;  %v1625_v6 = vld [vmem:[%s4723_s5 + $0x150] sm:$0xff]  ;;  %v1640_v7 = vld [vmem:[%s4723_s5 + $0x1c8] sm:$0xff] }
 0x1c5   :  { %1492 = vmatpush2.msra.mxu0 %v1115_v8  ;;  %1563 = vmatpush2.msra.mxu1 %v1243_v10  ;;  %v4421_v8 = vpop.f32.mrf.mxu0  ;;  %v4423_v10 = vpop.f32.mrf.mxu1 }
 0x1c6   :  { %1493 = vmatprep.subr.mxu0 %v1112_v12  ;;  %1564 = vmatprep.subr.mxu1 %v1240_v13  ;;  %v1624_v12 = vld [vmem:[%s4723_s5 + $0x148] sm:$0xff]  ;;  %v1639_v13 = vld [vmem:[%s4723_s5 + $0x1c0] sm:$0xff] }
 0x1c7   :  { %1494 = vmatpush2.msra.mxu0 %v1111_v15  ;;  %1565 = vmatpush2.msra.mxu1 %v1239_v16  ;;  %v1623_v15 = vld [vmem:[%s4723_s5 + $0x140] sm:$0xff]  ;;  %v1007_v16 = vlaneseq }
 0x1c8   :  { %1495 = vmatprep.subr.mxu0 %v1108_v17  ;;  %1566 = vmatprep.subr.mxu1 %v1236_v18  ;;  %v1638_v17 = vld [vmem:[%s4723_s5 + $0x1b8] sm:$0xff]  ;;  %v648_v18 = vpop.f32.mrf.mxu0 }
 0x1c9   :  { %1496 = vmatpush2.msra.mxu0 %v1107_v20  ;;  %1567 = vmatpush2.msra.mxu1 %v1235_v2  ;;  %v719_v20 = vpop.f32.mrf.mxu1  ;;  %v1622_v2 = vld [vmem:[%s4723_s5 + $0x138] sm:$0xff] }
 0x1ca   :  { %1497 = vmatprep.subr.mxu0 %v1104_v22  ;;  %1568 = vmatprep.subr.mxu1 %v1232_v9  ;;  %v1637_v22 = vld [vmem:[%s4723_s5 + $0x1b0] sm:$0xff]  ;;  %v788_v9 = vpop.f32.mrf.mxu0 }
 0x1cb   :  { %1498 = vmatpush2.msra.mxu0 %v1103_v0  ;;  %1569 = vmatpush2.msra.mxu1 %v1231_v23  ;;  %v859_v0 = vpop.f32.mrf.mxu1  ;;  %v1621_v23 = vld [vmem:[%s4723_s5 + $0x130] sm:$0xff] }
 0x1cc   :  { %1499 = vmatprep.subr.mxu0 %v1100_v1  ;;  %1570 = vmatprep.subr.mxu1 %v1228_v24  ;;  %v1008_v1 = vshrl.u32 %v1007_v16, 7  ;;  %v1636_v24 = vld [vmem:[%s4723_s5 + $0x1a8] sm:$0xff] }
 0x1cd   :  { %1500 = vmatpush2.msra.mxu0 %v1099_v56  ;;  %1501 = vmatprep.mubr.f32.mxu0 %v3882_v19  ;;  %v1597_v19 = vld [vmem:[%s4723_s5 + $0x70] sm:$0xff]  ;;  %v1620_v56 = vld [vmem:[%s4723_s5 + $0x128] sm:$0xff] }
 0x1ce   :  { %1571 = vmatpush2.msra.mxu1 %v1227_v25  ;;  %1572 = vmatprep.mubr.f32.mxu1 %v3889_v21  ;;  %v1612_v21 = vld [vmem:[%s4723_s5 + $0xe8] sm:$0xff]  ;;  %v1017_v25 = vsub.s32 2, %v1008_v1 }
 0x1cf   :  { %1502 = vmatmul.mubr.f32.vlgmr.msra.gmra.mxu0 %v3855_v11  ;;  %1573 = vmatmul.mubr.f32.vlgmr.msra.gmra.mxu1 %v3866_v14  ;;  %v1596_v11 = vld [vmem:[%s4723_s5 + $0x68] sm:$0xff]  ;;  %v1611_v14 = vld [vmem:[%s4723_s5 + $0xe0] sm:$0xff] }
 0x1d0   :  { %2682 = vmatprep.subr.mxu0 %v1614_v26  ;;  %2717 = vmatprep.subr.mxu1 %v1646_v55  ;;  %v1635_v26 = vld [vmem:[%s4723_s5 + $0x1a0] sm:$0xff] }
 0x1d1   :  { %2683 = vmatpush3.msra.mxu0 %v1598_v27  ;;  %2718 = vmatpush3.msra.mxu1 %v1630_v57  ;;  %v790_v27 = vpop.f32.mrf.mxu0  ;;  %v1808_v16 = vld [vmem:[#allocation8 + $0x60] sm:$0xff] }
 0x1d2   :  { %2684 = vmatprep.subr.mxu0 %v1613_v28  ;;  %2719 = vmatprep.subr.mxu1 %v1645_v58  ;;  %v861_v28 = vpop.f32.mrf.mxu1 }
 0x1d3   :  { %2685 = vmatpush3.msra.mxu0 %v1597_v19  ;;  %2720 = vmatpush3.msra.mxu1 %v1629_v59  ;;  %v1619_v19 = vld [vmem:[%s4723_s5 + $0x120] sm:$0xff] }
 0x1d4   :  { %2686 = vmatprep.subr.mxu0 %v1612_v21  ;;  %2721 = vmatprep.subr.mxu1 %v1644_v60  ;;  %v1021_v21 = vsub.s32 3, %v1008_v1 }
 0x1d5   :  { %2687 = vmatpush3.msra.mxu0 %v1596_v11  ;;  %2722 = vmatpush3.msra.mxu1 %v1628_v61  ;;  %v1634_v11 = vld [vmem:[%s4723_s5 + $0x198] sm:$0xff] }
 0x1d6   :  { %2688 = vmatprep.subr.mxu0 %v1611_v14  ;;  %2723 = vmatprep.subr.mxu1 %v1643_v62  ;;  %v183_v14 = vld [vmem:[#allocation5] sm:$0xf] }
 0x1d7   :  { %2689 = vmatpush3.msra.mxu0 %v1595_v29  ;;  %2724 = vmatpush3.msra.mxu1 %v1627_v63 }
 0x1d8   :  { %2690 = vmatprep.subr.mxu0 %v1610_v30  ;;  %2725 = vmatprep.subr.mxu1 %v1642_v3 }
 0x1d9   :  { %2691 = vmatpush3.msra.mxu0 %v1594_v31  ;;  %2726 = vmatpush3.msra.mxu1 %v1626_v4 }
 0x1da   :  { %2692 = vmatprep.subr.mxu0 %v1609_v32  ;;  %2727 = vmatprep.subr.mxu1 %v1641_v5  ;;  %v1018_v32 = vrot.slane %v183_v14, %v1017_v25  ;;  %v1802_v25 = vld [vmem:[#allocation8 + $0x30] sm:$0xff] }
 0x1db   :  { %2693 = vmatpush3.msra.mxu0 %v1593_v33  ;;  %2728 = vmatpush3.msra.mxu1 %v1625_v6 }
 0x1dc   :  { %2694 = vmatprep.subr.mxu0 %v1608_v34  ;;  %2729 = vmatprep.subr.mxu1 %v1640_v7  ;;  %v1811_v7 = vld [vmem:[#allocation8 + $0x78] sm:$0xff] }
 0x1dd   :  { %2695 = vmatpush3.msra.mxu0 %v1592_v35  ;;  %2730 = vmatpush3.msra.mxu1 %v1624_v12  ;;  %v1826_v12 = vld [vmem:[#allocation8 + $0xf0] sm:$0xff] }
 0x1de   :  { %2696 = vmatprep.subr.mxu0 %v1607_v36  ;;  %2731 = vmatprep.subr.mxu1 %v1639_v13  ;;  %v1022_v36 = vrot.slane %v183_v14, %v1021_v21  ;;  %v1809_v13 = vld [vmem:[#allocation8 + $0x68] sm:$0xff]  ;;  %v1815_v21 = vld [vmem:[#allocation8 + $0x98] sm:$0xff] }
 0x1df   :  { %2697 = vmatpush3.msra.mxu0 %v1591_v37  ;;  %2732 = vmatpush3.msra.mxu1 %v1623_v15  ;;  %v1618_v37 = vld [vmem:[%s4723_s5 + $0x118] sm:$0xff]  ;;  %v1824_v15 = vld [vmem:[#allocation8 + $0xe0] sm:$0xff] }
 0x1e0   :  { %2698 = vmatprep.subr.mxu0 %v1606_v38  ;;  %2733 = vmatprep.subr.mxu1 %v1638_v17  ;;  %v1823_v17 = vld [vmem:[#allocation8 + $0xd8] sm:$0xff] }
 0x1e1   :  { %2699 = vmatpush3.msra.mxu0 %v1590_v39  ;;  %2734 = vmatpush3.msra.mxu1 %v1622_v2  ;;  %v1633_v39 = vld [vmem:[%s4723_s5 + $0x190] sm:$0xff] }
 0x1e2   :  { %2700 = vmatprep.subr.mxu0 %v1605_v40  ;;  %2735 = vmatprep.subr.mxu1 %v1637_v22  ;;  %v1806_v2 = vld [vmem:[#allocation8 + $0x50] sm:$0xff]  ;;  %v1821_v22 = vld [vmem:[#allocation8 + $0xc8] sm:$0xff] }
 0x1e3   :  { %2701 = vmatpush3.msra.mxu0 %v1589_v41  ;;  %2736 = vmatpush3.msra.mxu1 %v1621_v23  ;;  %v1804_v23 = vld [vmem:[#allocation8 + $0x40] sm:$0xff] }
 0x1e4   :  { %2702 = vmatprep.subr.mxu0 %v1604_v42  ;;  %2737 = vmatprep.subr.mxu1 %v1636_v24  ;;  %v1617_v42 = vld [vmem:[%s4723_s5 + $0x110] sm:$0xff]  ;;  %v1803_v24 = vld [vmem:[#allocation8 + $0x38] sm:$0xff] }
 0x1e5   :  { %2703 = vmatpush3.msra.mxu0 %v1588_v43  ;;  %2738 = vmatpush3.msra.mxu1 %v1620_v56  ;;  %v1632_v43 = vld [vmem:[%s4723_s5 + $0x188] sm:$0xff]  ;;  %v1818_v56 = vld [vmem:[#allocation8 + $0xb0] sm:$0xff] }
 0x1e6   :  { %2704 = vmatprep.subr.mxu0 %v1603_v44  ;;  %2739 = vmatprep.subr.mxu1 %v1635_v26  ;;  %v1817_v26 = vld [vmem:[#allocation8 + $0xa8] sm:$0xff] }
 0x1e7   :  { %2705 = vmatpush3.msra.mxu0 %v1587_v45  ;;  %2740 = vmatpush3.msra.mxu1 %v1619_v19  ;;  %v1616_v45 = vld [vmem:[%s4723_s5 + $0x108] sm:$0xff] }
 0x1e8   :  { %2706 = vmatprep.subr.mxu0 %v1602_v46  ;;  %2741 = vmatprep.subr.mxu1 %v1634_v11  ;;  %v1631_v46 = vld [vmem:[%s4723_s5 + $0x180] sm:$0xff] }
 0x1e9   :  { %2707 = vmatpush3.msra.mxu0 %v1586_v47  ;;  %2742 = vmatpush3.msra.mxu1 %v1618_v37  ;;  %v1615_v47 = vld [vmem:[%s4723_s5 + $0x100] sm:$0xff]  ;;  %s2621_s5 = sshll.u32 %s3315_s25, 4  ;;  %s2622_s5 = int_to_ptr.vmem [resolvable:$true] %s2621_s5 }
 0x1ea   :  { %2708 = vmatprep.subr.mxu0 %v1601_v48  ;;  %2743 = vmatprep.subr.mxu1 %v1633_v39  ;;  %v1859_v48 = vld [vmem:[#allocation8 + $0x1f8] sm:$0xff]  ;;  %v1800_v19 = vld [vmem:[#allocation8 + $0x20] sm:$0xff] }
 0x1eb   :  { %2709 = vmatpush3.msra.mxu0 %v1585_v49  ;;  %2744 = vmatpush3.msra.mxu1 %v1617_v42  ;;  %v1013_v49 = vsub.s32 1, %v1008_v1  ;;  %v1799_v11 = vld [vmem:[#allocation8 + $0x18] sm:$0xff] }
 0x1ec   :  { %2710 = vmatprep.subr.mxu0 %v1600_v50  ;;  %2745 = vmatprep.subr.mxu1 %v1632_v43  ;;  %v1009_v50 = vsub.s32 0, %v1008_v1  ;;  %v1819_v1 = vld [vmem:[#allocation8 + $0xb8] sm:$0xff] }
 0x1ed   :  { %2711 = vmatpush3.msra.mxu0 %v1584_v51  ;;  %2746 = vmatpush3.msra.mxu1 %v1616_v45  ;;  %v720_v51 = vadd.f32 %v719_v20, %v648_v18  ;;  %v1807_v18 = vld [vmem:[#allocation8 + $0x58] sm:$0xff]  ;;  %v1822_v20 = vld [vmem:[#allocation8 + $0xd0] sm:$0xff] }
 0x1ee   :  { %2712 = vmatprep.subr.mxu0 %v1599_v52  ;;  %2747 = vmatprep.subr.mxu1 %v1631_v46  ;;  %v718_v52 = vadd.f32 %v4423_v10, %v4421_v8  ;;  %v1010_v57 = vrot.slane %v183_v14, %v1009_v50  ;;  %v1810_v8 = vld [vmem:[#allocation8 + $0x70] sm:$0xff]  ;;  %v1825_v10 = vld [vmem:[#allocation8 + $0xe8] sm:$0xff]  ;;  %v1843_v43 = vld [vmem:[#allocation8 + $0x178] sm:$0xff] }
 0x1ef   :  { %2713 = vmatpush3.msra.mxu0 %v1583_v53  ;;  %2748 = vmatpush3.msra.mxu1 %v1615_v47  ;;  %v791_v53 = vadd.f32 %v790_v27, %v720_v51  ;;  %v1801_v27 = vld [vmem:[#allocation8 + $0x28] sm:$0xff]  ;;  %v1858_v45 = vld [vmem:[#allocation8 + $0x1f0] sm:$0xff]  ;;  %v1840_v50 = vld [vmem:[#allocation8 + $0x160] sm:$0xff] }
 0x1f0   :  { %2752 = vmatprep.subr.mxu0 %v1827_v54  ;;  %2787 = vmatprep.subr.mxu1 %v1859_v48  ;;  %v1014_v54 = vrot.slane %v183_v14, %v1013_v49  ;;  %v789_v55 = vadd.f32 %v788_v9, %v718_v52  ;;  %v1805_v9 = vld [vmem:[#allocation8 + $0x48] sm:$0xff]  ;;  %v1814_v14 = vld [vmem:[#allocation8 + $0x90] sm:$0xff]  ;;  %v1856_v49 = vld [vmem:[#allocation8 + $0x1e0] sm:$0xff] }
 0x1f1   :  { %v1842_v46 = vld [vmem:[#allocation8 + $0x170] sm:$0xff]  ;;  %v1857_v47 = vld [vmem:[#allocation8 + $0x1e8] sm:$0xff] }
 0x1f2   :  { %v1028_v63 = vadd.f32 %v1014_v54, %v791_v53  ;;  %v1027_v4 = vadd.f32 %v1010_v57, %v789_v55  ;;  %v1841_v48 = vld [vmem:[#allocation8 + $0x168] sm:$0xff]  ;;  %v1854_v51 = vld [vmem:[#allocation8 + $0x1d0] sm:$0xff]  ;;  %v1852_v55 = vld [vmem:[#allocation8 + $0x1c0] sm:$0xff] }
 0x1f3   :  { %v1838_v52 = vld [vmem:[#allocation8 + $0x150] sm:$0xff]  ;;  %v1853_v53 = vld [vmem:[#allocation8 + $0x1c8] sm:$0xff]  ;;  %v1836_v57 = vld [vmem:[#allocation8 + $0x140] sm:$0xff] }
 0x1f4   :  { %v1837_v54 = vld [vmem:[#allocation8 + $0x148] sm:$0xff] }
 0x20b   :  { %v930_v29 = vpop.f32.mrf.mxu0  ;;  %v1001_v30 = vpop.f32.mrf.mxu1 }
 0x20c   :  { %v931_v31 = vadd.f32 %v930_v29, %v859_v0  ;;  %v1820_v0 = vld [vmem:[#allocation8 + $0xc0] sm:$0xff]  ;;  %v1798_v29 = vld [vmem:[#allocation8 + $0x10] sm:$0xff] }
 0x20d   :  { %v932_v33 = vpop.f32.mrf.mxu0  ;;  %v1003_v38 = vpop.f32.mrf.mxu1 }
 0x20e   :  { %v1002_v34 = vadd.f32 %v1001_v30, %v931_v31  ;;  %v933_v35 = vadd.f32 %v932_v33, %v861_v28  ;;  %v1816_v28 = vld [vmem:[#allocation8 + $0xa0] sm:$0xff]  ;;  %v1813_v30 = vld [vmem:[#allocation8 + $0x88] sm:$0xff] }
 0x20f   :  { %v1797_v31 = vld [vmem:[#allocation8 + $0x8] sm:$0xff]  ;;  %v1796_v33 = vld [vmem:[#allocation8] sm:$0xff] }
 0x210   :  { %v4467_v40 = vadd.f32 %v1018_v32, %v1002_v34  ;;  %v1004_v41 = vadd.f32 %v1003_v38, %v933_v35  ;;  %v1812_v32 = vld [vmem:[#allocation8 + $0x80] sm:$0xff] }
 0x212   :  { %v4475_v44 = vadd.f32 %v1022_v36, %v1004_v41 }
 0x24d   :  { %v1361_v58 = vpop.f32.mrf.mxu0  ;;  %v1432_v59 = vpop.f32.mrf.mxu1 }
 0x24e   :  { %v1433_v60 = vadd.f32 %v1432_v59, %v1361_v58  ;;  %v1851_v58 = vld [vmem:[#allocation8 + $0x1b8] sm:$0xff] }
 0x24f   :  { %v1363_v61 = vpop.f32.mrf.mxu0  ;;  %v1434_v62 = vpop.f32.mrf.mxu1  ;;  %v1835_v59 = vld [vmem:[#allocation8 + $0x138] sm:$0xff] }
 0x250   :  { %v1435_v3 = vadd.f32 %v1434_v62, %v1363_v61  ;;  %v4488_v6 = vadd.f32 %v1433_v60, %v1027_v4  ;;  %v1850_v60 = vld [vmem:[#allocation8 + $0x1b0] sm:$0xff]  ;;  %v1849_v62 = vld [vmem:[#allocation8 + $0x1a8] sm:$0xff]  ;;  %v1832_v4 = vld [vmem:[#allocation8 + $0x120] sm:$0xff] }
 0x251   :  { %v1834_v61 = vld [vmem:[#allocation8 + $0x130] sm:$0xff] }
 0x252   :  { %v1580_v5 = vadd.f32 %v1435_v3, %v1028_v63  ;;  %v1833_v63 = vld [vmem:[#allocation8 + $0x128] sm:$0xff]  ;;  %v1848_v3 = vld [vmem:[#allocation8 + $0x1a0] sm:$0xff] }
 0x254   :  { %1718 = vmatprep.mubr.f32.mxu0 %v1580_v5 }
 0x255   :  { %1719 = vmatmul.mubr.f32.vlgmr.msra.gmra.mxu0 %v4488_v6 }
 0x256   :  { %2753 = vmatpush3.msra.mxu0 %v1811_v7  ;;  %1931 = vmatprep.mubr.f32.mxu0 %v1580_v5  ;;  %v1847_v5 = vld [vmem:[#allocation8 + $0x198] sm:$0xff]  ;;  %v1846_v7 = vld [vmem:[#allocation8 + $0x190] sm:$0xff] }
 0x257   :  { %2754 = vmatprep.subr.mxu0 %v1826_v12  ;;  %v1830_v12 = vld [vmem:[#allocation8 + $0x110] sm:$0xff] }
 0x258   :  { %2755 = vmatpush3.msra.mxu0 %v1810_v8  ;;  %v1845_v8 = vld [vmem:[#allocation8 + $0x188] sm:$0xff] }
 0x259   :  { %2756 = vmatprep.subr.mxu0 %v1825_v10  ;;  %v1829_v10 = vld [vmem:[#allocation8 + $0x108] sm:$0xff] }
 0x25a   :  { %2757 = vmatpush3.msra.mxu0 %v1809_v13  ;;  %v1844_v13 = vld [vmem:[#allocation8 + $0x180] sm:$0xff] }
 0x25b   :  { %2758 = vmatprep.subr.mxu0 %v1824_v15  ;;  %v1828_v15 = vld [vmem:[#allocation8 + $0x100] sm:$0xff] }
 0x25c   :  { %2759 = vmatpush3.msra.mxu0 %v1808_v16  ;;  %v3311_v16 = vmov 0.0  }
 0x25d   :  { %2760 = vmatprep.subr.mxu0 %v1823_v17  ;;  %v2062_v17 = vld [vmem:[%s4729_s11 + $0x78] sm:$0xff] }
 0x25e   :  { %2761 = vmatpush3.msra.mxu0 %v1807_v18  ;;  %v2061_v18 = vld [vmem:[%s4729_s11 + $0x70] sm:$0xff] }
 0x25f   :  { %2762 = vmatprep.subr.mxu0 %v1822_v20  ;;  %v2060_v20 = vld [vmem:[%s4729_s11 + $0x68] sm:$0xff] }
 0x260   :  { %2763 = vmatpush3.msra.mxu0 %v1806_v2  ;;  %v2059_v2 = vld [vmem:[%s4729_s11 + $0x60] sm:$0xff] }
 0x261   :  { %2764 = vmatprep.subr.mxu0 %v1821_v22  ;;  %v2058_v22 = vld [vmem:[%s4729_s11 + $0x58] sm:$0xff] }
 0x262   :  { %2765 = vmatpush3.msra.mxu0 %v1805_v9  ;;  %v2057_v9 = vld [vmem:[%s4729_s11 + $0x50] sm:$0xff] }
 0x263   :  { %2766 = vmatprep.subr.mxu0 %v1820_v0  ;;  %v2056_v0 = vld [vmem:[%s4729_s11 + $0x48] sm:$0xff] }
 0x264   :  { %2767 = vmatpush3.msra.mxu0 %v1804_v23  ;;  %v2055_v23 = vld [vmem:[%s4729_s11 + $0x40] sm:$0xff] }
 0x265   :  { %2768 = vmatprep.subr.mxu0 %v1819_v1  ;;  %v2054_v1 = vld [vmem:[%s4729_s11 + $0x38] sm:$0xff] }
 0x266   :  { %2769 = vmatpush3.msra.mxu0 %v1803_v24  ;;  %v2053_v24 = vld [vmem:[%s4729_s11 + $0x30] sm:$0xff] }
 0x267   :  { %2770 = vmatprep.subr.mxu0 %v1818_v56  ;;  %v2052_v56 = vld [vmem:[%s4729_s11 + $0x28] sm:$0xff] }
 0x268   :  { %2771 = vmatpush3.msra.mxu0 %v1802_v25  ;;  %v2051_v25 = vld [vmem:[%s4729_s11 + $0x20] sm:$0xff] }
 0x269   :  { %2772 = vmatprep.subr.mxu0 %v1817_v26  ;;  %v2050_v26 = vld [vmem:[%s4729_s11 + $0x18] sm:$0xff] }
 0x26a   :  { %2773 = vmatpush3.msra.mxu0 %v1801_v27  ;;  %v2049_v27 = vld [vmem:[%s4729_s11 + $0x10] sm:$0xff] }
 0x26b   :  { %2774 = vmatprep.subr.mxu0 %v1816_v28  ;;  %v2048_v28 = vld [vmem:[%s4729_s11 + $0x8] sm:$0xff] }
 0x26c   :  { %2775 = vmatpush3.msra.mxu0 %v1800_v19  ;;  %v2047_v19 = vld [vmem:[%s4729_s11] sm:$0xff]  ;;  %s3313_s11 = smov 64  }
 0x26d   :  { %2776 = vmatprep.subr.mxu0 %v1815_v21  ;;  %v4567_v21 = vld [vmem:[#allocation17 + $0x38] sm:$0xff] }
 0x26e   :  { %2777 = vmatpush3.msra.mxu0 %v1799_v11  ;;  %v4569_v11 = vld [vmem:[#allocation17 + $0x30] sm:$0xff] }
 0x26f   :  { %2778 = vmatprep.subr.mxu0 %v1814_v14  ;;  %v4574_v14 = vld [vmem:[#allocation17 + $0x28] sm:$0xff] }
 0x270   :  { %2779 = vmatpush3.msra.mxu0 %v1798_v29  ;;  %v4578_v29 = vld [vmem:[#allocation17 + $0x20] sm:$0xff] }
 0x271   :  { %2780 = vmatprep.subr.mxu0 %v1813_v30  ;;  %v4582_v30 = vld [vmem:[#allocation17 + $0x18] sm:$0xff] }
 0x272   :  { %2781 = vmatpush3.msra.mxu0 %v1797_v31  ;;  %v4586_v31 = vld [vmem:[#allocation17 + $0x10] sm:$0xff] }
 0x273   :  { %2782 = vmatprep.subr.mxu0 %v1812_v32  ;;  %v4590_v32 = vld [vmem:[#allocation17 + $0x8] sm:$0xff] }
 0x274   :  { %2783 = vmatpush3.msra.mxu0 %v1796_v33 }
 0x275   :  { %1932 = vmatmul.mubr.f32.vlgmr.msra.gmra.mxu0 %v4488_v6  ;;  %v1831_v6 = vld [vmem:[#allocation8 + $0x118] sm:$0xff]  ;;  %2873 = vmatprep.subr.mxu0 %v3311_v16 }
 0x276   :  { %2874 = vmatpush3.msra.mxu0 %v2062_v17  ;;  %2905 = vmatprep.mubr.msk.f32.mxu0 %vm3312_vm0, %v3311_v16  ;;  %v2669_v17 = vld [vmem:[#allocation13] ss:$0 sm:$0xff] }
 0x277   :  { %2875 = vmatprep.subr.mxu0 %v3311_v16 }
 0x278   :  { %2876 = vmatpush3.msra.mxu0 %v2061_v18 }
 0x279   :  { %2877 = vmatprep.subr.mxu0 %v3311_v16 }
 0x27a   :  { %2878 = vmatpush3.msra.mxu0 %v2060_v20 }
 0x27b   :  { %2879 = vmatprep.subr.mxu0 %v3311_v16 }
 0x27c   :  { %2880 = vmatpush3.msra.mxu0 %v2059_v2 }
 0x27d   :  { %2881 = vmatprep.subr.mxu0 %v3311_v16 }
 0x27e   :  { %2882 = vmatpush3.msra.mxu0 %v2058_v22  ;;  %v2142_v22 = vld [vmem:[#allocation17] sm:$0xff] }
 0x27f   :  { %2883 = vmatprep.subr.mxu0 %v3311_v16 }
 0x280   :  { %2884 = vmatpush3.msra.mxu0 %v2057_v9  ;;  %v2670_v9 = vld [vmem:[#allocation14] ss:$0 sm:$0xff] }
 0x281   :  { %2885 = vmatprep.subr.mxu0 %v3311_v16 }
 0x282   :  { %2886 = vmatpush3.msra.mxu0 %v2056_v0 }
 0x283   :  { %2887 = vmatprep.subr.mxu0 %v3311_v16 }
 0x284   :  { %2888 = vmatpush3.msra.mxu0 %v2055_v23 }
 0x285   :  { %2889 = vmatprep.subr.mxu0 %v3311_v16 }
 0x286   :  { %2890 = vmatpush3.msra.mxu0 %v2054_v1  ;;  %v2224_v1 = vld [vmem:[#allocation16] sm:$0xff] }
 0x287   :  { %2891 = vmatprep.subr.mxu0 %v3311_v16 }
 0x288   :  { %2892 = vmatpush3.msra.mxu0 %v2053_v24 }
 0x289   :  { %2893 = vmatprep.subr.mxu0 %v3311_v16 }
 0x28a   :  { %2894 = vmatpush3.msra.mxu0 %v2052_v56  ;;  %v2225_v56 = vld [vmem:[#allocation16 + $0x8] sm:$0xff] }
 0x28b   :  { %2895 = vmatprep.subr.mxu0 %v3311_v16 }
 0x28c   :  { %2896 = vmatpush3.msra.mxu0 %v2051_v25 }
 0x28d   :  { %2897 = vmatprep.subr.mxu0 %v3311_v16 }
 0x28e   :  { %2898 = vmatpush3.msra.mxu0 %v2050_v26 }
 0x28f   :  { %v1503_v34 = vpop.f32.mrf.mxu0  ;;  %v1574_v35 = vpop.f32.mrf.mxu1  ;;  %2899 = vmatprep.subr.mxu0 %v3311_v16 }
 0x290   :  { %v1575_v36 = vadd.f32 %v1574_v35, %v1503_v34  ;;  %2900 = vmatpush3.msra.mxu0 %v2049_v27 }
 0x291   :  { %v1505_v37 = vpop.f32.mrf.mxu0  ;;  %v1576_v38 = vpop.f32.mrf.mxu1  ;;  %2901 = vmatprep.subr.mxu0 %v3311_v16 }
 0x292   :  { %v1577_v39 = vadd.f32 %v1576_v38, %v1505_v37  ;;  %v4494_v42 = vadd.f32 %v1575_v36, %v4467_v40  ;;  %v1839_v40 = vld [vmem:[#allocation8 + $0x158] sm:$0xff]  ;;  %2902 = vmatpush3.msra.mxu0 %v2048_v28 }
 0x293   :  { %2903 = vmatprep.subr.mxu0 %v3311_v16  ;;  %v2666_v36 = vld [vmem:[#allocation7] ss:$0 sm:$0xff] }
 0x294   :  { %v1582_v41 = vadd.f32 %v1577_v39, %v4475_v44  ;;  %v1855_v44 = vld [vmem:[#allocation8 + $0x1d8] sm:$0xff]  ;;  %2904 = vmatpush3.msra.mxu0 %v2047_v19 }
 0x295   :  { %2960 = vmatprep.subr.mxu0 %v3311_v16 }
 0x296   :  { %1788 = vmatprep.mubr.f32.mxu1 %v1582_v41 }
 0x297   :  { %1789 = vmatmul.mubr.f32.vlgmr.msra.gmra.mxu1 %v4494_v42 }
 0x298   :  { %2788 = vmatpush3.msra.mxu1 %v1843_v43  ;;  %2001 = vmatprep.mubr.f32.mxu1 %v1582_v41 }
 0x299   :  { %2789 = vmatprep.subr.mxu1 %v1858_v45 }
 0x29a   :  { %2790 = vmatpush3.msra.mxu1 %v1842_v46 }
 0x29b   :  { %2791 = vmatprep.subr.mxu1 %v1857_v47  ;;  %v2667_v47 = vld [vmem:[#allocation10] ss:$0 sm:$0xff] }
 0x29c   :  { %2792 = vmatpush3.msra.mxu1 %v1841_v48 }
 0x29d   :  { %2793 = vmatprep.subr.mxu1 %v1856_v49 }
 0x29e   :  { %2794 = vmatpush3.msra.mxu1 %v1840_v50 }
 0x29f   :  { %2795 = vmatprep.subr.mxu1 %v1855_v44 }
 0x2a0   :  { %2796 = vmatpush3.msra.mxu1 %v1839_v40 }
 0x2a1   :  { %2797 = vmatprep.subr.mxu1 %v1854_v51 }
 0x2a2   :  { %2798 = vmatpush3.msra.mxu1 %v1838_v52 }
 0x2a3   :  { %2799 = vmatprep.subr.mxu1 %v1853_v53 }
 0x2a4   :  { %2800 = vmatpush3.msra.mxu1 %v1837_v54 }
 0x2a5   :  { %2801 = vmatprep.subr.mxu1 %v1852_v55 }
 0x2a6   :  { %2802 = vmatpush3.msra.mxu1 %v1836_v57 }
 0x2a7   :  { %2803 = vmatprep.subr.mxu1 %v1851_v58 }
 0x2a8   :  { %2804 = vmatpush3.msra.mxu1 %v1835_v59 }
 0x2a9   :  { %2805 = vmatprep.subr.mxu1 %v1850_v60 }
 0x2aa   :  { %2806 = vmatpush3.msra.mxu1 %v1834_v61 }
 0x2ab   :  { %2807 = vmatprep.subr.mxu1 %v1849_v62 }
 0x2ac   :  { %2808 = vmatpush3.msra.mxu1 %v1833_v63 }
 0x2ad   :  { %2809 = vmatprep.subr.mxu1 %v1848_v3 }
 0x2ae   :  { %2810 = vmatpush3.msra.mxu1 %v1832_v4 }
 0x2af   :  { %2811 = vmatprep.subr.mxu1 %v1847_v5 }
 0x2b0   :  { %2812 = vmatpush3.msra.mxu1 %v1831_v6 }
 0x2b1   :  { %2813 = vmatprep.subr.mxu1 %v1846_v7 }
 0x2b2   :  { %2814 = vmatpush3.msra.mxu1 %v1830_v12 }
 0x2b3   :  { %2815 = vmatprep.subr.mxu1 %v1845_v8 }
 0x2b4   :  { %2816 = vmatpush3.msra.mxu1 %v1829_v10 }
 0x2b5   :  { %2817 = vmatprep.subr.mxu1 %v1844_v13  ;;  %v2668_v13 = vld [vmem:[#allocation11] ss:$0 sm:$0xff] }
 0x2b6   :  { %2818 = vmatpush3.msra.mxu1 %v1828_v15 }
 0x2b7   :  { %2002 = vmatmul.mubr.f32.vlgmr.msra.gmra.mxu1 %v4494_v42  ;;  %2908 = vmatprep.subr.mxu1 %v3311_v16 }
 0x2b8   :  { %2924 = vmatprep.mubr.msk.f32.mxu1 %vm3312_vm0, %v3311_v16  ;;  %2909 = vmatpush3.msra.mxu1 %v4567_v21 }
 0x2b9   :  { %2910 = vmatprep.subr.mxu1 %v3311_v16 }
 0x2ba   :  { %2911 = vmatpush3.msra.mxu1 %v4569_v11 }
 0x2bb   :  { %2912 = vmatprep.subr.mxu1 %v3311_v16 }
 0x2bc   :  { %2913 = vmatpush3.msra.mxu1 %v4574_v14 }
 0x2bd   :  { %2914 = vmatprep.subr.mxu1 %v3311_v16 }
 0x2be   :  { %2915 = vmatpush3.msra.mxu1 %v4578_v29 }
 0x2bf   :  { %2916 = vmatprep.subr.mxu1 %v3311_v16 }
 0x2c0   :  { %2917 = vmatpush3.msra.mxu1 %v4582_v30 }
 0x2c1   :  { %2918 = vmatprep.subr.mxu1 %v3311_v16 }
 0x2c2   :  { %2919 = vmatpush3.msra.mxu1 %v4586_v31 }
 0x2c3   :  { %2920 = vmatprep.subr.mxu1 %v3311_v16 }
 0x2c4   :  { %2921 = vmatpush3.msra.mxu1 %v4590_v32 }
 0x2c5   :  { %2922 = vmatprep.subr.mxu1 %v3311_v16 }
 0x2c6   :  { %2923 = vmatpush3.msra.mxu1 %v2142_v22 }
 0x2c7   :  { %2927 = vmatprep.subr.mxu1 %v4567_v21 }
 0x315   :  { %v2714_v33 = vpop.f32.mrf.mxu0 }
 0x317   :  { %v2715_v34 = vpop.f32.mrf.mxu0 }
 0x318   :  { %v2716_v35 = vadd.f32 %v2715_v34, %v2714_v33 }
 0x31a   :  { %v1721_v39 = vadd.f32 %v2716_v35, %v2666_v36 }
 0x335   :  { %v2784_v43 = vpop.f32.mrf.mxu0 }
 0x337   :  { %v2785_v45 = vpop.f32.mrf.mxu0 }
 0x338   :  { %v2786_v46 = vadd.f32 %v2785_v45, %v2784_v43  ;;  %v2537_v43 = vld [vmem:[%s4732_s14 + $0x20] sm:$0xff]  ;;  %v2536_v45 = vld [vmem:[%s4732_s14 + $0x18] sm:$0xff] }
 0x33a   :  { %v1934_v50 = vadd.f32 %v2786_v46, %v2667_v47  ;;  %v2535_v46 = vld [vmem:[%s4732_s14 + $0x10] sm:$0xff]  ;;  %v2534_v47 = vld [vmem:[%s4732_s14 + $0x8] sm:$0xff] }
 0x357   :  { %v2749_v37 = vpop.f32.mrf.mxu1 }
 0x359   :  { %v2750_v38 = vpop.f32.mrf.mxu1 }
 0x35a   :  { %v2751_v41 = vadd.f32 %v2750_v38, %v2749_v37 }
 0x35c   :  { %v1791_v42 = vadd.f32 %v2751_v41, %v1721_v39  ;;  %v2540_v39 = vld [vmem:[%s4732_s14 + $0x38] sm:$0xff]  ;;  %v2539_v41 = vld [vmem:[%s4732_s14 + $0x30] sm:$0xff] }
 0x35e   :  { %1795 = vst.msk [vmem:[#allocation19] sm:$0xf] %vm1794_vm1, %v1791_v42  ;;  %v2538_v42 = vld [vmem:[%s4732_s14 + $0x28] sm:$0xff] }
 0x377   :  { %v2819_v48 = vpop.f32.mrf.mxu1 }
 0x379   :  { %v2820_v49 = vpop.f32.mrf.mxu1 }
 0x37a   :  { %v2821_v44 = vadd.f32 %v2820_v49, %v2819_v48  ;;  %v2533_v48 = vld [vmem:[%s4732_s14] sm:$0xff]  ;;  %s3314_s14 = smov [#allocation20]  }
 0x37b   :  { %s2631_s24 = sshll.u32 %s3314_s14, 4  ;;  %s2632_s24 = int_to_ptr.vmem [resolvable:$true] %s2631_s24 }
 0x37c   :  { %v2004_v40 = vadd.f32 %v2821_v44, %v1934_v50  ;;  %s3221_s2 = scalar_lea.vmem %s2632_s24, 64  ;;  %p3226_p9 = scmp.lt.s32.totalorder %s2632_s24, %s2632_s24 }
 0x37d   :  { %p3222_p8 = scmp.ne.s32.totalorder %s2632_s24, %s3221_s2  ;;  %p3227_p10 = scmp.lt.s32.totalorder %s3221_s2, %s3221_s2 }
 0x37e   :  { %v2008_v51 = vsel %vm2007_vm2, %v2004_v40, 0.0 }
 0x37f   :  { %v2009_v52 = vrot.slane %v2008_v51, 4  ;;  %p3228_p11 = por %p3227_p10, %p3226_p9 }
 0x381   :  { %v2010_v53 = vadd.f32 %v2009_v52, %v2008_v51  ;;  %p3229_p12 = pnand %p3228_p11, %p3222_p8 }
 0x383   :  { %v2011_v54 = vrot.slane %v2010_v53, 2 }
 0x385   :  { %v2012_v55 = vadd.f32 %v2011_v54, %v2010_v53 }
 0x387   :  { %v2013_v57 = vrot.slane %v2012_v55, 1 }
 0x389   :  { %v2014_v58 = vadd.f32 %v2013_v57, %v2012_v55 }
 0x38b   :  { %v2016_v59 = vmul.f32 0.25, %v2014_v58 }
 0x38d   :  { %v2017_v60 = vsub.f32 %v2004_v40, %v2016_v59 }
 0x38f   :  { %v2018_v61 = vmul.f32 %v2017_v60, %v2017_v60 }
 0x391   :  { %v2019_v62 = vsel %vm2007_vm2, %v2018_v61, 0.0 }
 0x392   :  { %v2020_v63 = vrot.slane %v2019_v62, 4 }
 0x394   :  { %v2021_v3 = vadd.f32 %v2020_v63, %v2019_v62 }
 0x396   :  { %v2022_v4 = vrot.slane %v2021_v3, 2 }
 0x398   :  { %v2023_v5 = vadd.f32 %v2022_v4, %v2021_v3 }
 0x39a   :  { %v2024_v6 = vrot.slane %v2023_v5, 1 }
 0x39c   :  { %v2025_v7 = vadd.f32 %v2024_v6, %v2023_v5 }
 0x39e   :  { %v2026_v12 = vmul.f32 0.25, %v2025_v7 }
 0x3a0   :  { %v2027_v8 = vadd.f32 1e-05, %v2026_v12 }
 0x3a2   :  { %3004 = vrsqrt.f32 %v2027_v8 }
 0x3af   :  { %v3005_v10 = vpop.eup %3004 }
 0x3b0   :  { %v2029_v15 = vmul.f32 %v3005_v10, %v2017_v60 }
 0x3b2   :  { %v2037_v18 = vmul.f32 %v2668_v13, %v2029_v15 }
 0x3b4   :  { %v2045_v20 = vadd.f32 %v2669_v17, %v2037_v18 }
 0x3b6   :  { %v2046_v2 = vmax.f32 %v2045_v20, 0.0 }
 0x3b8   :  { %2906 = vmatmul.mubr.f32.vlgmr.msra.gmra.mxu0 %v2046_v2 }
 0x3b9   :  { %2976 = vmatprep.mubr.msk.f32.mxu0 %vm3312_vm0, %v3311_v16  ;;  %2961 = vmatpush3.msra.mxu0 %v2540_v39 }
 0x3ba   :  { %2962 = vmatprep.subr.mxu0 %v3311_v16 }
 0x3bb   :  { %2963 = vmatpush3.msra.mxu0 %v2539_v41 }
 0x3bc   :  { %2964 = vmatprep.subr.mxu0 %v3311_v16 }
 0x3bd   :  { %2965 = vmatpush3.msra.mxu0 %v2538_v42 }
 0x3be   :  { %2966 = vmatprep.subr.mxu0 %v3311_v16 }
 0x3bf   :  { %2967 = vmatpush3.msra.mxu0 %v2537_v43 }
 0x3c0   :  { %2968 = vmatprep.subr.mxu0 %v3311_v16 }
 0x3c1   :  { %2969 = vmatpush3.msra.mxu0 %v2536_v45 }
 0x3c2   :  { %2970 = vmatprep.subr.mxu0 %v3311_v16 }
 0x3c3   :  { %2971 = vmatpush3.msra.mxu0 %v2535_v46 }
 0x3c4   :  { %2972 = vmatprep.subr.mxu0 %v3311_v16 }
 0x3c5   :  { %2973 = vmatpush3.msra.mxu0 %v2534_v47 }
 0x3c6   :  { %2974 = vmatprep.subr.mxu0 %v3311_v16 }
 0x3c7   :  { %2975 = vmatpush3.msra.mxu0 %v2533_v48 }
 0x478   :  { %v2136_v0 = vpop.f32.mrf.mxu0 }
 0x479   :  { %v4599_v23 = vadd.f32 %v2670_v9, %v2136_v0 }
 0x47a   :  { %v2907_v24 = vpop.f32.mrf.mxu0 }
 0x47b   :  { %2925 = vmatmul.mubr.msk.f32.vlgmr.msra.gmra.mxu1 %vm2150_vm3, %v4599_v23  ;;  %2141 = vst.msk [vmem:[#allocation20] sm:$0xf] %vm2140_vm4, %v4599_v23  ;;  %v2526_v37 = vmul.f32 %v4599_v23, %v4599_v23 }
 0x47c   :  { %2928 = vmatpush3.msra.mxu1 %v4567_v21  ;;  %2943 = vmatprep.mubr.msk.f32.mxu1 %vm2150_vm3, %v2224_v1 }
 0x47d   :  { %2929 = vmatprep.subr.mxu1 %v4569_v11  ;;  %v2527_v38 = vsel %vm2140_vm4, %v2526_v37, 0.0 }
 0x47e   :  { %2930 = vmatpush3.msra.mxu1 %v4569_v11 }
 0x47f   :  { %2931 = vmatprep.subr.mxu1 %v4574_v14 }
 0x480   :  { %2932 = vmatpush3.msra.mxu1 %v4574_v14 }
 0x481   :  { %2933 = vmatprep.subr.mxu1 %v4578_v29 }
 0x482   :  { %2934 = vmatpush3.msra.mxu1 %v4578_v29 }
 0x483   :  { %2935 = vmatprep.subr.mxu1 %v4582_v30 }
 0x484   :  { %2936 = vmatpush3.msra.mxu1 %v4582_v30 }
 0x485   :  { %2937 = vmatprep.subr.mxu1 %v4586_v31 }
 0x486   :  { %2938 = vmatpush3.msra.mxu1 %v4586_v31 }
 0x487   :  { %2939 = vmatprep.subr.mxu1 %v4590_v32 }
 0x488   :  { %2940 = vmatpush3.msra.mxu1 %v4590_v32 }
 0x489   :  { %2941 = vmatprep.subr.mxu1 %v2142_v22 }
 0x48a   :  { %2942 = vmatpush3.msra.mxu1 %v2142_v22 }
 0x48b   :  { %2944 = vmatmul.mubr.msk.f32.vlgmr.msra.gmra.mxu1 %vm2150_vm3, %v2225_v56  ;;  %2946 = vmatprep.subr.mxu1 %v3311_v16 }
 0x48c   :  { %2950 = vmatprep.mubr.msk.f32.mxu1 %vm3312_vm0, %v3311_v16 }
 0x53b   :  { %v4623_v25 = vpop.f32.mrf.mxu1 }
 0x53c   :  { %v2307_v26 = vmul.f32 %v4623_v25, %v4623_v25 }
 0x53d   :  { %v2926_v27 = vpop.f32.mrf.mxu1 }
 0x53e   :  { %2410 = vrot.lane.b32.xlu1 %v2307_v26, %s3313_s11  ;;  %v2308_v34 = vsel %vm2140_vm4, %v2307_v26, 0.0 }
 0x54b   :  { %v4628_v28 = vpop.f32.mrf.mxu1 }
 0x54c   :  { %v2315_v19 = vmul.f32 %v4628_v28, %v4628_v28 }
 0x54d   :  { %v4632_v21 = vpop.f32.mrf.mxu1 }
 0x54e   :  { %2423 = vrot.lane.b32.xlu0 %v2315_v19, %s3313_s11  ;;  %v2314_v11 = vmul.f32 %v4632_v21, %v4632_v21  ;;  %v2319_v31 = vsel %vm2150_vm3, %v2315_v19, 0.0 }
 0x550   :  { %v2316_v36 = vsel %vm2150_vm3, %v2314_v11, 0.0 }
 0x552   :  { %2421 = vrot.lane.b32.xlu0 %v2314_v11, %s3313_s11 }
 0x5b0   :  { %v2411_v33 = vpop.permute.xlu1 %2410 }
 0x5b1   :  { %v2413_v35 = vsel %vm2140_vm4, %v2411_v33, 0.0 }
 0x5c0   :  { %v2424_v14 = vpop.permute.xlu0 %2423 }
 0x5c1   :  { %v2430_v29 = vsel %vm2150_vm3, %v2424_v14, 0.0 }
 0x5c2   :  { %2431 = vadd.xlane.f32.xlu1 %v2430_v29 }
 0x5c4   :  { %v2422_v30 = vpop.permute.xlu0 %2421 }
 0x5c5   :  { %v2427_v32 = vsel %vm2150_vm3, %v2422_v30, 0.0 }
 0x5c6   :  { %2320 = vadd.xlane.f32.xlu1 %v2319_v31  ;;  %2428 = vadd.xlane.f32.xlu0 %v2427_v32 }
 0x5ca   :  { %2309 = vadd.xlane.f32.xlu1 %v2308_v34  ;;  %2414 = vadd.xlane.f32.xlu0 %v2413_v35 }
 0x5ce   :  { %2317 = vadd.xlane.f32.xlu0 %v2316_v36 }
 0x5d2   :  { %2528 = vadd.xlane.f32.xlu0 %v2527_v38 }
 0x64b   :  { %v2432_v49 = vpop.xlane.xlu1 %2431 }
 0x64c   :  { %v2434_v50 = vmax.f32 %v2432_v49, 1e-24 }
 0x64e   :  { %3006 = vrsqrt.f32 %v2434_v50 }
 0x64f   :  { %v2321_v44 = vpop.xlane.xlu1 %2320  ;;  %v2429_v40 = vpop.xlane.xlu0 %2428 }
 0x650   :  { %v2323_v51 = vmax.f32 %v2321_v44, 1e-24  ;;  %v2433_v52 = vmax.f32 %v2429_v40, 1e-24 }
 0x652   :  { %3008 = vrsqrt.f32 %v2323_v51 }
 0x653   :  { %3010 = vrsqrt.f32 %v2433_v52  ;;  %v2415_v53 = vpop.xlane.xlu0 %2414  ;;  %v2310_v54 = vpop.xlane.xlu1 %2309 }
 0x654   :  { %v2416_v55 = vmax.f32 %v2415_v53, 1e-24  ;;  %v2311_v57 = vmax.f32 %v2310_v54, 1e-24 }
 0x656   :  { %3012 = vrsqrt.f32 %v2416_v55 }
 0x657   :  { %v2318_v58 = vpop.xlane.xlu0 %2317 }
 0x658   :  { %v2322_v59 = vmax.f32 %v2318_v58, 1e-24 }
 0x65a   :  { %3014 = vrsqrt.f32 %v2322_v59 }
 0x65b   :  { %v3007_v60 = vpop.eup %3006  ;;  %3016 = vrsqrt.f32 %v2311_v57  ;;  %v2529_v61 = vpop.xlane.xlu0 %2528 }
 0x65c   :  { %v2530_v62 = vmax.f32 %v2529_v61, 1e-24  ;;  %v2438_v63 = vmul.f32 %v3007_v60, %v4628_v28 }
 0x65e   :  { %3018 = vrsqrt.f32 %v2530_v62  ;;  %2446 = vrot.lane.b32.xlu1 %v2438_v63, %s3313_s11 }
 0x65f   :  { %v3009_v3 = vpop.eup %3008 }
 0x660   :  { %v3011_v4 = vpop.eup %3010  ;;  %v2327_v5 = vmul.f32 %v3009_v3, %v4628_v28 }
 0x661   :  { %v2437_v6 = vmul.f32 %v3011_v4, %v4632_v21 }
 0x662   :  { %2947 = vmatpush3.xpose.msk.msra.mxu1 %vm2150_vm3, %v2327_v5 }
 0x663   :  { %2444 = vrot.lane.b32.xlu0 %v2437_v6, %s3313_s11  ;;  %2948 = vmatprep.subr.mxu1 %v3311_v16  ;;  %v3013_v7 = vpop.eup %3012 }
 0x664   :  { %v2418_v12 = vmul.f32 %v3013_v7, %v4623_v25 }
 0x666   :  { %2440 = vrot.lane.b32.xlu1 %v2418_v12, %s3313_s11 }
 0x667   :  { %v3015_v8 = vpop.eup %3014 }
 0x668   :  { %v3017_v10 = vpop.eup %3016  ;;  %v2326_v13 = vmul.f32 %v3015_v8, %v4632_v21 }
 0x669   :  { %v2313_v17 = vmul.f32 %v3017_v10, %v4623_v25 }
 0x66a   :  { %2949 = vmatpush3.xpose.msk.msra.mxu1 %vm2150_vm3, %v2326_v13 }
 0x66b   :  { %v3019_v15 = vpop.eup %3018  ;;  %2953 = vmatprep.subr.mxu1 %v3311_v16 }
 0x66c   :  { %v2532_v18 = vmul.f32 %v3019_v15, %v4599_v23 }
 0x66d   :  { %2951 = vmatmul.mubr.msk.f32.vlgmr.msra.gmra.mxu1 %vm2150_vm3, %v2313_v17 }
 0x66e   :  { %2977 = vmatmul.mubr.msk.f32.vlgmr.msra.gmra.mxu0 %vm2150_vm3, %v2532_v18  ;;  %2957 = vmatprep.mubr.msk.f32.mxu1 %vm3312_vm0, %v3311_v16 }
 0x6d0   :  { %v2447_v20 = vpop.permute.xlu1 %2446 }
 0x6d1   :  { %2954 = vmatpush3.xpose.msk.msra.mxu1 %vm2150_vm3, %v2447_v20 }
 0x6d2   :  { %2955 = vmatprep.subr.mxu1 %v3311_v16 }
 0x6d5   :  { %v2445_v2 = vpop.permute.xlu0 %2444 }
 0x6d6   :  { %2956 = vmatpush3.xpose.msk.msra.mxu1 %vm2150_vm3, %v2445_v2 }
 0x6d8   :  { %v2441_v22 = vpop.permute.xlu1 %2440 }
 0x6d9   :  { %2958 = vmatmul.mubr.msk.f32.vlgmr.msra.gmra.mxu1 %vm2150_vm3, %v2441_v22 }
 0x6da   :  { %3232 = shalt.err (!%p3229_p12)
}
 0x6db   :  { %2634 = dma.vmem_to_hbm [thread:$0]  %s2632_s24, 64, %s4735_s17, [#allocation21]  }
 0x6dc   :  { %s3241_s26 = scalar_lea.vmem %s2622_s5, 64  ;;  %p3246_p0 = scmp.lt.s32.totalorder %s2622_s5, %s2622_s5 }
 0x6dd   :  { %p3242_p13 = scmp.ne.s32.totalorder %s2622_s5, %s3241_s26  ;;  %p3247_p1 = scmp.lt.s32.totalorder %s3241_s26, %s3241_s26 }
 0x6df   :  { %p3248_p2 = por %p3247_p1, %p3246_p0 }
 0x6e1   :  { %p3249_p3 = pnand %p3248_p2, %p3242_p13 }
 0x6e3   :  { %3252 = shalt.err (!%p3249_p3)
}
 0x6e4   :  { %2624 = dma.vmem_to_hbm [thread:$0]  %s2622_s5, 64, %s4734_s16, [#allocation4]   ;;  %vm2407_vm5 = vcmask 125952  }
 0x6e5   :  { %s3316_s11 = smov [#allocation22]  }
 0x6e6   :  { %s2641_s29 = sshll.u32 %s3316_s11, 4  ;;  %s2642_s29 = int_to_ptr.vmem [resolvable:$true] %s2641_s29 }
 0x6e7   :  { %s3261_s6 = scalar_lea.vmem %s2642_s29, 64  ;;  %p3266_p5 = scmp.lt.s32.totalorder %s2642_s29, %s2642_s29 }
 0x6e8   :  { %p3262_p4 = scmp.ne.s32.totalorder %s2642_s29, %s3261_s6  ;;  %p3267_p6 = scmp.lt.s32.totalorder %s3261_s6, %s3261_s6 }
 0x6ea   :  { %p3268_p7 = por %p3267_p6, %p3266_p5 }
 0x6ec   :  { %p3269_p8 = pnand %p3268_p7, %p3262_p4 }
 0x72d   :  { %v2403_v16 = vpop.f32.mrf.mxu1 }
 0x72e   :  { %2408 = vst.msk [vmem:[%s4737_s19] sm:$0xf] %vm2407_vm5, %v2403_v16  ;;  %v2610_v9 = vpop.f32.mrf.mxu0 }
 0x72f   :  { %2614 = vst.msk [vmem:[#allocation22] sm:$0xf] %vm2407_vm5, %v2610_v9  ;;  %v2952_v0 = vpop.f32.mrf.mxu1 }
 0x730   :  { %v2978_v23 = vpop.f32.mrf.mxu0 }
 0x731   :  { %3272 = shalt.err (!%p3269_p8)
}
 0x732   :  { %2644 = dma.vmem_to_hbm [thread:$0]  %s2642_s29, 64, %s4736_s18, [#allocation21]  }
 0x799   :  { %v2520_v1 = vpop.f32.mrf.mxu1 }
 0x79a   :  { %2680 = vst.msk [vmem:[%s4737_s19 + $0x4] sm:$0xf] %vm2407_vm5, %v2520_v1 }
 0x79b   :  { %v2959_v24 = vpop.f32.mrf.mxu1 }
 0x79c   :  { %3293 = dma.done.wait [#allocation4], 64  }
 0x79d   :  { %3294 = vsyncadd [#allocation4], 4294967232 }
 0x79e   :  { %3295 = dma.done.wait [#allocation21], 128  }
 0x79f   :  { %3296 = vsyncadd [#allocation21], 4294967168 }
 0x7a0   :  { %2658 = vsyncpa [#allocation3], 1 }
 0x7a1   :  { %2659 = vsyncpa [#allocation6], 1 }
 0x7a2   :  { %2660 = vsyncpa [#allocation9], 1 }
 0x7a3   :  { %2661 = vsyncpa [#allocation12], 1 }
 0x7a4   :  { %2662 = vsyncpa [#allocation15], 1 }
 0x7a5   :  { %2663 = vsyncpa [#allocation18], 1 }
 0x7a6   :  { %2664 = vsyncpa [#allocation4], 1 }
 0x7a7   :  { %2665 = vsyncpa [#allocation21], 1 }

</bundles_post_ra>
